<compile_context>
chip_gen: v5e
topology: v5e:2x2
jax: 0.10.0
libtpu: 0.0.40
codegen_flags: <defaults>
</compile_context>

<pallas_src>
import math
from functools import partial

import jax
import jax.numpy as jnp
from jax.experimental import pallas as pl
from jax.experimental.pallas import tpu as pltpu

NEG_INF = jnp.float32(-1e30)   # finite "minus infinity" for additive masks


# ----------------------------------------------------------------------------
# Fused decoder-layer kernel: self-attn + LN1 + cross-attn + LN2 + FFN + LN3.
# One grid step per batch element; all layer weights resident in VMEM.
# ----------------------------------------------------------------------------
def _decoder_layer_kernel(
    y_ref, mem_ref, sbias_ref, mbias_ref,
    sa_wqkv_ref, sa_bqkv_ref, sa_wo_ref, sa_bo_ref,
    ca_wq_ref, ca_bq_ref, ca_wkv_ref, ca_bkv_ref, ca_wo_ref, ca_bo_ref,
    w1_ref, b1_ref, w2_ref, b2_ref,
    ln1g_ref, ln1b_ref, ln2g_ref, ln2b_ref, ln3g_ref, ln3b_ref,
    o_ref, *, nhead, eps):
  D = y_ref.shape[-1]
  dh = D // nhead
  scale = 1.0 / math.sqrt(dh)

  y = y_ref[0].astype(jnp.float32)     # (S_t, D) residual stream, f32
  mem = mem_ref[0]                     # (S_s, D) bf16

  def layer_norm(x, g_ref, b_ref):
    mu = jnp.mean(x, axis=-1, keepdims=True)
    var = jnp.mean(jnp.square(x - mu), axis=-1, keepdims=True)
    return (x - mu) * jax.lax.rsqrt(var + eps) * g_ref[...] + b_ref[...]

  def attend_project(q, k, v, bias, wo_ref, bo_ref):
    # q:(S_q,D) k,v:(S_k,D) f32; bias broadcastable to (S_q,S_k) f32.
    # wo_ref:(H,dh,D) bf16. Returns concat_h(softmax(q_h k_h^T)v_h) @ Wo + bo
    # without ever materializing the head-concat (per-head Wo-chunk accumulate).
    S_q = q.shape[0]
    out = jnp.zeros((S_q, D), jnp.float32) + bo_ref[...]
    for h in range(nhead):                       # static unroll over heads
      lo, hi = h * dh, (h + 1) * dh
      q_h = q[:, lo:hi].astype(jnp.bfloat16)
      k_h = k[:, lo:hi].astype(jnp.bfloat16)
      v_h = v[:, lo:hi].astype(jnp.bfloat16)
      # contract last axes directly (no explicit K transpose before the MXU)
      s = jax.lax.dot_general(q_h, k_h, (((1,), (1,)), ((), ())),
                              preferred_element_type=jnp.float32)  # (S_q,S_k)
      s = s * scale + bias
      m = jnp.max(s, axis=-1, keepdims=True)
      p = jnp.exp(s - m)
      l = jnp.sum(p, axis=-1, keepdims=True)
      p = (p * pl.reciprocal(l, approx=True)).astype(jnp.bfloat16)  # EUP recip
      ctx_h = jnp.dot(p, v_h, preferred_element_type=jnp.float32)   # (S_q,dh)
      out = out + jnp.dot(ctx_h.astype(jnp.bfloat16), wo_ref[h],
                          preferred_element_type=jnp.float32)
    return out

  # ---- masked self-attention (packed QKV) + residual + LN1 ----
  qkv = jnp.dot(y.astype(jnp.bfloat16), sa_wqkv_ref[...],
                preferred_element_type=jnp.float32) + sa_bqkv_ref[...]
  q, k, v = qkv[:, :D], qkv[:, D:2 * D], qkv[:, 2 * D:]
  sa = attend_project(q, k, v, sbias_ref[0], sa_wo_ref, sa_bo_ref)
  y = layer_norm(y + sa, ln1g_ref, ln1b_ref)

  # ---- cross-attention over the memory (packed KV) + residual + LN2 ----
  q = jnp.dot(y.astype(jnp.bfloat16), ca_wq_ref[...],
              preferred_element_type=jnp.float32) + ca_bq_ref[...]
  kv = jnp.dot(mem, ca_wkv_ref[...],
               preferred_element_type=jnp.float32) + ca_bkv_ref[...]
  k, v = kv[:, :D], kv[:, D:]
  ca = attend_project(q, k, v, mbias_ref[0], ca_wo_ref, ca_bo_ref)
  y = layer_norm(y + ca, ln2g_ref, ln2b_ref)

  # ---- FFN: linear1 + ReLU + linear2 fused, + residual + LN3 ----
  h1 = jnp.dot(y.astype(jnp.bfloat16), w1_ref[...],
               preferred_element_type=jnp.float32) + b1_ref[...]
  h1 = jnp.maximum(h1, 0.0).astype(jnp.bfloat16)
  ff = jnp.dot(h1, w2_ref[...], preferred_element_type=jnp.float32) + b2_ref[...]
  y = layer_norm(y + ff, ln3g_ref, ln3b_ref)

  o_ref[0] = y.astype(o_ref.dtype)


def fused_decoder_layer(y, mem, self_bias, mem_bias, lp, *, nhead, eps=1e-5):
  """y:(B,S_t,D) f32, mem:(B,S_s,D) bf16, self_bias:(B,S_t,S_t), mem_bias:(B,1,S_s)."""
  B, S_t, D = y.shape
  S_s = mem.shape[1]

  def batch3(shape):
    return pl.BlockSpec(shape, lambda b: (b, 0, 0))

  def const(shape):
    if len(shape) == 2:
      return pl.BlockSpec(shape, lambda b: (0, 0))
    return pl.BlockSpec(shape, lambda b: (0, 0, 0))

  in_specs = [
      batch3((1, S_t, D)),                 # y
      batch3((1, S_s, D)),                 # memory
      batch3((1, S_t, S_t)),               # self-attn additive bias (per batch)
      batch3((1, 1, S_s)),                 # cross-attn additive bias (key-only)
      const(lp["sa_wqkv"].shape), const(lp["sa_bqkv"].shape),
      const(lp["sa_wo"].shape),   const(lp["sa_bo"].shape),
      const(lp["ca_wq"].shape),   const(lp["ca_bq"].shape),
      const(lp["ca_wkv"].shape),  const(lp["ca_bkv"].shape),
      const(lp["ca_wo"].shape),   const(lp["ca_bo"].shape),
      const(lp["w1"].shape), const(lp["b1"].shape),
      const(lp["w2"].shape), const(lp["b2"].shape),
      const(lp["ln1_g"].shape), const(lp["ln1_b"].shape),
      const(lp["ln2_g"].shape), const(lp["ln2_b"].shape),
      const(lp["ln3_g"].shape), const(lp["ln3_b"].shape),
  ]
  return pl.pallas_call(
      partial(_decoder_layer_kernel, nhead=nhead, eps=eps),
      out_shape=jax.ShapeDtypeStruct((B, S_t, D), jnp.float32),
      grid=(B,),
      in_specs=in_specs,
      out_specs=pl.BlockSpec((1, S_t, D), lambda b: (b, 0, 0)),
      compiler_params=pltpu.CompilerParams(
          dimension_semantics=("parallel",)),   # shards batch across TCs on v7x
  )(y, mem, self_bias, mem_bias,
    lp["sa_wqkv"], lp["sa_bqkv"], lp["sa_wo"], lp["sa_bo"],
    lp["ca_wq"], lp["ca_bq"], lp["ca_wkv"], lp["ca_bkv"],
    lp["ca_wo"], lp["ca_bo"],
    lp["w1"], lp["b1"], lp["w2"], lp["b2"],
    lp["ln1_g"], lp["ln1_b"], lp["ln2_g"], lp["ln2_b"],
    lp["ln3_g"], lp["ln3_b"])


# ----------------------------------------------------------------------------
# Tiled output projection: bf16 matmul, f32 accumulator scratch, K-axis grid.
# ----------------------------------------------------------------------------
def _linear_kernel(x_ref, w_ref, b_ref, o_ref, acc_ref):
  @pl.when(pl.program_id(2) == 0)
  def _():
    acc_ref[...] = jnp.zeros_like(acc_ref)

  acc_ref[...] += jnp.dot(x_ref[...], w_ref[...],
                          preferred_element_type=jnp.float32)

  @pl.when(pl.program_id(2) == pl.num_programs(2) - 1)
  def _():
    o_ref[...] = (acc_ref[...] + b_ref[...]).astype(o_ref.dtype)


def pallas_linear(x, w, b, *, tm=256, tn=256, tk=512):
  """x:(M,K) float, w:(K,N) bf16, b:(1,N) f32 -> (M,N) f32."""
  M, K = x.shape
  N = w.shape[1]
  tm = tm if M % tm == 0 else M     # fall back to full dim for small/odd sizes
  tn = tn if N % tn == 0 else N
  tk = tk if K % tk == 0 else K
  return pl.pallas_call(
      _linear_kernel,
      out_shape=jax.ShapeDtypeStruct((M, N), jnp.float32),
      grid=(M // tm, N // tn, K // tk),
      in_specs=[
          pl.BlockSpec((tm, tk), lambda i, j, k: (i, k)),
          pl.BlockSpec((tk, tn), lambda i, j, k: (k, j)),
          pl.BlockSpec((1, tn), lambda i, j, k: (0, j)),
      ],
      out_specs=pl.BlockSpec((tm, tn), lambda i, j, k: (i, j)),
      scratch_shapes=[pltpu.VMEM((tm, tn), jnp.float32)],
      compiler_params=pltpu.CompilerParams(
          dimension_semantics=("parallel", "parallel", "arbitrary")),
  )(x.astype(jnp.bfloat16), w, b)


# ----------------------------------------------------------------------------
# Forward pass matching SwipeCurveTransformerDecoderv1.forward (dropout = id)
# ----------------------------------------------------------------------------
def swipe_decoder_forward(params, x, memory, tgt_mask,
                          memory_key_padding_mask, tgt_key_padding_mask,
                          *, nhead):
  S_t, B, D = x.shape

  y = jnp.transpose(x, (1, 0, 2)).astype(jnp.float32)            # (B, S_t, D)
  mem = jnp.transpose(memory, (1, 0, 2)).astype(jnp.bfloat16)    # (B, S_s, D)

  # self-attn additive bias = causal tgt_mask + target key padding (per batch,
  # NOT broadcast over heads); -inf entries are mapped to a finite -1e30 and
  # the sum is clamped so fully-masked entries never produce NaN/inf.
  causal = jnp.nan_to_num(tgt_mask.astype(jnp.float32),
                          neginf=float(NEG_INF), posinf=0.0)       # (S_t, S_t)
  tgt_pad = jnp.where(tgt_key_padding_mask[:, None, :], NEG_INF, 0.0)
  self_bias = jnp.maximum(causal[None, :, :] + tgt_pad, NEG_INF)   # (B,S_t,S_t)
  # cross-attn bias depends only on the memory key position -> (B, 1, S_s)
  mem_bias = jnp.where(memory_key_padding_mask[:, None, :], NEG_INF,
                       0.0).astype(jnp.float32)

  for lp in params["layers"]:
    y = fused_decoder_layer(y, mem, self_bias, mem_bias, lp, nhead=nhead)

  n_classes = params["out_w"].shape[1]
  logits = pallas_linear(y.reshape(B * S_t, D), params["out_w"], params["out_b"])
  return logits.reshape(B, S_t, n_classes).transpose(1, 0, 2)      # (S_t,B,C)


# ----------------------------------------------------------------------------
# Deterministic parameter init (weights stored bf16 for MXU, biases/LN f32)
# ----------------------------------------------------------------------------
def init_params(key, d_model, nhead, d_ff, n_classes, n_layers):
  keys = iter(jax.random.split(key, 8 * n_layers + 2))
  dh = d_model // nhead

  def w(shape, scale=0.02):
    return (jax.random.normal(next(keys), shape, jnp.float32) * scale
            ).astype(jnp.bfloat16)

  def zeros(n):
    return jnp.zeros((1, n), jnp.float32)

  def ones(n):
    return jnp.ones((1, n), jnp.float32)

  def layer():
    return dict(
        sa_wqkv=w((d_model, 3 * d_model)), sa_bqkv=zeros(3 * d_model),
        sa_wo=w((d_model, d_model)).reshape(nhead, dh, d_model),
        sa_bo=zeros(d_model),
        ca_wq=w((d_model, d_model)), ca_bq=zeros(d_model),
        ca_wkv=w((d_model, 2 * d_model)), ca_bkv=zeros(2 * d_model),
        ca_wo=w((d_model, d_model)).reshape(nhead, dh, d_model),
        ca_bo=zeros(d_model),
        w1=w((d_model, d_ff)), b1=zeros(d_ff),
        w2=w((d_ff, d_model)), b2=zeros(d_model),
        ln1_g=ones(d_model), ln1_b=zeros(d_model),
        ln2_g=ones(d_model), ln2_b=zeros(d_model),
        ln3_g=ones(d_model), ln3_b=zeros(d_model),
    )

  return dict(
      layers=[layer() for _ in range(n_layers)],
      out_w=w((d_model, n_classes)),
      out_b=zeros(n_classes),
  )


# ----------------------------------------------------------------------------
if __name__ == "__main__":
  B = 2
  S_TGT = 8          # decoded character positions
  S_SRC = 16         # swipe-curve memory length
  D_MODEL = 128      # char_emb_size (lane-dense)
  NHEAD = 4
  D_FF = 256         # dim_feedforward
  N_CLASSES = 128    # n_classes (kept lane-dense)
  N_LAYERS = 2       # num_decoder_layers
  # TODO(synk): dropout is omitted (inference-mode identity).

  root = jax.random.PRNGKey(0)
  kp, kx, km = jax.random.split(root, 3)

  params = init_params(kp, D_MODEL, NHEAD, D_FF, N_CLASSES, N_LAYERS)

  x = jax.random.normal(kx, (S_TGT, B, D_MODEL), jnp.float32)       # tgt embeddings
  memory = jax.random.normal(km, (S_SRC, B, D_MODEL), jnp.float32)  # encoded swipe

  # causal mask exactly like torch's generate_square_subsequent_mask (0 / -inf)
  idx = jnp.arange(S_TGT)
  tgt_mask = jnp.where(idx[None, :] > idx[:, None], -jnp.inf, 0.0).astype(jnp.float32)

  # key padding masks: True = padded (trailing padding; position 0 never padded)
  src_lens = jnp.array([S_SRC, S_SRC - 5], jnp.int32)
  tgt_lens = jnp.array([S_TGT, S_TGT - 3], jnp.int32)
  memory_key_padding_mask = jnp.arange(S_SRC)[None, :] >= src_lens[:, None]
  tgt_key_padding_mask = jnp.arange(S_TGT)[None, :] >= tgt_lens[:, None]

  fwd = jax.jit(partial(swipe_decoder_forward, nhead=NHEAD))
  out = fwd(params, x, memory, tgt_mask,
            memory_key_padding_mask, tgt_key_padding_mask)
  out = jax.block_until_ready(out)

  assert out.shape == (S_TGT, B, N_CLASSES), out.shape
  assert bool(jnp.all(jnp.isfinite(out)))
  print("KERNEL_OK")
</pallas_src>

<mosaic_0001>
module attributes {stable_mosaic.version = 11 : i64} {
  func.func @_linear_kernel(%arg0: i32, %arg1: i32, %arg2: i32, %arg3: memref<16x128xbf16, #tpu.memory_space<vmem>>, %arg4: memref<128x128xbf16, #tpu.memory_space<vmem>>, %arg5: memref<1x128xf32, #tpu.memory_space<vmem>>, %arg6: memref<16x128xf32, #tpu.memory_space<vmem>>, %arg7: memref<16x128xf32, #tpu.memory_space<vmem>>) attributes {dimension_semantics = [#tpu.dimension_semantics<parallel>, #tpu.dimension_semantics<parallel>, #tpu.dimension_semantics<arbitrary>], iteration_bounds = array<i64: 1, 1, 1>, scalar_prefetch = 0 : i64, scratch_operands = 1 : i64, tpu.core_type = #tpu.core_type<tc>, window_params = [{transform_indices = @transform_0, window_bounds = array<i64: 16, 128>}, {transform_indices = @transform_1, window_bounds = array<i64: 128, 128>}, {transform_indices = @transform_2, window_bounds = array<i64: 1, 128>}, {transform_indices = @transform_3, window_bounds = array<i64: 16, 128>}]} {
    %c0_i32 = arith.constant 0 : i32
    %0 = arith.cmpi eq, %arg2, %c0_i32 : i32
    %1 = arith.extui %0 : i1 to i32
    %c0_i32_0 = arith.constant 0 : i32
    %2 = arith.cmpi ne, %1, %c0_i32_0 : i32
    scf.if %2 {
      %cst_10 = arith.constant 0.000000e+00 : f32
      %12 = vector.broadcast %cst_10 : f32 to vector<16x128xf32>
      %c0_11 = arith.constant 0 : index
      %c0_12 = arith.constant 0 : index
      %13 = vector.load %arg7[%c0_11, %c0_12] : memref<16x128xf32, #tpu.memory_space<vmem>>, vector<16x128xf32>
      tpu.vector_store %arg7[%c0_11, %c0_12], %12 {strides = array<i32>} : memref<16x128xf32, #tpu.memory_space<vmem>>, vector<16x128xf32>,
    } else {
    }
    %c0 = arith.constant 0 : index
    %c0_1 = arith.constant 0 : index
    %3 = vector.load %arg7[%c0, %c0_1] : memref<16x128xf32, #tpu.memory_space<vmem>>, vector<16x128xf32>
    %c0_2 = arith.constant 0 : index
    %c0_3 = arith.constant 0 : index
    %4 = vector.load %arg3[%c0_2, %c0_3] : memref<16x128xbf16, #tpu.memory_space<vmem>>, vector<16x128xbf16>
    %c0_4 = arith.constant 0 : index
    %c0_5 = arith.constant 0 : index
    %5 = vector.load %arg4[%c0_4, %c0_5] : memref<128x128xbf16, #tpu.memory_space<vmem>>, vector<128x128xbf16>
    %cst = arith.constant dense<0.000000e+00> : vector<16x128xf32>
    %6 = tpu.matmul %4, %5, %cst {dimension_numbers = #tpu.dot_dimension_numbers<[1], [0], [0], [1], [0, 0, 1, 1], [], []>} : vector<16x128xbf16>, vector<128x128xbf16>, vector<16x128xf32> -> vector<16x128xf32>
    %7 = arith.addf %3, %6 : vector<16x128xf32>
    %c0_6 = arith.constant 0 : index
    %c0_7 = arith.constant 0 : index
    %8 = vector.load %arg7[%c0_6, %c0_7] : memref<16x128xf32, #tpu.memory_space<vmem>>, vector<16x128xf32>
    tpu.vector_store %arg7[%c0_6, %c0_7], %7 {strides = array<i32>} : memref<16x128xf32, #tpu.memory_space<vmem>>, vector<16x128xf32>,
    %c0_i32_8 = arith.constant 0 : i32
    %9 = arith.cmpi eq, %arg2, %c0_i32_8 : i32
    %10 = arith.extui %9 : i1 to i32
    %c0_i32_9 = arith.constant 0 : i32
    %11 = arith.cmpi ne, %10, %c0_i32_9 : i32
    scf.if %11 {
      %c0_10 = arith.constant 0 : index
      %c0_11 = arith.constant 0 : index
      %12 = vector.load %arg7[%c0_10, %c0_11] : memref<16x128xf32, #tpu.memory_space<vmem>>, vector<16x128xf32>
      %c0_12 = arith.constant 0 : index
      %c0_13 = arith.constant 0 : index
      %13 = vector.load %arg5[%c0_12, %c0_13] : memref<1x128xf32, #tpu.memory_space<vmem>>, vector<1x128xf32>
      %14 = vector.broadcast %13 : vector<1x128xf32> to vector<16x128xf32>
      %15 = arith.addf %12, %14 : vector<16x128xf32>
      %c0_14 = arith.constant 0 : index
      %c0_15 = arith.constant 0 : index
      %16 = vector.load %arg6[%c0_14, %c0_15] : memref<16x128xf32, #tpu.memory_space<vmem>>, vector<16x128xf32>
      tpu.vector_store %arg6[%c0_14, %c0_15], %15 {strides = array<i32>} : memref<16x128xf32, #tpu.memory_space<vmem>>, vector<16x128xf32>,
    } else {
    }
    return
  }
  func.func @transform_0(%arg0: i32, %arg1: i32, %arg2: i32) -> (i32, i32) {
    %c0_i32 = arith.constant 0 : i32
    return %arg0, %arg2 : i32, i32
  }
  func.func @transform_1(%arg0: i32, %arg1: i32, %arg2: i32) -> (i32, i32) {
    %c0_i32 = arith.constant 0 : i32
    return %arg2, %arg1 : i32, i32
  }
  func.func @transform_2(%arg0: i32, %arg1: i32, %arg2: i32) -> (i32, i32) {
    %c0_i32 = arith.constant 0 : i32
    %c0_i32_0 = arith.constant 0 : i32
    return %c0_i32, %arg1 : i32, i32
  }
  func.func @transform_3(%arg0: i32, %arg1: i32, %arg2: i32) -> (i32, i32) {
    %c0_i32 = arith.constant 0 : i32
    return %arg0, %arg1 : i32, i32
  }
}

module attributes {stable_mosaic.version = 11 : i64} {
  func.func @_decoder_layer_kernel(%arg0: i32, %arg1: memref<1x8x128xf32, #tpu.memory_space<vmem>>, %arg2: memref<1x16x128xbf16, #tpu.memory_space<vmem>>, %arg3: memref<1x8x8xf32, #tpu.memory_space<vmem>>, %arg4: memref<1x1x16xf32, #tpu.memory_space<vmem>>, %arg5: memref<128x384xbf16, #tpu.memory_space<vmem>>, %arg6: memref<1x384xf32, #tpu.memory_space<vmem>>, %arg7: memref<4x32x128xbf16, #tpu.memory_space<vmem>>, %arg8: memref<1x128xf32, #tpu.memory_space<vmem>>, %arg9: memref<128x128xbf16, #tpu.memory_space<vmem>>, %arg10: memref<1x128xf32, #tpu.memory_space<vmem>>, %arg11: memref<128x256xbf16, #tpu.memory_space<vmem>>, %arg12: memref<1x256xf32, #tpu.memory_space<vmem>>, %arg13: memref<4x32x128xbf16, #tpu.memory_space<vmem>>, %arg14: memref<1x128xf32, #tpu.memory_space<vmem>>, %arg15: memref<128x256xbf16, #tpu.memory_space<vmem>>, %arg16: memref<1x256xf32, #tpu.memory_space<vmem>>, %arg17: memref<256x128xbf16, #tpu.memory_space<vmem>>, %arg18: memref<1x128xf32, #tpu.memory_space<vmem>>, %arg19: memref<1x128xf32, #tpu.memory_space<vmem>>, %arg20: memref<1x128xf32, #tpu.memory_space<vmem>>, %arg21: memref<1x128xf32, #tpu.memory_space<vmem>>, %arg22: memref<1x128xf32, #tpu.memory_space<vmem>>, %arg23: memref<1x128xf32, #tpu.memory_space<vmem>>, %arg24: memref<1x128xf32, #tpu.memory_space<vmem>>, %arg25: memref<1x8x128xf32, #tpu.memory_space<vmem>>) attributes {dimension_semantics = [#tpu.dimension_semantics<parallel>], iteration_bounds = array<i64: 2>, scalar_prefetch = 0 : i64, scratch_operands = 0 : i64, tpu.core_type = #tpu.core_type<tc>, window_params = [{transform_indices = @transform_0, window_bounds = array<i64: 1, 8, 128>}, {transform_indices = @transform_1, window_bounds = array<i64: 1, 16, 128>}, {transform_indices = @transform_2, window_bounds = array<i64: 1, 8, 8>}, {transform_indices = @transform_3, window_bounds = array<i64: 1, 1, 16>}, {pipeline_mode = #tpu.pipeline_mode<synchronous>, transform_indices = @transform_4, window_bounds = array<i64: 128, 384>}, {pipeline_mode = #tpu.pipeline_mode<synchronous>, transform_indices = @transform_5, window_bounds = array<i64: 1, 384>}, {pipeline_mode = #tpu.pipeline_mode<synchronous>, transform_indices = @transform_6, window_bounds = array<i64: 4, 32, 128>}, {pipeline_mode = #tpu.pipeline_mode<synchronous>, transform_indices = @transform_7, window_bounds = array<i64: 1, 128>}, {pipeline_mode = #tpu.pipeline_mode<synchronous>, transform_indices = @transform_8, window_bounds = array<i64: 128, 128>}, {pipeline_mode = #tpu.pipeline_mode<synchronous>, transform_indices = @transform_9, window_bounds = array<i64: 1, 128>}, {pipeline_mode = #tpu.pipeline_mode<synchronous>, transform_indices = @transform_10, window_bounds = array<i64: 128, 256>}, {pipeline_mode = #tpu.pipeline_mode<synchronous>, transform_indices = @transform_11, window_bounds = array<i64: 1, 256>}, {pipeline_mode = #tpu.pipeline_mode<synchronous>, transform_indices = @transform_12, window_bounds = array<i64: 4, 32, 128>}, {pipeline_mode = #tpu.pipeline_mode<synchronous>, transform_indices = @transform_13, window_bounds = array<i64: 1, 128>}, {pipeline_mode = #tpu.pipeline_mode<synchronous>, transform_indices = @transform_14, window_bounds = array<i64: 128, 256>}, {pipeline_mode = #tpu.pipeline_mode<synchronous>, transform_indices = @transform_15, window_bounds = array<i64: 1, 256>}, {pipeline_mode = #tpu.pipeline_mode<synchronous>, transform_indices = @transform_16, window_bounds = array<i64: 256, 128>}, {pipeline_mode = #tpu.pipeline_mode<synchronous>, transform_indices = @transform_17, window_bounds = array<i64: 1, 128>}, {pipeline_mode = #tpu.pipeline_mode<synchronous>, transform_indices = @transform_18, window_bounds = array<i64: 1, 128>}, {pipeline_mode = #tpu.pipeline_mode<synchronous>, transform_indices = @transform_19, window_bounds = array<i64: 1, 128>}, {pipeline_mode = #tpu.pipeline_mode<synchronous>, transform_indices = @transform_20, window_bounds = array<i64: 1, 128>}, {pipeline_mode = #tpu.pipeline_mode<synchronous>, transform_indices = @transform_21, window_bounds = array<i64: 1, 128>}, {pipeline_mode = #tpu.pipeline_mode<synchronous>, transform_indices = @transform_22, window_bounds = array<i64: 1, 128>}, {pipeline_mode = #tpu.pipeline_mode<synchronous>, transform_indices = @transform_23, window_bounds = array<i64: 1, 128>}, {transform_indices = @transform_24, window_bounds = array<i64: 1, 8, 128>}]} {
    %c0 = arith.constant 0 : index
    %c0_0 = arith.constant 0 : index
    %c0_1 = arith.constant 0 : index
    %0 = vector.load %arg1[%c0, %c0_0, %c0_1] : memref<1x8x128xf32, #tpu.memory_space<vmem>>, vector<1x8x128xf32>
    %1 = vector.shape_cast %0 : vector<1x8x128xf32> to vector<8x128xf32>
    %c0_2 = arith.constant 0 : index
    %c0_3 = arith.constant 0 : index
    %c0_4 = arith.constant 0 : index
    %2 = vector.load %arg2[%c0_2, %c0_3, %c0_4] : memref<1x16x128xbf16, #tpu.memory_space<vmem>>, vector<1x16x128xbf16>
    %3 = vector.shape_cast %2 : vector<1x16x128xbf16> to vector<16x128xbf16>
    %4 = arith.truncf %1 : vector<8x128xf32> to vector<8x128xbf16>
    %c0_5 = arith.constant 0 : index
    %c0_6 = arith.constant 0 : index
    %5 = vector.load %arg5[%c0_5, %c0_6] : memref<128x384xbf16, #tpu.memory_space<vmem>>, vector<128x384xbf16>
    %cst = arith.constant dense<0.000000e+00> : vector<8x384xf32>
    %6 = tpu.matmul %4, %5, %cst {dimension_numbers = #tpu.dot_dimension_numbers<[1], [0], [0], [1], [0, 0, 1, 1], [], []>} : vector<8x128xbf16>, vector<128x384xbf16>, vector<8x384xf32> -> vector<8x384xf32>
    %c0_7 = arith.constant 0 : index
    %c0_8 = arith.constant 0 : index
    %7 = vector.load %arg6[%c0_7, %c0_8] : memref<1x384xf32, #tpu.memory_space<vmem>>, vector<1x384xf32>
    %8 = vector.broadcast %7 : vector<1x384xf32> to vector<8x384xf32>
    %9 = arith.addf %6, %8 : vector<8x384xf32>
    %10 = vector.extract_strided_slice %9 {offsets = [0, 0], sizes = [8, 128], strides = [1, 1]} : vector<8x384xf32> to vector<8x128xf32>
    %11 = vector.extract_strided_slice %9 {offsets = [0, 128], sizes = [8, 128], strides = [1, 1]} : vector<8x384xf32> to vector<8x128xf32>
    %12 = vector.extract_strided_slice %9 {offsets = [0, 256], sizes = [8, 128], strides = [1, 1]} : vector<8x384xf32> to vector<8x128xf32>
    %c0_9 = arith.constant 0 : index
    %c0_10 = arith.constant 0 : index
    %c0_11 = arith.constant 0 : index
    %13 = vector.load %arg3[%c0_9, %c0_10, %c0_11] : memref<1x8x8xf32, #tpu.memory_space<vmem>>, vector<1x8x8xf32>
    %14 = vector.shape_cast %13 : vector<1x8x8xf32> to vector<8x8xf32>
    %cst_12 = arith.constant 0.000000e+00 : f32
    %15 = vector.broadcast %cst_12 : f32 to vector<8x128xf32>
    %c0_13 = arith.constant 0 : index
    %c0_14 = arith.constant 0 : index
    %16 = vector.load %arg8[%c0_13, %c0_14] : memref<1x128xf32, #tpu.memory_space<vmem>>, vector<1x128xf32>
    %17 = vector.broadcast %16 : vector<1x128xf32> to vector<8x128xf32>
    %18 = arith.addf %15, %17 : vector<8x128xf32>
    %19 = vector.extract_strided_slice %10 {offsets = [0, 0], sizes = [8, 32], strides = [1, 1]} : vector<8x128xf32> to vector<8x32xf32>
    %20 = arith.truncf %19 : vector<8x32xf32> to vector<8x32xbf16>
    %21 = vector.extract_strided_slice %11 {offsets = [0, 0], sizes = [8, 32], strides = [1, 1]} : vector<8x128xf32> to vector<8x32xf32>
    %22 = arith.truncf %21 : vector<8x32xf32> to vector<8x32xbf16>
    %23 = vector.extract_strided_slice %12 {offsets = [0, 0], sizes = [8, 32], strides = [1, 1]} : vector<8x128xf32> to vector<8x32xf32>
    %24 = arith.truncf %23 : vector<8x32xf32> to vector<8x32xbf16>
    %cst_15 = arith.constant dense<0.000000e+00> : vector<8x8xf32>
    %25 = tpu.matmul %20, %22, %cst_15 {dimension_numbers = #tpu.dot_dimension_numbers<[1], [1], [0], [0], [0, 0, 1, 0], [], []>} : vector<8x32xbf16>, vector<8x32xbf16>, vector<8x8xf32> -> vector<8x8xf32>
    %cst_16 = arith.constant 0.176776692 : f32
    %26 = vector.broadcast %cst_16 : f32 to vector<8x8xf32>
    %27 = arith.mulf %25, %26 : vector<8x8xf32>
    %28 = arith.addf %27, %14 : vector<8x8xf32>
    %cst_17 = arith.constant dense<0xFF800000> : vector<8xf32>
    %29 = vector.multi_reduction <maximumf>, %28, %cst_17 [1] : vector<8x8xf32> to vector<8xf32>
    %30 = vector.shape_cast %29 : vector<8xf32> to vector<8x1xf32>
    %31 = vector.broadcast %30 : vector<8x1xf32> to vector<8x8xf32>
    %32 = arith.subf %28, %31 : vector<8x8xf32>
    %33 = math.exp %32 : vector<8x8xf32>
    %cst_18 = arith.constant dense<0.000000e+00> : vector<8xf32>
    %34 = vector.multi_reduction <add>, %33, %cst_18 [1] : vector<8x8xf32> to vector<8xf32>
    %35 = vector.shape_cast %34 : vector<8xf32> to vector<8x1xf32>
    %36 = tpu.reciprocal %35 {approx = true} : vector<8x1xf32> -> vector<8x1xf32>
    %37 = vector.broadcast %36 : vector<8x1xf32> to vector<8x8xf32>
    %38 = arith.mulf %33, %37 : vector<8x8xf32>
    %39 = arith.truncf %38 : vector<8x8xf32> to vector<8x8xbf16>
    %cst_19 = arith.constant dense<0.000000e+00> : vector<8x32xf32>
    %40 = tpu.matmul %39, %24, %cst_19 {dimension_numbers = #tpu.dot_dimension_numbers<[1], [0], [0], [1], [0, 0, 1, 1], [], []>} : vector<8x8xbf16>, vector<8x32xbf16>, vector<8x32xf32> -> vector<8x32xf32>
    %41 = arith.truncf %40 : vector<8x32xf32> to vector<8x32xbf16>
    %c0_20 = arith.constant 0 : index
    %c0_21 = arith.constant 0 : index
    %c0_22 = arith.constant 0 : index
    %42 = vector.load %arg7[%c0_20, %c0_21, %c0_22] : memref<4x32x128xbf16, #tpu.memory_space<vmem>>, vector<1x32x128xbf16>
    %43 = vector.shape_cast %42 : vector<1x32x128xbf16> to vector<32x128xbf16>
    %cst_23 = arith.constant dense<0.000000e+00> : vector<8x128xf32>
    %44 = tpu.matmul %41, %43, %cst_23 {dimension_numbers = #tpu.dot_dimension_numbers<[1], [0], [0], [1], [0, 0, 1, 1], [], []>} : vector<8x32xbf16>, vector<32x128xbf16>, vector<8x128xf32> -> vector<8x128xf32>
    %45 = arith.addf %18, %44 : vector<8x128xf32>
    %46 = vector.extract_strided_slice %10 {offsets = [0, 32], sizes = [8, 32], strides = [1, 1]} : vector<8x128xf32> to vector<8x32xf32>
    %47 = arith.truncf %46 : vector<8x32xf32> to vector<8x32xbf16>
    %48 = vector.extract_strided_slice %11 {offsets = [0, 32], sizes = [8, 32], strides = [1, 1]} : vector<8x128xf32> to vector<8x32xf32>
    %49 = arith.truncf %48 : vector<8x32xf32> to vector<8x32xbf16>
    %50 = vector.extract_strided_slice %12 {offsets = [0, 32], sizes = [8, 32], strides = [1, 1]} : vector<8x128xf32> to vector<8x32xf32>
    %51 = arith.truncf %50 : vector<8x32xf32> to vector<8x32xbf16>
    %cst_24 = arith.constant dense<0.000000e+00> : vector<8x8xf32>
    %52 = tpu.matmul %47, %49, %cst_24 {dimension_numbers = #tpu.dot_dimension_numbers<[1], [1], [0], [0], [0, 0, 1, 0], [], []>} : vector<8x32xbf16>, vector<8x32xbf16>, vector<8x8xf32> -> vector<8x8xf32>
    %cst_25 = arith.constant 0.176776692 : f32
    %53 = vector.broadcast %cst_25 : f32 to vector<8x8xf32>
    %54 = arith.mulf %52, %53 : vector<8x8xf32>
    %55 = arith.addf %54, %14 : vector<8x8xf32>
    %cst_26 = arith.constant dense<0xFF800000> : vector<8xf32>
    %56 = vector.multi_reduction <maximumf>, %55, %cst_26 [1] : vector<8x8xf32> to vector<8xf32>
    %57 = vector.shape_cast %56 : vector<8xf32> to vector<8x1xf32>
    %58 = vector.broadcast %57 : vector<8x1xf32> to vector<8x8xf32>
    %59 = arith.subf %55, %58 : vector<8x8xf32>
    %60 = math.exp %59 : vector<8x8xf32>
    %cst_27 = arith.constant dense<0.000000e+00> : vector<8xf32>
    %61 = vector.multi_reduction <add>, %60, %cst_27 [1] : vector<8x8xf32> to vector<8xf32>
    %62 = vector.shape_cast %61 : vector<8xf32> to vector<8x1xf32>
    %63 = tpu.reciprocal %62 {approx = true} : vector<8x1xf32> -> vector<8x1xf32>
    %64 = vector.broadcast %63 : vector<8x1xf32> to vector<8x8xf32>
    %65 = arith.mulf %60, %64 : vector<8x8xf32>
    %66 = arith.truncf %65 : vector<8x8xf32> to vector<8x8xbf16>
    %cst_28 = arith.constant dense<0.000000e+00> : vector<8x32xf32>
    %67 = tpu.matmul %66, %51, %cst_28 {dimension_numbers = #tpu.dot_dimension_numbers<[1], [0], [0], [1], [0, 0, 1, 1], [], []>} : vector<8x8xbf16>, vector<8x32xbf16>, vector<8x32xf32> -> vector<8x32xf32>
    %68 = arith.truncf %67 : vector<8x32xf32> to vector<8x32xbf16>
    %c1 = arith.constant 1 : index
    %c0_29 = arith.constant 0 : index
    %c0_30 = arith.constant 0 : index
    %69 = vector.load %arg7[%c1, %c0_29, %c0_30] : memref<4x32x128xbf16, #tpu.memory_space<vmem>>, vector<1x32x128xbf16>
    %70 = vector.shape_cast %69 : vector<1x32x128xbf16> to vector<32x128xbf16>
    %cst_31 = arith.constant dense<0.000000e+00> : vector<8x128xf32>
    %71 = tpu.matmul %68, %70, %cst_31 {dimension_numbers = #tpu.dot_dimension_numbers<[1], [0], [0], [1], [0, 0, 1, 1], [], []>} : vector<8x32xbf16>, vector<32x128xbf16>, vector<8x128xf32> -> vector<8x128xf32>
    %72 = arith.addf %45, %71 : vector<8x128xf32>
    %73 = vector.extract_strided_slice %10 {offsets = [0, 64], sizes = [8, 32], strides = [1, 1]} : vector<8x128xf32> to vector<8x32xf32>
    %74 = arith.truncf %73 : vector<8x32xf32> to vector<8x32xbf16>
    %75 = vector.extract_strided_slice %11 {offsets = [0, 64], sizes = [8, 32], strides = [1, 1]} : vector<8x128xf32> to vector<8x32xf32>
    %76 = arith.truncf %75 : vector<8x32xf32> to vector<8x32xbf16>
    %77 = vector.extract_strided_slice %12 {offsets = [0, 64], sizes = [8, 32], strides = [1, 1]} : vector<8x128xf32> to vector<8x32xf32>
    %78 = arith.truncf %77 : vector<8x32xf32> to vector<8x32xbf16>
    %cst_32 = arith.constant dense<0.000000e+00> : vector<8x8xf32>
    %79 = tpu.matmul %74, %76, %cst_32 {dimension_numbers = #tpu.dot_dimension_numbers<[1], [1], [0], [0], [0, 0, 1, 0], [], []>} : vector<8x32xbf16>, vector<8x32xbf16>, vector<8x8xf32> -> vector<8x8xf32>
    %cst_33 = arith.constant 0.176776692 : f32
    %80 = vector.broadcast %cst_33 : f32 to vector<8x8xf32>
    %81 = arith.mulf %79, %80 : vector<8x8xf32>
    %82 = arith.addf %81, %14 : vector<8x8xf32>
    %cst_34 = arith.constant dense<0xFF800000> : vector<8xf32>
    %83 = vector.multi_reduction <maximumf>, %82, %cst_34 [1] : vector<8x8xf32> to vector<8xf32>
    %84 = vector.shape_cast %83 : vector<8xf32> to vector<8x1xf32>
    %85 = vector.broadcast %84 : vector<8x1xf32> to vector<8x8xf32>
    %86 = arith.subf %82, %85 : vector<8x8xf32>
    %87 = math.exp %86 : vector<8x8xf32>
    %cst_35 = arith.constant dense<0.000000e+00> : vector<8xf32>
    %88 = vector.multi_reduction <add>, %87, %cst_35 [1] : vector<8x8xf32> to vector<8xf32>
    %89 = vector.shape_cast %88 : vector<8xf32> to vector<8x1xf32>
    %90 = tpu.reciprocal %89 {approx = true} : vector<8x1xf32> -> vector<8x1xf32>
    %91 = vector.broadcast %90 : vector<8x1xf32> to vector<8x8xf32>
    %92 = arith.mulf %87, %91 : vector<8x8xf32>
    %93 = arith.truncf %92 : vector<8x8xf32> to vector<8x8xbf16>
    %cst_36 = arith.constant dense<0.000000e+00> : vector<8x32xf32>
    %94 = tpu.matmul %93, %78, %cst_36 {dimension_numbers = #tpu.dot_dimension_numbers<[1], [0], [0], [1], [0, 0, 1, 1], [], []>} : vector<8x8xbf16>, vector<8x32xbf16>, vector<8x32xf32> -> vector<8x32xf32>
    %95 = arith.truncf %94 : vector<8x32xf32> to vector<8x32xbf16>
    %c2 = arith.constant 2 : index
    %c0_37 = arith.constant 0 : index
    %c0_38 = arith.constant 0 : index
    %96 = vector.load %arg7[%c2, %c0_37, %c0_38] : memref<4x32x128xbf16, #tpu.memory_space<vmem>>, vector<1x32x128xbf16>
    %97 = vector.shape_cast %96 : vector<1x32x128xbf16> to vector<32x128xbf16>
    %cst_39 = arith.constant dense<0.000000e+00> : vector<8x128xf32>
    %98 = tpu.matmul %95, %97, %cst_39 {dimension_numbers = #tpu.dot_dimension_numbers<[1], [0], [0], [1], [0, 0, 1, 1], [], []>} : vector<8x32xbf16>, vector<32x128xbf16>, vector<8x128xf32> -> vector<8x128xf32>
    %99 = arith.addf %72, %98 : vector<8x128xf32>
    %100 = vector.extract_strided_slice %10 {offsets = [0, 96], sizes = [8, 32], strides = [1, 1]} : vector<8x128xf32> to vector<8x32xf32>
    %101 = arith.truncf %100 : vector<8x32xf32> to vector<8x32xbf16>
    %102 = vector.extract_strided_slice %11 {offsets = [0, 96], sizes = [8, 32], strides = [1, 1]} : vector<8x128xf32> to vector<8x32xf32>
    %103 = arith.truncf %102 : vector<8x32xf32> to vector<8x32xbf16>
    %104 = vector.extract_strided_slice %12 {offsets = [0, 96], sizes = [8, 32], strides = [1, 1]} : vector<8x128xf32> to vector<8x32xf32>
    %105 = arith.truncf %104 : vector<8x32xf32> to vector<8x32xbf16>
    %cst_40 = arith.constant dense<0.000000e+00> : vector<8x8xf32>
    %106 = tpu.matmul %101, %103, %cst_40 {dimension_numbers = #tpu.dot_dimension_numbers<[1], [1], [0], [0], [0, 0, 1, 0], [], []>} : vector<8x32xbf16>, vector<8x32xbf16>, vector<8x8xf32> -> vector<8x8xf32>
    %cst_41 = arith.constant 0.176776692 : f32
    %107 = vector.broadcast %cst_41 : f32 to vector<8x8xf32>
    %108 = arith.mulf %106, %107 : vector<8x8xf32>
    %109 = arith.addf %108, %14 : vector<8x8xf32>
    %cst_42 = arith.constant dense<0xFF800000> : vector<8xf32>
    %110 = vector.multi_reduction <maximumf>, %109, %cst_42 [1] : vector<8x8xf32> to vector<8xf32>
    %111 = vector.shape_cast %110 : vector<8xf32> to vector<8x1xf32>
    %112 = vector.broadcast %111 : vector<8x1xf32> to vector<8x8xf32>
    %113 = arith.subf %109, %112 : vector<8x8xf32>
    %114 = math.exp %113 : vector<8x8xf32>
    %cst_43 = arith.constant dense<0.000000e+00> : vector<8xf32>
    %115 = vector.multi_reduction <add>, %114, %cst_43 [1] : vector<8x8xf32> to vector<8xf32>
    %116 = vector.shape_cast %115 : vector<8xf32> to vector<8x1xf32>
    %117 = tpu.reciprocal %116 {approx = true} : vector<8x1xf32> -> vector<8x1xf32>
    %118 = vector.broadcast %117 : vector<8x1xf32> to vector<8x8xf32>
    %119 = arith.mulf %114, %118 : vector<8x8xf32>
    %120 = arith.truncf %119 : vector<8x8xf32> to vector<8x8xbf16>
    %cst_44 = arith.constant dense<0.000000e+00> : vector<8x32xf32>
    %121 = tpu.matmul %120, %105, %cst_44 {dimension_numbers = #tpu.dot_dimension_numbers<[1], [0], [0], [1], [0, 0, 1, 1], [], []>} : vector<8x8xbf16>, vector<8x32xbf16>, vector<8x32xf32> -> vector<8x32xf32>
    %122 = arith.truncf %121 : vector<8x32xf32> to vector<8x32xbf16>
    %c3 = arith.constant 3 : index
    %c0_45 = arith.constant 0 : index
    %c0_46 = arith.constant 0 : index
    %123 = vector.load %arg7[%c3, %c0_45, %c0_46] : memref<4x32x128xbf16, #tpu.memory_space<vmem>>, vector<1x32x128xbf16>
    %124 = vector.shape_cast %123 : vector<1x32x128xbf16> to vector<32x128xbf16>
    %cst_47 = arith.constant dense<0.000000e+00> : vector<8x128xf32>
    %125 = tpu.matmul %122, %124, %cst_47 {dimension_numbers = #tpu.dot_dimension_numbers<[1], [0], [0], [1], [0, 0, 1, 1], [], []>} : vector<8x32xbf16>, vector<32x128xbf16>, vector<8x128xf32> -> vector<8x128xf32>
    %126 = arith.addf %99, %125 : vector<8x128xf32>
    %127 = arith.addf %1, %126 : vector<8x128xf32>
    %cst_48 = arith.constant dense<0.000000e+00> : vector<8xf32>
    %128 = vector.multi_reduction <add>, %127, %cst_48 [1] : vector<8x128xf32> to vector<8xf32>
    %129 = vector.shape_cast %128 : vector<8xf32> to vector<8x1xf32>
    %cst_49 = arith.constant 1.280000e+02 : f32
    %130 = vector.broadcast %cst_49 : f32 to vector<8x1xf32>
    %131 = arith.divf %129, %130 : vector<8x1xf32>
    %132 = vector.broadcast %131 : vector<8x1xf32> to vector<8x128xf32>
    %133 = arith.subf %127, %132 : vector<8x128xf32>
    %134 = arith.mulf %133, %133 : vector<8x128xf32>
    %cst_50 = arith.constant dense<0.000000e+00> : vector<8xf32>
    %135 = vector.multi_reduction <add>, %134, %cst_50 [1] : vector<8x128xf32> to vector<8xf32>
    %136 = vector.shape_cast %135 : vector<8xf32> to vector<8x1xf32>
    %cst_51 = arith.constant 1.280000e+02 : f32
    %137 = vector.broadcast %cst_51 : f32 to vector<8x1xf32>
    %138 = arith.divf %136, %137 : vector<8x1xf32>
    %139 = vector.broadcast %131 : vector<8x1xf32> to vector<8x128xf32>
    %140 = arith.subf %127, %139 : vector<8x128xf32>
    %cst_52 = arith.constant 9.99999974E-6 : f32
    %141 = vector.broadcast %cst_52 : f32 to vector<8x1xf32>
    %142 = arith.addf %138, %141 : vector<8x1xf32>
    %143 = math.rsqrt %142 : vector<8x1xf32>
    %144 = vector.broadcast %143 : vector<8x1xf32> to vector<8x128xf32>
    %145 = arith.mulf %140, %144 : vector<8x128xf32>
    %c0_53 = arith.constant 0 : index
    %c0_54 = arith.constant 0 : index
    %146 = vector.load %arg19[%c0_53, %c0_54] : memref<1x128xf32, #tpu.memory_space<vmem>>, vector<1x128xf32>
    %147 = vector.broadcast %146 : vector<1x128xf32> to vector<8x128xf32>
    %148 = arith.mulf %145, %147 : vector<8x128xf32>
    %c0_55 = arith.constant 0 : index
    %c0_56 = arith.constant 0 : index
    %149 = vector.load %arg20[%c0_55, %c0_56] : memref<1x128xf32, #tpu.memory_space<vmem>>, vector<1x128xf32>
    %150 = vector.broadcast %149 : vector<1x128xf32> to vector<8x128xf32>
    %151 = arith.addf %148, %150 : vector<8x128xf32>
    %152 = arith.truncf %151 : vector<8x128xf32> to vector<8x128xbf16>
    %c0_57 = arith.constant 0 : index
    %c0_58 = arith.constant 0 : index
    %153 = vector.load %arg9[%c0_57, %c0_58] : memref<128x128xbf16, #tpu.memory_space<vmem>>, vector<128x128xbf16>
    %cst_59 = arith.constant dense<0.000000e+00> : vector<8x128xf32>
    %154 = tpu.matmul %152, %153, %cst_59 {dimension_numbers = #tpu.dot_dimension_numbers<[1], [0], [0], [1], [0, 0, 1, 1], [], []>} : vector<8x128xbf16>, vector<128x128xbf16>, vector<8x128xf32> -> vector<8x128xf32>
    %c0_60 = arith.constant 0 : index
    %c0_61 = arith.constant 0 : index
    %155 = vector.load %arg10[%c0_60, %c0_61] : memref<1x128xf32, #tpu.memory_space<vmem>>, vector<1x128xf32>
    %156 = vector.broadcast %155 : vector<1x128xf32> to vector<8x128xf32>
    %157 = arith.addf %154, %156 : vector<8x128xf32>
    %c0_62 = arith.constant 0 : index
    %c0_63 = arith.constant 0 : index
    %158 = vector.load %arg11[%c0_62, %c0_63] : memref<128x256xbf16, #tpu.memory_space<vmem>>, vector<128x256xbf16>
    %cst_64 = arith.constant dense<0.000000e+00> : vector<16x256xf32>
    %159 = tpu.matmul %3, %158, %cst_64 {dimension_numbers = #tpu.dot_dimension_numbers<[1], [0], [0], [1], [0, 0, 1, 1], [], []>} : vector<16x128xbf16>, vector<128x256xbf16>, vector<16x256xf32> -> vector<16x256xf32>
    %c0_65 = arith.constant 0 : index
    %c0_66 = arith.constant 0 : index
    %160 = vector.load %arg12[%c0_65, %c0_66] : memref<1x256xf32, #tpu.memory_space<vmem>>, vector<1x256xf32>
    %161 = vector.broadcast %160 : vector<1x256xf32> to vector<16x256xf32>
    %162 = arith.addf %159, %161 : vector<16x256xf32>
    %163 = vector.extract_strided_slice %162 {offsets = [0, 0], sizes = [16, 128], strides = [1, 1]} : vector<16x256xf32> to vector<16x128xf32>
    %164 = vector.extract_strided_slice %162 {offsets = [0, 128], sizes = [16, 128], strides = [1, 1]} : vector<16x256xf32> to vector<16x128xf32>
    %c0_67 = arith.constant 0 : index
    %c0_68 = arith.constant 0 : index
    %c0_69 = arith.constant 0 : index
    %165 = vector.load %arg4[%c0_67, %c0_68, %c0_69] : memref<1x1x16xf32, #tpu.memory_space<vmem>>, vector<1x1x16xf32>
    %166 = vector.shape_cast %165 : vector<1x1x16xf32> to vector<1x16xf32>
    %cst_70 = arith.constant 0.000000e+00 : f32
    %167 = vector.broadcast %cst_70 : f32 to vector<8x128xf32>
    %c0_71 = arith.constant 0 : index
    %c0_72 = arith.constant 0 : index
    %168 = vector.load %arg14[%c0_71, %c0_72] : memref<1x128xf32, #tpu.memory_space<vmem>>, vector<1x128xf32>
    %169 = vector.broadcast %168 : vector<1x128xf32> to vector<8x128xf32>
    %170 = arith.addf %167, %169 : vector<8x128xf32>
    %171 = vector.extract_strided_slice %157 {offsets = [0, 0], sizes = [8, 32], strides = [1, 1]} : vector<8x128xf32> to vector<8x32xf32>
    %172 = arith.truncf %171 : vector<8x32xf32> to vector<8x32xbf16>
    %173 = vector.extract_strided_slice %163 {offsets = [0, 0], sizes = [16, 32], strides = [1, 1]} : vector<16x128xf32> to vector<16x32xf32>
    %174 = arith.truncf %173 : vector<16x32xf32> to vector<16x32xbf16>
    %175 = vector.extract_strided_slice %164 {offsets = [0, 0], sizes = [16, 32], strides = [1, 1]} : vector<16x128xf32> to vector<16x32xf32>
    %176 = arith.truncf %175 : vector<16x32xf32> to vector<16x32xbf16>
    %cst_73 = arith.constant dense<0.000000e+00> : vector<8x16xf32>
    %177 = tpu.matmul %172, %174, %cst_73 {dimension_numbers = #tpu.dot_dimension_numbers<[1], [1], [0], [0], [0, 0, 1, 0], [], []>} : vector<8x32xbf16>, vector<16x32xbf16>, vector<8x16xf32> -> vector<8x16xf32>
    %cst_74 = arith.constant 0.176776692 : f32
    %178 = vector.broadcast %cst_74 : f32 to vector<8x16xf32>
    %179 = arith.mulf %177, %178 : vector<8x16xf32>
    %180 = vector.broadcast %166 : vector<1x16xf32> to vector<8x16xf32>
    %181 = arith.addf %179, %180 : vector<8x16xf32>
    %cst_75 = arith.constant dense<0xFF800000> : vector<8xf32>
    %182 = vector.multi_reduction <maximumf>, %181, %cst_75 [1] : vector<8x16xf32> to vector<8xf32>
    %183 = vector.shape_cast %182 : vector<8xf32> to vector<8x1xf32>
    %184 = vector.broadcast %183 : vector<8x1xf32> to vector<8x16xf32>
    %185 = arith.subf %181, %184 : vector<8x16xf32>
    %186 = math.exp %185 : vector<8x16xf32>
    %cst_76 = arith.constant dense<0.000000e+00> : vector<8xf32>
    %187 = vector.multi_reduction <add>, %186, %cst_76 [1] : vector<8x16xf32> to vector<8xf32>
    %188 = vector.shape_cast %187 : vector<8xf32> to vector<8x1xf32>
    %189 = tpu.reciprocal %188 {approx = true} : vector<8x1xf32> -> vector<8x1xf32>
    %190 = vector.broadcast %189 : vector<8x1xf32> to vector<8x16xf32>
    %191 = arith.mulf %186, %190 : vector<8x16xf32>
    %192 = arith.truncf %191 : vector<8x16xf32> to vector<8x16xbf16>
    %cst_77 = arith.constant dense<0.000000e+00> : vector<8x32xf32>
    %193 = tpu.matmul %192, %176, %cst_77 {dimension_numbers = #tpu.dot_dimension_numbers<[1], [0], [0], [1], [0, 0, 1, 1], [], []>} : vector<8x16xbf16>, vector<16x32xbf16>, vector<8x32xf32> -> vector<8x32xf32>
    %194 = arith.truncf %193 : vector<8x32xf32> to vector<8x32xbf16>
    %c0_78 = arith.constant 0 : index
    %c0_79 = arith.constant 0 : index
    %c0_80 = arith.constant 0 : index
    %195 = vector.load %arg13[%c0_78, %c0_79, %c0_80] : memref<4x32x128xbf16, #tpu.memory_space<vmem>>, vector<1x32x128xbf16>
    %196 = vector.shape_cast %195 : vector<1x32x128xbf16> to vector<32x128xbf16>
    %cst_81 = arith.constant dense<0.000000e+00> : vector<8x128xf32>
    %197 = tpu.matmul %194, %196, %cst_81 {dimension_numbers = #tpu.dot_dimension_numbers<[1], [0], [0], [1], [0, 0, 1, 1], [], []>} : vector<8x32xbf16>, vector<32x128xbf16>, vector<8x128xf32> -> vector<8x128xf32>
    %198 = arith.addf %170, %197 : vector<8x128xf32>
    %199 = vector.extract_strided_slice %157 {offsets = [0, 32], sizes = [8, 32], strides = [1, 1]} : vector<8x128xf32> to vector<8x32xf32>
    %200 = arith.truncf %199 : vector<8x32xf32> to vector<8x32xbf16>
    %201 = vector.extract_strided_slice %163 {offsets = [0, 32], sizes = [16, 32], strides = [1, 1]} : vector<16x128xf32> to vector<16x32xf32>
    %202 = arith.truncf %201 : vector<16x32xf32> to vector<16x32xbf16>
    %203 = vector.extract_strided_slice %164 {offsets = [0, 32], sizes = [16, 32], strides = [1, 1]} : vector<16x128xf32> to vector<16x32xf32>
    %204 = arith.truncf %203 : vector<16x32xf32> to vector<16x32xbf16>
    %cst_82 = arith.constant dense<0.000000e+00> : vector<8x16xf32>
    %205 = tpu.matmul %200, %202, %cst_82 {dimension_numbers = #tpu.dot_dimension_numbers<[1], [1], [0], [0], [0, 0, 1, 0], [], []>} : vector<8x32xbf16>, vector<16x32xbf16>, vector<8x16xf32> -> vector<8x16xf32>
    %cst_83 = arith.constant 0.176776692 : f32
    %206 = vector.broadcast %cst_83 : f32 to vector<8x16xf32>
    %207 = arith.mulf %205, %206 : vector<8x16xf32>
    %208 = vector.broadcast %166 : vector<1x16xf32> to vector<8x16xf32>
    %209 = arith.addf %207, %208 : vector<8x16xf32>
    %cst_84 = arith.constant dense<0xFF800000> : vector<8xf32>
    %210 = vector.multi_reduction <maximumf>, %209, %cst_84 [1] : vector<8x16xf32> to vector<8xf32>
    %211 = vector.shape_cast %210 : vector<8xf32> to vector<8x1xf32>
    %212 = vector.broadcast %211 : vector<8x1xf32> to vector<8x16xf32>
    %213 = arith.subf %209, %212 : vector<8x16xf32>
    %214 = math.exp %213 : vector<8x16xf32>
    %cst_85 = arith.constant dense<0.000000e+00> : vector<8xf32>
    %215 = vector.multi_reduction <add>, %214, %cst_85 [1] : vector<8x16xf32> to vector<8xf32>
    %216 = vector.shape_cast %215 : vector<8xf32> to vector<8x1xf32>
    %217 = tpu.reciprocal %216 {approx = true} : vector<8x1xf32> -> vector<8x1xf32>
    %218 = vector.broadcast %217 : vector<8x1xf32> to vector<8x16xf32>
    %219 = arith.mulf %214, %218 : vector<8x16xf32>
    %220 = arith.truncf %219 : vector<8x16xf32> to vector<8x16xbf16>
    %cst_86 = arith.constant dense<0.000000e+00> : vector<8x32xf32>
    %221 = tpu.matmul %220, %204, %cst_86 {dimension_numbers = #tpu.dot_dimension_numbers<[1], [0], [0], [1], [0, 0, 1, 1], [], []>} : vector<8x16xbf16>, vector<16x32xbf16>, vector<8x32xf32> -> vector<8x32xf32>
    %222 = arith.truncf %221 : vector<8x32xf32> to vector<8x32xbf16>
    %c1_87 = arith.constant 1 : index
    %c0_88 = arith.constant 0 : index
    %c0_89 = arith.constant 0 : index
    %223 = vector.load %arg13[%c1_87, %c0_88, %c0_89] : memref<4x32x128xbf16, #tpu.memory_space<vmem>>, vector<1x32x128xbf16>
    %224 = vector.shape_cast %223 : vector<1x32x128xbf16> to vector<32x128xbf16>
    %cst_90 = arith.constant dense<0.000000e+00> : vector<8x128xf32>
    %225 = tpu.matmul %222, %224, %cst_90 {dimension_numbers = #tpu.dot_dimension_numbers<[1], [0], [0], [1], [0, 0, 1, 1], [], []>} : vector<8x32xbf16>, vector<32x128xbf16>, vector<8x128xf32> -> vector<8x128xf32>
    %226 = arith.addf %198, %225 : vector<8x128xf32>
    %227 = vector.extract_strided_slice %157 {offsets = [0, 64], sizes = [8, 32], strides = [1, 1]} : vector<8x128xf32> to vector<8x32xf32>
    %228 = arith.truncf %227 : vector<8x32xf32> to vector<8x32xbf16>
    %229 = vector.extract_strided_slice %163 {offsets = [0, 64], sizes = [16, 32], strides = [1, 1]} : vector<16x128xf32> to vector<16x32xf32>
    %230 = arith.truncf %229 : vector<16x32xf32> to vector<16x32xbf16>
    %231 = vector.extract_strided_slice %164 {offsets = [0, 64], sizes = [16, 32], strides = [1, 1]} : vector<16x128xf32> to vector<16x32xf32>
    %232 = arith.truncf %231 : vector<16x32xf32> to vector<16x32xbf16>
    %cst_91 = arith.constant dense<0.000000e+00> : vector<8x16xf32>
    %233 = tpu.matmul %228, %230, %cst_91 {dimension_numbers = #tpu.dot_dimension_numbers<[1], [1], [0], [0], [0, 0, 1, 0], [], []>} : vector<8x32xbf16>, vector<16x32xbf16>, vector<8x16xf32> -> vector<8x16xf32>
    %cst_92 = arith.constant 0.176776692 : f32
    %234 = vector.broadcast %cst_92 : f32 to vector<8x16xf32>
    %235 = arith.mulf %233, %234 : vector<8x16xf32>
    %236 = vector.broadcast %166 : vector<1x16xf32> to vector<8x16xf32>
    %237 = arith.addf %235, %236 : vector<8x16xf32>
    %cst_93 = arith.constant dense<0xFF800000> : vector<8xf32>
    %238 = vector.multi_reduction <maximumf>, %237, %cst_93 [1] : vector<8x16xf32> to vector<8xf32>
    %239 = vector.shape_cast %238 : vector<8xf32> to vector<8x1xf32>
    %240 = vector.broadcast %239 : vector<8x1xf32> to vector<8x16xf32>
    %241 = arith.subf %237, %240 : vector<8x16xf32>
    %242 = math.exp %241 : vector<8x16xf32>
    %cst_94 = arith.constant dense<0.000000e+00> : vector<8xf32>
    %243 = vector.multi_reduction <add>, %242, %cst_94 [1] : vector<8x16xf32> to vector<8xf32>
    %244 = vector.shape_cast %243 : vector<8xf32> to vector<8x1xf32>
    %245 = tpu.reciprocal %244 {approx = true} : vector<8x1xf32> -> vector<8x1xf32>
    %246 = vector.broadcast %245 : vector<8x1xf32> to vector<8x16xf32>
    %247 = arith.mulf %242, %246 : vector<8x16xf32>
    %248 = arith.truncf %247 : vector<8x16xf32> to vector<8x16xbf16>
    %cst_95 = arith.constant dense<0.000000e+00> : vector<8x32xf32>
    %249 = tpu.matmul %248, %232, %cst_95 {dimension_numbers = #tpu.dot_dimension_numbers<[1], [0], [0], [1], [0, 0, 1, 1], [], []>} : vector<8x16xbf16>, vector<16x32xbf16>, vector<8x32xf32> -> vector<8x32xf32>
    %250 = arith.truncf %249 : vector<8x32xf32> to vector<8x32xbf16>
    %c2_96 = arith.constant 2 : index
    %c0_97 = arith.constant 0 : index
    %c0_98 = arith.constant 0 : index
    %251 = vector.load %arg13[%c2_96, %c0_97, %c0_98] : memref<4x32x128xbf16, #tpu.memory_space<vmem>>, vector<1x32x128xbf16>
    %252 = vector.shape_cast %251 : vector<1x32x128xbf16> to vector<32x128xbf16>
    %cst_99 = arith.constant dense<0.000000e+00> : vector<8x128xf32>
    %253 = tpu.matmul %250, %252, %cst_99 {dimension_numbers = #tpu.dot_dimension_numbers<[1], [0], [0], [1], [0, 0, 1, 1], [], []>} : vector<8x32xbf16>, vector<32x128xbf16>, vector<8x128xf32> -> vector<8x128xf32>
    %254 = arith.addf %226, %253 : vector<8x128xf32>
    %255 = vector.extract_strided_slice %157 {offsets = [0, 96], sizes = [8, 32], strides = [1, 1]} : vector<8x128xf32> to vector<8x32xf32>
    %256 = arith.truncf %255 : vector<8x32xf32> to vector<8x32xbf16>
    %257 = vector.extract_strided_slice %163 {offsets = [0, 96], sizes = [16, 32], strides = [1, 1]} : vector<16x128xf32> to vector<16x32xf32>
    %258 = arith.truncf %257 : vector<16x32xf32> to vector<16x32xbf16>
    %259 = vector.extract_strided_slice %164 {offsets = [0, 96], sizes = [16, 32], strides = [1, 1]} : vector<16x128xf32> to vector<16x32xf32>
    %260 = arith.truncf %259 : vector<16x32xf32> to vector<16x32xbf16>
    %cst_100 = arith.constant dense<0.000000e+00> : vector<8x16xf32>
    %261 = tpu.matmul %256, %258, %cst_100 {dimension_numbers = #tpu.dot_dimension_numbers<[1], [1], [0], [0], [0, 0, 1, 0], [], []>} : vector<8x32xbf16>, vector<16x32xbf16>, vector<8x16xf32> -> vector<8x16xf32>
    %cst_101 = arith.constant 0.176776692 : f32
    %262 = vector.broadcast %cst_101 : f32 to vector<8x16xf32>
    %263 = arith.mulf %261, %262 : vector<8x16xf32>
    %264 = vector.broadcast %166 : vector<1x16xf32> to vector<8x16xf32>
    %265 = arith.addf %263, %264 : vector<8x16xf32>
    %cst_102 = arith.constant dense<0xFF800000> : vector<8xf32>
    %266 = vector.multi_reduction <maximumf>, %265, %cst_102 [1] : vector<8x16xf32> to vector<8xf32>
    %267 = vector.shape_cast %266 : vector<8xf32> to vector<8x1xf32>
    %268 = vector.broadcast %267 : vector<8x1xf32> to vector<8x16xf32>
    %269 = arith.subf %265, %268 : vector<8x16xf32>
    %270 = math.exp %269 : vector<8x16xf32>
    %cst_103 = arith.constant dense<0.000000e+00> : vector<8xf32>
    %271 = vector.multi_reduction <add>, %270, %cst_103 [1] : vector<8x16xf32> to vector<8xf32>
    %272 = vector.shape_cast %271 : vector<8xf32> to vector<8x1xf32>
    %273 = tpu.reciprocal %272 {approx = true} : vector<8x1xf32> -> vector<8x1xf32>
    %274 = vector.broadcast %273 : vector<8x1xf32> to vector<8x16xf32>
    %275 = arith.mulf %270, %274 : vector<8x16xf32>
    %276 = arith.truncf %275 : vector<8x16xf32> to vector<8x16xbf16>
    %cst_104 = arith.constant dense<0.000000e+00> : vector<8x32xf32>
    %277 = tpu.matmul %276, %260, %cst_104 {dimension_numbers = #tpu.dot_dimension_numbers<[1], [0], [0], [1], [0, 0, 1, 1], [], []>} : vector<8x16xbf16>, vector<16x32xbf16>, vector<8x32xf32> -> vector<8x32xf32>
    %278 = arith.truncf %277 : vector<8x32xf32> to vector<8x32xbf16>
    %c3_105 = arith.constant 3 : index
    %c0_106 = arith.constant 0 : index
    %c0_107 = arith.constant 0 : index
    %279 = vector.load %arg13[%c3_105, %c0_106, %c0_107] : memref<4x32x128xbf16, #tpu.memory_space<vmem>>, vector<1x32x128xbf16>
    %280 = vector.shape_cast %279 : vector<1x32x128xbf16> to vector<32x128xbf16>
    %cst_108 = arith.constant dense<0.000000e+00> : vector<8x128xf32>
    %281 = tpu.matmul %278, %280, %cst_108 {dimension_numbers = #tpu.dot_dimension_numbers<[1], [0], [0], [1], [0, 0, 1, 1], [], []>} : vector<8x32xbf16>, vector<32x128xbf16>, vector<8x128xf32> -> vector<8x128xf32>
    %282 = arith.addf %254, %281 : vector<8x128xf32>
    %283 = arith.addf %151, %282 : vector<8x128xf32>
    %cst_109 = arith.constant dense<0.000000e+00> : vector<8xf32>
    %284 = vector.multi_reduction <add>, %283, %cst_109 [1] : vector<8x128xf32> to vector<8xf32>
    %285 = vector.shape_cast %284 : vector<8xf32> to vector<8x1xf32>
    %cst_110 = arith.constant 1.280000e+02 : f32
    %286 = vector.broadcast %cst_110 : f32 to vector<8x1xf32>
    %287 = arith.divf %285, %286 : vector<8x1xf32>
    %288 = vector.broadcast %287 : vector<8x1xf32> to vector<8x128xf32>
    %289 = arith.subf %283, %288 : vector<8x128xf32>
    %290 = arith.mulf %289, %289 : vector<8x128xf32>
    %cst_111 = arith.constant dense<0.000000e+00> : vector<8xf32>
    %291 = vector.multi_reduction <add>, %290, %cst_111 [1] : vector<8x128xf32> to vector<8xf32>
    %292 = vector.shape_cast %291 : vector<8xf32> to vector<8x1xf32>
    %cst_112 = arith.constant 1.280000e+02 : f32
    %293 = vector.broadcast %cst_112 : f32 to vector<8x1xf32>
    %294 = arith.divf %292, %293 : vector<8x1xf32>
    %295 = vector.broadcast %287 : vector<8x1xf32> to vector<8x128xf32>
    %296 = arith.subf %283, %295 : vector<8x128xf32>
    %cst_113 = arith.constant 9.99999974E-6 : f32
    %297 = vector.broadcast %cst_113 : f32 to vector<8x1xf32>
    %298 = arith.addf %294, %297 : vector<8x1xf32>
    %299 = math.rsqrt %298 : vector<8x1xf32>
    %300 = vector.broadcast %299 : vector<8x1xf32> to vector<8x128xf32>
    %301 = arith.mulf %296, %300 : vector<8x128xf32>
    %c0_114 = arith.constant 0 : index
    %c0_115 = arith.constant 0 : index
    %302 = vector.load %arg21[%c0_114, %c0_115] : memref<1x128xf32, #tpu.memory_space<vmem>>, vector<1x128xf32>
    %303 = vector.broadcast %302 : vector<1x128xf32> to vector<8x128xf32>
    %304 = arith.mulf %301, %303 : vector<8x128xf32>
    %c0_116 = arith.constant 0 : index
    %c0_117 = arith.constant 0 : index
    %305 = vector.load %arg22[%c0_116, %c0_117] : memref<1x128xf32, #tpu.memory_space<vmem>>, vector<1x128xf32>
    %306 = vector.broadcast %305 : vector<1x128xf32> to vector<8x128xf32>
    %307 = arith.addf %304, %306 : vector<8x128xf32>
    %308 = arith.truncf %307 : vector<8x128xf32> to vector<8x128xbf16>
    %c0_118 = arith.constant 0 : index
    %c0_119 = arith.constant 0 : index
    %309 = vector.load %arg15[%c0_118, %c0_119] : memref<128x256xbf16, #tpu.memory_space<vmem>>, vector<128x256xbf16>
    %cst_120 = arith.constant dense<0.000000e+00> : vector<8x256xf32>
    %310 = tpu.matmul %308, %309, %cst_120 {dimension_numbers = #tpu.dot_dimension_numbers<[1], [0], [0], [1], [0, 0, 1, 1], [], []>} : vector<8x128xbf16>, vector<128x256xbf16>, vector<8x256xf32> -> vector<8x256xf32>
    %c0_121 = arith.constant 0 : index
    %c0_122 = arith.constant 0 : index
    %311 = vector.load %arg16[%c0_121, %c0_122] : memref<1x256xf32, #tpu.memory_space<vmem>>, vector<1x256xf32>
    %312 = vector.broadcast %311 : vector<1x256xf32> to vector<8x256xf32>
    %313 = arith.addf %310, %312 : vector<8x256xf32>
    %cst_123 = arith.constant 0.000000e+00 : f32
    %314 = vector.broadcast %cst_123 : f32 to vector<8x256xf32>
    %315 = arith.maximumf %313, %314 : vector<8x256xf32>
    %316 = arith.truncf %315 : vector<8x256xf32> to vector<8x256xbf16>
    %c0_124 = arith.constant 0 : index
    %c0_125 = arith.constant 0 : index
    %317 = vector.load %arg17[%c0_124, %c0_125] : memref<256x128xbf16, #tpu.memory_space<vmem>>, vector<256x128xbf16>
    %cst_126 = arith.constant dense<0.000000e+00> : vector<8x128xf32>
    %318 = tpu.matmul %316, %317, %cst_126 {dimension_numbers = #tpu.dot_dimension_numbers<[1], [0], [0], [1], [0, 0, 1, 1], [], []>} : vector<8x256xbf16>, vector<256x128xbf16>, vector<8x128xf32> -> vector<8x128xf32>
    %c0_127 = arith.constant 0 : index
    %c0_128 = arith.constant 0 : index
    %319 = vector.load %arg18[%c0_127, %c0_128] : memref<1x128xf32, #tpu.memory_space<vmem>>, vector<1x128xf32>
    %320 = vector.broadcast %319 : vector<1x128xf32> to vector<8x128xf32>
    %321 = arith.addf %318, %320 : vector<8x128xf32>
    %322 = arith.addf %307, %321 : vector<8x128xf32>
    %cst_129 = arith.constant dense<0.000000e+00> : vector<8xf32>
    %323 = vector.multi_reduction <add>, %322, %cst_129 [1] : vector<8x128xf32> to vector<8xf32>
    %324 = vector.shape_cast %323 : vector<8xf32> to vector<8x1xf32>
    %cst_130 = arith.constant 1.280000e+02 : f32
    %325 = vector.broadcast %cst_130 : f32 to vector<8x1xf32>
    %326 = arith.divf %324, %325 : vector<8x1xf32>
    %327 = vector.broadcast %326 : vector<8x1xf32> to vector<8x128xf32>
    %328 = arith.subf %322, %327 : vector<8x128xf32>
    %329 = arith.mulf %328, %328 : vector<8x128xf32>
    %cst_131 = arith.constant dense<0.000000e+00> : vector<8xf32>
    %330 = vector.multi_reduction <add>, %329, %cst_131 [1] : vector<8x128xf32> to vector<8xf32>
    %331 = vector.shape_cast %330 : vector<8xf32> to vector<8x1xf32>
    %cst_132 = arith.constant 1.280000e+02 : f32
    %332 = vector.broadcast %cst_132 : f32 to vector<8x1xf32>
    %333 = arith.divf %331, %332 : vector<8x1xf32>
    %334 = vector.broadcast %326 : vector<8x1xf32> to vector<8x128xf32>
    %335 = arith.subf %322, %334 : vector<8x128xf32>
    %cst_133 = arith.constant 9.99999974E-6 : f32
    %336 = vector.broadcast %cst_133 : f32 to vector<8x1xf32>
    %337 = arith.addf %333, %336 : vector<8x1xf32>
    %338 = math.rsqrt %337 : vector<8x1xf32>
    %339 = vector.broadcast %338 : vector<8x1xf32> to vector<8x128xf32>
    %340 = arith.mulf %335, %339 : vector<8x128xf32>
    %c0_134 = arith.constant 0 : index
    %c0_135 = arith.constant 0 : index
    %341 = vector.load %arg23[%c0_134, %c0_135] : memref<1x128xf32, #tpu.memory_space<vmem>>, vector<1x128xf32>
    %342 = vector.broadcast %341 : vector<1x128xf32> to vector<8x128xf32>
    %343 = arith.mulf %340, %342 : vector<8x128xf32>
    %c0_136 = arith.constant 0 : index
    %c0_137 = arith.constant 0 : index
    %344 = vector.load %arg24[%c0_136, %c0_137] : memref<1x128xf32, #tpu.memory_space<vmem>>, vector<1x128xf32>
    %345 = vector.broadcast %344 : vector<1x128xf32> to vector<8x128xf32>
    %346 = arith.addf %343, %345 : vector<8x128xf32>
    %c0_138 = arith.constant 0 : index
    %c0_139 = arith.constant 0 : index
    %c0_140 = arith.constant 0 : index
    %347 = vector.load %arg25[%c0_138, %c0_139, %c0_140] : memref<1x8x128xf32, #tpu.memory_space<vmem>>, vector<1x8x128xf32>
    %348 = vector.shape_cast %347 : vector<1x8x128xf32> to vector<8x128xf32>
    %349 = vector.shape_cast %346 : vector<8x128xf32> to vector<1x8x128xf32>
    tpu.vector_store %arg25[%c0_138, %c0_139, %c0_140], %349 {strides = array<i32>} : memref<1x8x128xf32, #tpu.memory_space<vmem>>, vector<1x8x128xf32>,
    return
  }
  func.func @transform_0(%arg0: i32) -> (i32, i32, i32) {
    %c0_i32 = arith.constant 0 : i32
    %c0_i32_0 = arith.constant 0 : i32
    %c0_i32_1 = arith.constant 0 : i32
    return %arg0, %c0_i32, %c0_i32_0 : i32, i32, i32
  }
  func.func @transform_1(%arg0: i32) -> (i32, i32, i32) {
    %c0_i32 = arith.constant 0 : i32
    %c0_i32_0 = arith.constant 0 : i32
    %c0_i32_1 = arith.constant 0 : i32
    return %arg0, %c0_i32, %c0_i32_0 : i32, i32, i32
  }
  func.func @transform_2(%arg0: i32) -> (i32, i32, i32) {
    %c0_i32 = arith.constant 0 : i32
    %c0_i32_0 = arith.constant 0 : i32
    %c0_i32_1 = arith.constant 0 : i32
    return %arg0, %c0_i32, %c0_i32_0 : i32, i32, i32
  }
  func.func @transform_3(%arg0: i32) -> (i32, i32, i32) {
    %c0_i32 = arith.constant 0 : i32
    %c0_i32_0 = arith.constant 0 : i32
    %c0_i32_1 = arith.constant 0 : i32
    return %arg0, %c0_i32, %c0_i32_0 : i32, i32, i32
  }
  func.func @transform_4(%arg0: i32) -> (i32, i32) {
    %c0_i32 = arith.constant 0 : i32
    %c0_i32_0 = arith.constant 0 : i32
    %c0_i32_1 = arith.constant 0 : i32
    return %c0_i32, %c0_i32_0 : i32, i32
  }
  func.func @transform_5(%arg0: i32) -> (i32, i32) {
    %c0_i32 = arith.constant 0 : i32
    %c0_i32_0 = arith.constant 0 : i32
    %c0_i32_1 = arith.constant 0 : i32
    return %c0_i32, %c0_i32_0 : i32, i32
  }
  func.func @transform_6(%arg0: i32) -> (i32, i32, i32) {
    %c0_i32 = arith.constant 0 : i32
    %c0_i32_0 = arith.constant 0 : i32
    %c0_i32_1 = arith.constant 0 : i32
    %c0_i32_2 = arith.constant 0 : i32
    return %c0_i32, %c0_i32_0, %c0_i32_1 : i32, i32, i32
  }
  func.func @transform_7(%arg0: i32) -> (i32, i32) {
    %c0_i32 = arith.constant 0 : i32
    %c0_i32_0 = arith.constant 0 : i32
    %c0_i32_1 = arith.constant 0 : i32
    return %c0_i32, %c0_i32_0 : i32, i32
  }
  func.func @transform_8(%arg0: i32) -> (i32, i32) {
    %c0_i32 = arith.constant 0 : i32
    %c0_i32_0 = arith.constant 0 : i32
    %c0_i32_1 = arith.constant 0 : i32
    return %c0_i32, %c0_i32_0 : i32, i32
  }
  func.func @transform_9(%arg0: i32) -> (i32, i32) {
    %c0_i32 = arith.constant 0 : i32
    %c0_i32_0 = arith.constant 0 : i32
    %c0_i32_1 = arith.constant 0 : i32
    return %c0_i32, %c0_i32_0 : i32, i32
  }
  func.func @transform_10(%arg0: i32) -> (i32, i32) {
    %c0_i32 = arith.constant 0 : i32
    %c0_i32_0 = arith.constant 0 : i32
    %c0_i32_1 = arith.constant 0 : i32
    return %c0_i32, %c0_i32_0 : i32, i32
  }
  func.func @transform_11(%arg0: i32) -> (i32, i32) {
    %c0_i32 = arith.constant 0 : i32
    %c0_i32_0 = arith.constant 0 : i32
    %c0_i32_1 = arith.constant 0 : i32
    return %c0_i32, %c0_i32_0 : i32, i32
  }
  func.func @transform_12(%arg0: i32) -> (i32, i32, i32) {
    %c0_i32 = arith.constant 0 : i32
    %c0_i32_0 = arith.constant 0 : i32
    %c0_i32_1 = arith.constant 0 : i32
    %c0_i32_2 = arith.constant 0 : i32
    return %c0_i32, %c0_i32_0, %c0_i32_1 : i32, i32, i32
  }
  func.func @transform_13(%arg0: i32) -> (i32, i32) {
    %c0_i32 = arith.constant 0 : i32
    %c0_i32_0 = arith.constant 0 : i32
    %c0_i32_1 = arith.constant 0 : i32
    return %c0_i32, %c0_i32_0 : i32, i32
  }
  func.func @transform_14(%arg0: i32) -> (i32, i32) {
    %c0_i32 = arith.constant 0 : i32
    %c0_i32_0 = arith.constant 0 : i32
    %c0_i32_1 = arith.constant 0 : i32
    return %c0_i32, %c0_i32_0 : i32, i32
  }
  func.func @transform_15(%arg0: i32) -> (i32, i32) {
    %c0_i32 = arith.constant 0 : i32
    %c0_i32_0 = arith.constant 0 : i32
    %c0_i32_1 = arith.constant 0 : i32
    return %c0_i32, %c0_i32_0 : i32, i32
  }
  func.func @transform_16(%arg0: i32) -> (i32, i32) {
    %c0_i32 = arith.constant 0 : i32
    %c0_i32_0 = arith.constant 0 : i32
    %c0_i32_1 = arith.constant 0 : i32
    return %c0_i32, %c0_i32_0 : i32, i32
  }
  func.func @transform_17(%arg0: i32) -> (i32, i32) {
    %c0_i32 = arith.constant 0 : i32
    %c0_i32_0 = arith.constant 0 : i32
    %c0_i32_1 = arith.constant 0 : i32
    return %c0_i32, %c0_i32_0 : i32, i32
  }
  func.func @transform_18(%arg0: i32) -> (i32, i32) {
    %c0_i32 = arith.constant 0 : i32
    %c0_i32_0 = arith.constant 0 : i32
    %c0_i32_1 = arith.constant 0 : i32
    return %c0_i32, %c0_i32_0 : i32, i32
  }
  func.func @transform_19(%arg0: i32) -> (i32, i32) {
    %c0_i32 = arith.constant 0 : i32
    %c0_i32_0 = arith.constant 0 : i32
    %c0_i32_1 = arith.constant 0 : i32
    return %c0_i32, %c0_i32_0 : i32, i32
  }
  func.func @transform_20(%arg0: i32) -> (i32, i32) {
    %c0_i32 = arith.constant 0 : i32
    %c0_i32_0 = arith.constant 0 : i32
    %c0_i32_1 = arith.constant 0 : i32
    return %c0_i32, %c0_i32_0 : i32, i32
  }
  func.func @transform_21(%arg0: i32) -> (i32, i32) {
    %c0_i32 = arith.constant 0 : i32
    %c0_i32_0 = arith.constant 0 : i32
    %c0_i32_1 = arith.constant 0 : i32
    return %c0_i32, %c0_i32_0 : i32, i32
  }
  func.func @transform_22(%arg0: i32) -> (i32, i32) {
    %c0_i32 = arith.constant 0 : i32
    %c0_i32_0 = arith.constant 0 : i32
    %c0_i32_1 = arith.constant 0 : i32
    return %c0_i32, %c0_i32_0 : i32, i32
  }
  func.func @transform_23(%arg0: i32) -> (i32, i32) {
    %c0_i32 = arith.constant 0 : i32
    %c0_i32_0 = arith.constant 0 : i32
    %c0_i32_1 = arith.constant 0 : i32
    return %c0_i32, %c0_i32_0 : i32, i32
  }
  func.func @transform_24(%arg0: i32) -> (i32, i32, i32) {
    %c0_i32 = arith.constant 0 : i32
    %c0_i32_0 = arith.constant 0 : i32
    %c0_i32_1 = arith.constant 0 : i32
    return %arg0, %c0_i32, %c0_i32_0 : i32, i32, i32
  }
}

module attributes {stable_mosaic.version = 11 : i64} {
  func.func @_decoder_layer_kernel(%arg0: i32, %arg1: memref<1x8x128xf32, #tpu.memory_space<vmem>>, %arg2: memref<1x16x128xbf16, #tpu.memory_space<vmem>>, %arg3: memref<1x8x8xf32, #tpu.memory_space<vmem>>, %arg4: memref<1x1x16xf32, #tpu.memory_space<vmem>>, %arg5: memref<128x384xbf16, #tpu.memory_space<vmem>>, %arg6: memref<1x384xf32, #tpu.memory_space<vmem>>, %arg7: memref<4x32x128xbf16, #tpu.memory_space<vmem>>, %arg8: memref<1x128xf32, #tpu.memory_space<vmem>>, %arg9: memref<128x128xbf16, #tpu.memory_space<vmem>>, %arg10: memref<1x128xf32, #tpu.memory_space<vmem>>, %arg11: memref<128x256xbf16, #tpu.memory_space<vmem>>, %arg12: memref<1x256xf32, #tpu.memory_space<vmem>>, %arg13: memref<4x32x128xbf16, #tpu.memory_space<vmem>>, %arg14: memref<1x128xf32, #tpu.memory_space<vmem>>, %arg15: memref<128x256xbf16, #tpu.memory_space<vmem>>, %arg16: memref<1x256xf32, #tpu.memory_space<vmem>>, %arg17: memref<256x128xbf16, #tpu.memory_space<vmem>>, %arg18: memref<1x128xf32, #tpu.memory_space<vmem>>, %arg19: memref<1x128xf32, #tpu.memory_space<vmem>>, %arg20: memref<1x128xf32, #tpu.memory_space<vmem>>, %arg21: memref<1x128xf32, #tpu.memory_space<vmem>>, %arg22: memref<1x128xf32, #tpu.memory_space<vmem>>, %arg23: memref<1x128xf32, #tpu.memory_space<vmem>>, %arg24: memref<1x128xf32, #tpu.memory_space<vmem>>, %arg25: memref<1x8x128xf32, #tpu.memory_space<vmem>>) attributes {dimension_semantics = [#tpu.dimension_semantics<parallel>], iteration_bounds = array<i64: 2>, scalar_prefetch = 0 : i64, scratch_operands = 0 : i64, tpu.core_type = #tpu.core_type<tc>, window_params = [{transform_indices = @transform_0, window_bounds = array<i64: 1, 8, 128>}, {transform_indices = @transform_1, window_bounds = array<i64: 1, 16, 128>}, {transform_indices = @transform_2, window_bounds = array<i64: 1, 8, 8>}, {transform_indices = @transform_3, window_bounds = array<i64: 1, 1, 16>}, {pipeline_mode = #tpu.pipeline_mode<synchronous>, transform_indices = @transform_4, window_bounds = array<i64: 128, 384>}, {pipeline_mode = #tpu.pipeline_mode<synchronous>, transform_indices = @transform_5, window_bounds = array<i64: 1, 384>}, {pipeline_mode = #tpu.pipeline_mode<synchronous>, transform_indices = @transform_6, window_bounds = array<i64: 4, 32, 128>}, {pipeline_mode = #tpu.pipeline_mode<synchronous>, transform_indices = @transform_7, window_bounds = array<i64: 1, 128>}, {pipeline_mode = #tpu.pipeline_mode<synchronous>, transform_indices = @transform_8, window_bounds = array<i64: 128, 128>}, {pipeline_mode = #tpu.pipeline_mode<synchronous>, transform_indices = @transform_9, window_bounds = array<i64: 1, 128>}, {pipeline_mode = #tpu.pipeline_mode<synchronous>, transform_indices = @transform_10, window_bounds = array<i64: 128, 256>}, {pipeline_mode = #tpu.pipeline_mode<synchronous>, transform_indices = @transform_11, window_bounds = array<i64: 1, 256>}, {pipeline_mode = #tpu.pipeline_mode<synchronous>, transform_indices = @transform_12, window_bounds = array<i64: 4, 32, 128>}, {pipeline_mode = #tpu.pipeline_mode<synchronous>, transform_indices = @transform_13, window_bounds = array<i64: 1, 128>}, {pipeline_mode = #tpu.pipeline_mode<synchronous>, transform_indices = @transform_14, window_bounds = array<i64: 128, 256>}, {pipeline_mode = #tpu.pipeline_mode<synchronous>, transform_indices = @transform_15, window_bounds = array<i64: 1, 256>}, {pipeline_mode = #tpu.pipeline_mode<synchronous>, transform_indices = @transform_16, window_bounds = array<i64: 256, 128>}, {pipeline_mode = #tpu.pipeline_mode<synchronous>, transform_indices = @transform_17, window_bounds = array<i64: 1, 128>}, {pipeline_mode = #tpu.pipeline_mode<synchronous>, transform_indices = @transform_18, window_bounds = array<i64: 1, 128>}, {pipeline_mode = #tpu.pipeline_mode<synchronous>, transform_indices = @transform_19, window_bounds = array<i64: 1, 128>}, {pipeline_mode = #tpu.pipeline_mode<synchronous>, transform_indices = @transform_20, window_bounds = array<i64: 1, 128>}, {pipeline_mode = #tpu.pipeline_mode<synchronous>, transform_indices = @transform_21, window_bounds = array<i64: 1, 128>}, {pipeline_mode = #tpu.pipeline_mode<synchronous>, transform_indices = @transform_22, window_bounds = array<i64: 1, 128>}, {pipeline_mode = #tpu.pipeline_mode<synchronous>, transform_indices = @transform_23, window_bounds = array<i64: 1, 128>}, {transform_indices = @transform_24, window_bounds = array<i64: 1, 8, 128>}]} {
    %c0 = arith.constant 0 : index
    %c0_0 = arith.constant 0 : index
    %c0_1 = arith.constant 0 : index
    %0 = vector.load %arg1[%c0, %c0_0, %c0_1] : memref<1x8x128xf32, #tpu.memory_space<vmem>>, vector<1x8x128xf32>
    %1 = vector.shape_cast %0 : vector<1x8x128xf32> to vector<8x128xf32>
    %c0_2 = arith.constant 0 : index
    %c0_3 = arith.constant 0 : index
    %c0_4 = arith.constant 0 : index
    %2 = vector.load %arg2[%c0_2, %c0_3, %c0_4] : memref<1x16x128xbf16, #tpu.memory_space<vmem>>, vector<1x16x128xbf16>
    %3 = vector.shape_cast %2 : vector<1x16x128xbf16> to vector<16x128xbf16>
    %4 = arith.truncf %1 : vector<8x128xf32> to vector<8x128xbf16>
    %c0_5 = arith.constant 0 : index
    %c0_6 = arith.constant 0 : index
    %5 = vector.load %arg5[%c0_5, %c0_6] : memref<128x384xbf16, #tpu.memory_space<vmem>>, vector<128x384xbf16>
    %cst = arith.constant dense<0.000000e+00> : vector<8x384xf32>
    %6 = tpu.matmul %4, %5, %cst {dimension_numbers = #tpu.dot_dimension_numbers<[1], [0], [0], [1], [0, 0, 1, 1], [], []>} : vector<8x128xbf16>, vector<128x384xbf16>, vector<8x384xf32> -> vector<8x384xf32>
    %c0_7 = arith.constant 0 : index
    %c0_8 = arith.constant 0 : index
    %7 = vector.load %arg6[%c0_7, %c0_8] : memref<1x384xf32, #tpu.memory_space<vmem>>, vector<1x384xf32>
    %8 = vector.broadcast %7 : vector<1x384xf32> to vector<8x384xf32>
    %9 = arith.addf %6, %8 : vector<8x384xf32>
    %10 = vector.extract_strided_slice %9 {offsets = [0, 0], sizes = [8, 128], strides = [1, 1]} : vector<8x384xf32> to vector<8x128xf32>
    %11 = vector.extract_strided_slice %9 {offsets = [0, 128], sizes = [8, 128], strides = [1, 1]} : vector<8x384xf32> to vector<8x128xf32>
    %12 = vector.extract_strided_slice %9 {offsets = [0, 256], sizes = [8, 128], strides = [1, 1]} : vector<8x384xf32> to vector<8x128xf32>
    %c0_9 = arith.constant 0 : index
    %c0_10 = arith.constant 0 : index
    %c0_11 = arith.constant 0 : index
    %13 = vector.load %arg3[%c0_9, %c0_10, %c0_11] : memref<1x8x8xf32, #tpu.memory_space<vmem>>, vector<1x8x8xf32>
    %14 = vector.shape_cast %13 : vector<1x8x8xf32> to vector<8x8xf32>
    %cst_12 = arith.constant 0.000000e+00 : f32
    %15 = vector.broadcast %cst_12 : f32 to vector<8x128xf32>
    %c0_13 = arith.constant 0 : index
    %c0_14 = arith.constant 0 : index
    %16 = vector.load %arg8[%c0_13, %c0_14] : memref<1x128xf32, #tpu.memory_space<vmem>>, vector<1x128xf32>
    %17 = vector.broadcast %16 : vector<1x128xf32> to vector<8x128xf32>
    %18 = arith.addf %15, %17 : vector<8x128xf32>
    %19 = vector.extract_strided_slice %10 {offsets = [0, 0], sizes = [8, 32], strides = [1, 1]} : vector<8x128xf32> to vector<8x32xf32>
    %20 = arith.truncf %19 : vector<8x32xf32> to vector<8x32xbf16>
    %21 = vector.extract_strided_slice %11 {offsets = [0, 0], sizes = [8, 32], strides = [1, 1]} : vector<8x128xf32> to vector<8x32xf32>
    %22 = arith.truncf %21 : vector<8x32xf32> to vector<8x32xbf16>
    %23 = vector.extract_strided_slice %12 {offsets = [0, 0], sizes = [8, 32], strides = [1, 1]} : vector<8x128xf32> to vector<8x32xf32>
    %24 = arith.truncf %23 : vector<8x32xf32> to vector<8x32xbf16>
    %cst_15 = arith.constant dense<0.000000e+00> : vector<8x8xf32>
    %25 = tpu.matmul %20, %22, %cst_15 {dimension_numbers = #tpu.dot_dimension_numbers<[1], [1], [0], [0], [0, 0, 1, 0], [], []>} : vector<8x32xbf16>, vector<8x32xbf16>, vector<8x8xf32> -> vector<8x8xf32>
    %cst_16 = arith.constant 0.176776692 : f32
    %26 = vector.broadcast %cst_16 : f32 to vector<8x8xf32>
    %27 = arith.mulf %25, %26 : vector<8x8xf32>
    %28 = arith.addf %27, %14 : vector<8x8xf32>
    %cst_17 = arith.constant dense<0xFF800000> : vector<8xf32>
    %29 = vector.multi_reduction <maximumf>, %28, %cst_17 [1] : vector<8x8xf32> to vector<8xf32>
    %30 = vector.shape_cast %29 : vector<8xf32> to vector<8x1xf32>
    %31 = vector.broadcast %30 : vector<8x1xf32> to vector<8x8xf32>
    %32 = arith.subf %28, %31 : vector<8x8xf32>
    %33 = math.exp %32 : vector<8x8xf32>
    %cst_18 = arith.constant dense<0.000000e+00> : vector<8xf32>
    %34 = vector.multi_reduction <add>, %33, %cst_18 [1] : vector<8x8xf32> to vector<8xf32>
    %35 = vector.shape_cast %34 : vector<8xf32> to vector<8x1xf32>
    %36 = tpu.reciprocal %35 {approx = true} : vector<8x1xf32> -> vector<8x1xf32>
    %37 = vector.broadcast %36 : vector<8x1xf32> to vector<8x8xf32>
    %38 = arith.mulf %33, %37 : vector<8x8xf32>
    %39 = arith.truncf %38 : vector<8x8xf32> to vector<8x8xbf16>
    %cst_19 = arith.constant dense<0.000000e+00> : vector<8x32xf32>
    %40 = tpu.matmul %39, %24, %cst_19 {dimension_numbers = #tpu.dot_dimension_numbers<[1], [0], [0], [1], [0, 0, 1, 1], [], []>} : vector<8x8xbf16>, vector<8x32xbf16>, vector<8x32xf32> -> vector<8x32xf32>
    %41 = arith.truncf %40 : vector<8x32xf32> to vector<8x32xbf16>
    %c0_20 = arith.constant 0 : index
    %c0_21 = arith.constant 0 : index
    %c0_22 = arith.constant 0 : index
    %42 = vector.load %arg7[%c0_20, %c0_21, %c0_22] : memref<4x32x128xbf16, #tpu.memory_space<vmem>>, vector<1x32x128xbf16>
    %43 = vector.shape_cast %42 : vector<1x32x128xbf16> to vector<32x128xbf16>
    %cst_23 = arith.constant dense<0.000000e+00> : vector<8x128xf32>
    %44 = tpu.matmul %41, %43, %cst_23 {dimension_numbers = #tpu.dot_dimension_numbers<[1], [0], [0], [1], [0, 0, 1, 1], [], []>} : vector<8x32xbf16>, vector<32x128xbf16>, vector<8x128xf32> -> vector<8x128xf32>
    %45 = arith.addf %18, %44 : vector<8x128xf32>
    %46 = vector.extract_strided_slice %10 {offsets = [0, 32], sizes = [8, 32], strides = [1, 1]} : vector<8x128xf32> to vector<8x32xf32>
    %47 = arith.truncf %46 : vector<8x32xf32> to vector<8x32xbf16>
    %48 = vector.extract_strided_slice %11 {offsets = [0, 32], sizes = [8, 32], strides = [1, 1]} : vector<8x128xf32> to vector<8x32xf32>
    %49 = arith.truncf %48 : vector<8x32xf32> to vector<8x32xbf16>
    %50 = vector.extract_strided_slice %12 {offsets = [0, 32], sizes = [8, 32], strides = [1, 1]} : vector<8x128xf32> to vector<8x32xf32>
    %51 = arith.truncf %50 : vector<8x32xf32> to vector<8x32xbf16>
    %cst_24 = arith.constant dense<0.000000e+00> : vector<8x8xf32>
    %52 = tpu.matmul %47, %49, %cst_24 {dimension_numbers = #tpu.dot_dimension_numbers<[1], [1], [0], [0], [0, 0, 1, 0], [], []>} : vector<8x32xbf16>, vector<8x32xbf16>, vector<8x8xf32> -> vector<8x8xf32>
    %cst_25 = arith.constant 0.176776692 : f32
    %53 = vector.broadcast %cst_25 : f32 to vector<8x8xf32>
    %54 = arith.mulf %52, %53 : vector<8x8xf32>
    %55 = arith.addf %54, %14 : vector<8x8xf32>
    %cst_26 = arith.constant dense<0xFF800000> : vector<8xf32>
    %56 = vector.multi_reduction <maximumf>, %55, %cst_26 [1] : vector<8x8xf32> to vector<8xf32>
    %57 = vector.shape_cast %56 : vector<8xf32> to vector<8x1xf32>
    %58 = vector.broadcast %57 : vector<8x1xf32> to vector<8x8xf32>
    %59 = arith.subf %55, %58 : vector<8x8xf32>
    %60 = math.exp %59 : vector<8x8xf32>
    %cst_27 = arith.constant dense<0.000000e+00> : vector<8xf32>
    %61 = vector.multi_reduction <add>, %60, %cst_27 [1] : vector<8x8xf32> to vector<8xf32>
    %62 = vector.shape_cast %61 : vector<8xf32> to vector<8x1xf32>
    %63 = tpu.reciprocal %62 {approx = true} : vector<8x1xf32> -> vector<8x1xf32>
    %64 = vector.broadcast %63 : vector<8x1xf32> to vector<8x8xf32>
    %65 = arith.mulf %60, %64 : vector<8x8xf32>
    %66 = arith.truncf %65 : vector<8x8xf32> to vector<8x8xbf16>
    %cst_28 = arith.constant dense<0.000000e+00> : vector<8x32xf32>
    %67 = tpu.matmul %66, %51, %cst_28 {dimension_numbers = #tpu.dot_dimension_numbers<[1], [0], [0], [1], [0, 0, 1, 1], [], []>} : vector<8x8xbf16>, vector<8x32xbf16>, vector<8x32xf32> -> vector<8x32xf32>
    %68 = arith.truncf %67 : vector<8x32xf32> to vector<8x32xbf16>
    %c1 = arith.constant 1 : index
    %c0_29 = arith.constant 0 : index
    %c0_30 = arith.constant 0 : index
    %69 = vector.load %arg7[%c1, %c0_29, %c0_30] : memref<4x32x128xbf16, #tpu.memory_space<vmem>>, vector<1x32x128xbf16>
    %70 = vector.shape_cast %69 : vector<1x32x128xbf16> to vector<32x128xbf16>
    %cst_31 = arith.constant dense<0.000000e+00> : vector<8x128xf32>
    %71 = tpu.matmul %68, %70, %cst_31 {dimension_numbers = #tpu.dot_dimension_numbers<[1], [0], [0], [1], [0, 0, 1, 1], [], []>} : vector<8x32xbf16>, vector<32x128xbf16>, vector<8x128xf32> -> vector<8x128xf32>
    %72 = arith.addf %45, %71 : vector<8x128xf32>
    %73 = vector.extract_strided_slice %10 {offsets = [0, 64], sizes = [8, 32], strides = [1, 1]} : vector<8x128xf32> to vector<8x32xf32>
    %74 = arith.truncf %73 : vector<8x32xf32> to vector<8x32xbf16>
    %75 = vector.extract_strided_slice %11 {offsets = [0, 64], sizes = [8, 32], strides = [1, 1]} : vector<8x128xf32> to vector<8x32xf32>
    %76 = arith.truncf %75 : vector<8x32xf32> to vector<8x32xbf16>
    %77 = vector.extract_strided_slice %12 {offsets = [0, 64], sizes = [8, 32], strides = [1, 1]} : vector<8x128xf32> to vector<8x32xf32>
    %78 = arith.truncf %77 : vector<8x32xf32> to vector<8x32xbf16>
    %cst_32 = arith.constant dense<0.000000e+00> : vector<8x8xf32>
    %79 = tpu.matmul %74, %76, %cst_32 {dimension_numbers = #tpu.dot_dimension_numbers<[1], [1], [0], [0], [0, 0, 1, 0], [], []>} : vector<8x32xbf16>, vector<8x32xbf16>, vector<8x8xf32> -> vector<8x8xf32>
    %cst_33 = arith.constant 0.176776692 : f32
    %80 = vector.broadcast %cst_33 : f32 to vector<8x8xf32>
    %81 = arith.mulf %79, %80 : vector<8x8xf32>
    %82 = arith.addf %81, %14 : vector<8x8xf32>
    %cst_34 = arith.constant dense<0xFF800000> : vector<8xf32>
    %83 = vector.multi_reduction <maximumf>, %82, %cst_34 [1] : vector<8x8xf32> to vector<8xf32>
    %84 = vector.shape_cast %83 : vector<8xf32> to vector<8x1xf32>
    %85 = vector.broadcast %84 : vector<8x1xf32> to vector<8x8xf32>
    %86 = arith.subf %82, %85 : vector<8x8xf32>
    %87 = math.exp %86 : vector<8x8xf32>
    %cst_35 = arith.constant dense<0.000000e+00> : vector<8xf32>
    %88 = vector.multi_reduction <add>, %87, %cst_35 [1] : vector<8x8xf32> to vector<8xf32>
    %89 = vector.shape_cast %88 : vector<8xf32> to vector<8x1xf32>
    %90 = tpu.reciprocal %89 {approx = true} : vector<8x1xf32> -> vector<8x1xf32>
    %91 = vector.broadcast %90 : vector<8x1xf32> to vector<8x8xf32>
    %92 = arith.mulf %87, %91 : vector<8x8xf32>
    %93 = arith.truncf %92 : vector<8x8xf32> to vector<8x8xbf16>
    %cst_36 = arith.constant dense<0.000000e+00> : vector<8x32xf32>
    %94 = tpu.matmul %93, %78, %cst_36 {dimension_numbers = #tpu.dot_dimension_numbers<[1], [0], [0], [1], [0, 0, 1, 1], [], []>} : vector<8x8xbf16>, vector<8x32xbf16>, vector<8x32xf32> -> vector<8x32xf32>
    %95 = arith.truncf %94 : vector<8x32xf32> to vector<8x32xbf16>
    %c2 = arith.constant 2 : index
    %c0_37 = arith.constant 0 : index
    %c0_38 = arith.constant 0 : index
    %96 = vector.load %arg7[%c2, %c0_37, %c0_38] : memref<4x32x128xbf16, #tpu.memory_space<vmem>>, vector<1x32x128xbf16>
    %97 = vector.shape_cast %96 : vector<1x32x128xbf16> to vector<32x128xbf16>
    %cst_39 = arith.constant dense<0.000000e+00> : vector<8x128xf32>
    %98 = tpu.matmul %95, %97, %cst_39 {dimension_numbers = #tpu.dot_dimension_numbers<[1], [0], [0], [1], [0, 0, 1, 1], [], []>} : vector<8x32xbf16>, vector<32x128xbf16>, vector<8x128xf32> -> vector<8x128xf32>
    %99 = arith.addf %72, %98 : vector<8x128xf32>
    %100 = vector.extract_strided_slice %10 {offsets = [0, 96], sizes = [8, 32], strides = [1, 1]} : vector<8x128xf32> to vector<8x32xf32>
    %101 = arith.truncf %100 : vector<8x32xf32> to vector<8x32xbf16>
    %102 = vector.extract_strided_slice %11 {offsets = [0, 96], sizes = [8, 32], strides = [1, 1]} : vector<8x128xf32> to vector<8x32xf32>
    %103 = arith.truncf %102 : vector<8x32xf32> to vector<8x32xbf16>
    %104 = vector.extract_strided_slice %12 {offsets = [0, 96], sizes = [8, 32], strides = [1, 1]} : vector<8x128xf32> to vector<8x32xf32>
    %105 = arith.truncf %104 : vector<8x32xf32> to vector<8x32xbf16>
    %cst_40 = arith.constant dense<0.000000e+00> : vector<8x8xf32>
    %106 = tpu.matmul %101, %103, %cst_40 {dimension_numbers = #tpu.dot_dimension_numbers<[1], [1], [0], [0], [0, 0, 1, 0], [], []>} : vector<8x32xbf16>, vector<8x32xbf16>, vector<8x8xf32> -> vector<8x8xf32>
    %cst_41 = arith.constant 0.176776692 : f32
    %107 = vector.broadcast %cst_41 : f32 to vector<8x8xf32>
    %108 = arith.mulf %106, %107 : vector<8x8xf32>
    %109 = arith.addf %108, %14 : vector<8x8xf32>
    %cst_42 = arith.constant dense<0xFF800000> : vector<8xf32>
    %110 = vector.multi_reduction <maximumf>, %109, %cst_42 [1] : vector<8x8xf32> to vector<8xf32>
    %111 = vector.shape_cast %110 : vector<8xf32> to vector<8x1xf32>
    %112 = vector.broadcast %111 : vector<8x1xf32> to vector<8x8xf32>
    %113 = arith.subf %109, %112 : vector<8x8xf32>
    %114 = math.exp %113 : vector<8x8xf32>
    %cst_43 = arith.constant dense<0.000000e+00> : vector<8xf32>
    %115 = vector.multi_reduction <add>, %114, %cst_43 [1] : vector<8x8xf32> to vector<8xf32>
    %116 = vector.shape_cast %115 : vector<8xf32> to vector<8x1xf32>
    %117 = tpu.reciprocal %116 {approx = true} : vector<8x1xf32> -> vector<8x1xf32>
    %118 = vector.broadcast %117 : vector<8x1xf32> to vector<8x8xf32>
    %119 = arith.mulf %114, %118 : vector<8x8xf32>
    %120 = arith.truncf %119 : vector<8x8xf32> to vector<8x8xbf16>
    %cst_44 = arith.constant dense<0.000000e+00> : vector<8x32xf32>
    %121 = tpu.matmul %120, %105, %cst_44 {dimension_numbers = #tpu.dot_dimension_numbers<[1], [0], [0], [1], [0, 0, 1, 1], [], []>} : vector<8x8xbf16>, vector<8x32xbf16>, vector<8x32xf32> -> vector<8x32xf32>
    %122 = arith.truncf %121 : vector<8x32xf32> to vector<8x32xbf16>
    %c3 = arith.constant 3 : index
    %c0_45 = arith.constant 0 : index
    %c0_46 = arith.constant 0 : index
    %123 = vector.load %arg7[%c3, %c0_45, %c0_46] : memref<4x32x128xbf16, #tpu.memory_space<vmem>>, vector<1x32x128xbf16>
    %124 = vector.shape_cast %123 : vector<1x32x128xbf16> to vector<32x128xbf16>
    %cst_47 = arith.constant dense<0.000000e+00> : vector<8x128xf32>
    %125 = tpu.matmul %122, %124, %cst_47 {dimension_numbers = #tpu.dot_dimension_numbers<[1], [0], [0], [1], [0, 0, 1, 1], [], []>} : vector<8x32xbf16>, vector<32x128xbf16>, vector<8x128xf32> -> vector<8x128xf32>
    %126 = arith.addf %99, %125 : vector<8x128xf32>
    %127 = arith.addf %1, %126 : vector<8x128xf32>
    %cst_48 = arith.constant dense<0.000000e+00> : vector<8xf32>
    %128 = vector.multi_reduction <add>, %127, %cst_48 [1] : vector<8x128xf32> to vector<8xf32>
    %129 = vector.shape_cast %128 : vector<8xf32> to vector<8x1xf32>
    %cst_49 = arith.constant 1.280000e+02 : f32
    %130 = vector.broadcast %cst_49 : f32 to vector<8x1xf32>
    %131 = arith.divf %129, %130 : vector<8x1xf32>
    %132 = vector.broadcast %131 : vector<8x1xf32> to vector<8x128xf32>
    %133 = arith.subf %127, %132 : vector<8x128xf32>
    %134 = arith.mulf %133, %133 : vector<8x128xf32>
    %cst_50 = arith.constant dense<0.000000e+00> : vector<8xf32>
    %135 = vector.multi_reduction <add>, %134, %cst_50 [1] : vector<8x128xf32> to vector<8xf32>
    %136 = vector.shape_cast %135 : vector<8xf32> to vector<8x1xf32>
    %cst_51 = arith.constant 1.280000e+02 : f32
    %137 = vector.broadcast %cst_51 : f32 to vector<8x1xf32>
    %138 = arith.divf %136, %137 : vector<8x1xf32>
    %139 = vector.broadcast %131 : vector<8x1xf32> to vector<8x128xf32>
    %140 = arith.subf %127, %139 : vector<8x128xf32>
    %cst_52 = arith.constant 9.99999974E-6 : f32
    %141 = vector.broadcast %cst_52 : f32 to vector<8x1xf32>
    %142 = arith.addf %138, %141 : vector<8x1xf32>
    %143 = math.rsqrt %142 : vector<8x1xf32>
    %144 = vector.broadcast %143 : vector<8x1xf32> to vector<8x128xf32>
    %145 = arith.mulf %140, %144 : vector<8x128xf32>
    %c0_53 = arith.constant 0 : index
    %c0_54 = arith.constant 0 : index
    %146 = vector.load %arg19[%c0_53, %c0_54] : memref<1x128xf32, #tpu.memory_space<vmem>>, vector<1x128xf32>
    %147 = vector.broadcast %146 : vector<1x128xf32> to vector<8x128xf32>
    %148 = arith.mulf %145, %147 : vector<8x128xf32>
    %c0_55 = arith.constant 0 : index
    %c0_56 = arith.constant 0 : index
    %149 = vector.load %arg20[%c0_55, %c0_56] : memref<1x128xf32, #tpu.memory_space<vmem>>, vector<1x128xf32>
    %150 = vector.broadcast %149 : vector<1x128xf32> to vector<8x128xf32>
    %151 = arith.addf %148, %150 : vector<8x128xf32>
    %152 = arith.truncf %151 : vector<8x128xf32> to vector<8x128xbf16>
    %c0_57 = arith.constant 0 : index
    %c0_58 = arith.constant 0 : index
    %153 = vector.load %arg9[%c0_57, %c0_58] : memref<128x128xbf16, #tpu.memory_space<vmem>>, vector<128x128xbf16>
    %cst_59 = arith.constant dense<0.000000e+00> : vector<8x128xf32>
    %154 = tpu.matmul %152, %153, %cst_59 {dimension_numbers = #tpu.dot_dimension_numbers<[1], [0], [0], [1], [0, 0, 1, 1], [], []>} : vector<8x128xbf16>, vector<128x128xbf16>, vector<8x128xf32> -> vector<8x128xf32>
    %c0_60 = arith.constant 0 : index
    %c0_61 = arith.constant 0 : index
    %155 = vector.load %arg10[%c0_60, %c0_61] : memref<1x128xf32, #tpu.memory_space<vmem>>, vector<1x128xf32>
    %156 = vector.broadcast %155 : vector<1x128xf32> to vector<8x128xf32>
    %157 = arith.addf %154, %156 : vector<8x128xf32>
    %c0_62 = arith.constant 0 : index
    %c0_63 = arith.constant 0 : index
    %158 = vector.load %arg11[%c0_62, %c0_63] : memref<128x256xbf16, #tpu.memory_space<vmem>>, vector<128x256xbf16>
    %cst_64 = arith.constant dense<0.000000e+00> : vector<16x256xf32>
    %159 = tpu.matmul %3, %158, %cst_64 {dimension_numbers = #tpu.dot_dimension_numbers<[1], [0], [0], [1], [0, 0, 1, 1], [], []>} : vector<16x128xbf16>, vector<128x256xbf16>, vector<16x256xf32> -> vector<16x256xf32>
    %c0_65 = arith.constant 0 : index
    %c0_66 = arith.constant 0 : index
    %160 = vector.load %arg12[%c0_65, %c0_66] : memref<1x256xf32, #tpu.memory_space<vmem>>, vector<1x256xf32>
    %161 = vector.broadcast %160 : vector<1x256xf32> to vector<16x256xf32>
    %162 = arith.addf %159, %161 : vector<16x256xf32>
    %163 = vector.extract_strided_slice %162 {offsets = [0, 0], sizes = [16, 128], strides = [1, 1]} : vector<16x256xf32> to vector<16x128xf32>
    %164 = vector.extract_strided_slice %162 {offsets = [0, 128], sizes = [16, 128], strides = [1, 1]} : vector<16x256xf32> to vector<16x128xf32>
    %c0_67 = arith.constant 0 : index
    %c0_68 = arith.constant 0 : index
    %c0_69 = arith.constant 0 : index
    %165 = vector.load %arg4[%c0_67, %c0_68, %c0_69] : memref<1x1x16xf32, #tpu.memory_space<vmem>>, vector<1x1x16xf32>
    %166 = vector.shape_cast %165 : vector<1x1x16xf32> to vector<1x16xf32>
    %cst_70 = arith.constant 0.000000e+00 : f32
    %167 = vector.broadcast %cst_70 : f32 to vector<8x128xf32>
    %c0_71 = arith.constant 0 : index
    %c0_72 = arith.constant 0 : index
    %168 = vector.load %arg14[%c0_71, %c0_72] : memref<1x128xf32, #tpu.memory_space<vmem>>, vector<1x128xf32>
    %169 = vector.broadcast %168 : vector<1x128xf32> to vector<8x128xf32>
    %170 = arith.addf %167, %169 : vector<8x128xf32>
    %171 = vector.extract_strided_slice %157 {offsets = [0, 0], sizes = [8, 32], strides = [1, 1]} : vector<8x128xf32> to vector<8x32xf32>
    %172 = arith.truncf %171 : vector<8x32xf32> to vector<8x32xbf16>
    %173 = vector.extract_strided_slice %163 {offsets = [0, 0], sizes = [16, 32], strides = [1, 1]} : vector<16x128xf32> to vector<16x32xf32>
    %174 = arith.truncf %173 : vector<16x32xf32> to vector<16x32xbf16>
    %175 = vector.extract_strided_slice %164 {offsets = [0, 0], sizes = [16, 32], strides = [1, 1]} : vector<16x128xf32> to vector<16x32xf32>
    %176 = arith.truncf %175 : vector<16x32xf32> to vector<16x32xbf16>
    %cst_73 = arith.constant dense<0.000000e+00> : vector<8x16xf32>
    %177 = tpu.matmul %172, %174, %cst_73 {dimension_numbers = #tpu.dot_dimension_numbers<[1], [1], [0], [0], [0, 0, 1, 0], [], []>} : vector<8x32xbf16>, vector<16x32xbf16>, vector<8x16xf32> -> vector<8x16xf32>
    %cst_74 = arith.constant 0.176776692 : f32
    %178 = vector.broadcast %cst_74 : f32 to vector<8x16xf32>
    %179 = arith.mulf %177, %178 : vector<8x16xf32>
    %180 = vector.broadcast %166 : vector<1x16xf32> to vector<8x16xf32>
    %181 = arith.addf %179, %180 : vector<8x16xf32>
    %cst_75 = arith.constant dense<0xFF800000> : vector<8xf32>
    %182 = vector.multi_reduction <maximumf>, %181, %cst_75 [1] : vector<8x16xf32> to vector<8xf32>
    %183 = vector.shape_cast %182 : vector<8xf32> to vector<8x1xf32>
    %184 = vector.broadcast %183 : vector<8x1xf32> to vector<8x16xf32>
    %185 = arith.subf %181, %184 : vector<8x16xf32>
    %186 = math.exp %185 : vector<8x16xf32>
    %cst_76 = arith.constant dense<0.000000e+00> : vector<8xf32>
    %187 = vector.multi_reduction <add>, %186, %cst_76 [1] : vector<8x16xf32> to vector<8xf32>
    %188 = vector.shape_cast %187 : vector<8xf32> to vector<8x1xf32>
    %189 = tpu.reciprocal %188 {approx = true} : vector<8x1xf32> -> vector<8x1xf32>
    %190 = vector.broadcast %189 : vector<8x1xf32> to vector<8x16xf32>
    %191 = arith.mulf %186, %190 : vector<8x16xf32>
    %192 = arith.truncf %191 : vector<8x16xf32> to vector<8x16xbf16>
    %cst_77 = arith.constant dense<0.000000e+00> : vector<8x32xf32>
    %193 = tpu.matmul %192, %176, %cst_77 {dimension_numbers = #tpu.dot_dimension_numbers<[1], [0], [0], [1], [0, 0, 1, 1], [], []>} : vector<8x16xbf16>, vector<16x32xbf16>, vector<8x32xf32> -> vector<8x32xf32>
    %194 = arith.truncf %193 : vector<8x32xf32> to vector<8x32xbf16>
    %c0_78 = arith.constant 0 : index
    %c0_79 = arith.constant 0 : index
    %c0_80 = arith.constant 0 : index
    %195 = vector.load %arg13[%c0_78, %c0_79, %c0_80] : memref<4x32x128xbf16, #tpu.memory_space<vmem>>, vector<1x32x128xbf16>
    %196 = vector.shape_cast %195 : vector<1x32x128xbf16> to vector<32x128xbf16>
    %cst_81 = arith.constant dense<0.000000e+00> : vector<8x128xf32>
    %197 = tpu.matmul %194, %196, %cst_81 {dimension_numbers = #tpu.dot_dimension_numbers<[1], [0], [0], [1], [0, 0, 1, 1], [], []>} : vector<8x32xbf16>, vector<32x128xbf16>, vector<8x128xf32> -> vector<8x128xf32>
    %198 = arith.addf %170, %197 : vector<8x128xf32>
    %199 = vector.extract_strided_slice %157 {offsets = [0, 32], sizes = [8, 32], strides = [1, 1]} : vector<8x128xf32> to vector<8x32xf32>
    %200 = arith.truncf %199 : vector<8x32xf32> to vector<8x32xbf16>
    %201 = vector.extract_strided_slice %163 {offsets = [0, 32], sizes = [16, 32], strides = [1, 1]} : vector<16x128xf32> to vector<16x32xf32>
    %202 = arith.truncf %201 : vector<16x32xf32> to vector<16x32xbf16>
    %203 = vector.extract_strided_slice %164 {offsets = [0, 32], sizes = [16, 32], strides = [1, 1]} : vector<16x128xf32> to vector<16x32xf32>
    %204 = arith.truncf %203 : vector<16x32xf32> to vector<16x32xbf16>
    %cst_82 = arith.constant dense<0.000000e+00> : vector<8x16xf32>
    %205 = tpu.matmul %200, %202, %cst_82 {dimension_numbers = #tpu.dot_dimension_numbers<[1], [1], [0], [0], [0, 0, 1, 0], [], []>} : vector<8x32xbf16>, vector<16x32xbf16>, vector<8x16xf32> -> vector<8x16xf32>
    %cst_83 = arith.constant 0.176776692 : f32
    %206 = vector.broadcast %cst_83 : f32 to vector<8x16xf32>
    %207 = arith.mulf %205, %206 : vector<8x16xf32>
    %208 = vector.broadcast %166 : vector<1x16xf32> to vector<8x16xf32>
    %209 = arith.addf %207, %208 : vector<8x16xf32>
    %cst_84 = arith.constant dense<0xFF800000> : vector<8xf32>
    %210 = vector.multi_reduction <maximumf>, %209, %cst_84 [1] : vector<8x16xf32> to vector<8xf32>
    %211 = vector.shape_cast %210 : vector<8xf32> to vector<8x1xf32>
    %212 = vector.broadcast %211 : vector<8x1xf32> to vector<8x16xf32>
    %213 = arith.subf %209, %212 : vector<8x16xf32>
    %214 = math.exp %213 : vector<8x16xf32>
    %cst_85 = arith.constant dense<0.000000e+00> : vector<8xf32>
    %215 = vector.multi_reduction <add>, %214, %cst_85 [1] : vector<8x16xf32> to vector<8xf32>
    %216 = vector.shape_cast %215 : vector<8xf32> to vector<8x1xf32>
    %217 = tpu.reciprocal %216 {approx = true} : vector<8x1xf32> -> vector<8x1xf32>
    %218 = vector.broadcast %217 : vector<8x1xf32> to vector<8x16xf32>
    %219 = arith.mulf %214, %218 : vector<8x16xf32>
    %220 = arith.truncf %219 : vector<8x16xf32> to vector<8x16xbf16>
    %cst_86 = arith.constant dense<0.000000e+00> : vector<8x32xf32>
    %221 = tpu.matmul %220, %204, %cst_86 {dimension_numbers = #tpu.dot_dimension_numbers<[1], [0], [0], [1], [0, 0, 1, 1], [], []>} : vector<8x16xbf16>, vector<16x32xbf16>, vector<8x32xf32> -> vector<8x32xf32>
    %222 = arith.truncf %221 : vector<8x32xf32> to vector<8x32xbf16>
    %c1_87 = arith.constant 1 : index
    %c0_88 = arith.constant 0 : index
    %c0_89 = arith.constant 0 : index
    %223 = vector.load %arg13[%c1_87, %c0_88, %c0_89] : memref<4x32x128xbf16, #tpu.memory_space<vmem>>, vector<1x32x128xbf16>
    %224 = vector.shape_cast %223 : vector<1x32x128xbf16> to vector<32x128xbf16>
    %cst_90 = arith.constant dense<0.000000e+00> : vector<8x128xf32>
    %225 = tpu.matmul %222, %224, %cst_90 {dimension_numbers = #tpu.dot_dimension_numbers<[1], [0], [0], [1], [0, 0, 1, 1], [], []>} : vector<8x32xbf16>, vector<32x128xbf16>, vector<8x128xf32> -> vector<8x128xf32>
    %226 = arith.addf %198, %225 : vector<8x128xf32>
    %227 = vector.extract_strided_slice %157 {offsets = [0, 64], sizes = [8, 32], strides = [1, 1]} : vector<8x128xf32> to vector<8x32xf32>
    %228 = arith.truncf %227 : vector<8x32xf32> to vector<8x32xbf16>
    %229 = vector.extract_strided_slice %163 {offsets = [0, 64], sizes = [16, 32], strides = [1, 1]} : vector<16x128xf32> to vector<16x32xf32>
    %230 = arith.truncf %229 : vector<16x32xf32> to vector<16x32xbf16>
    %231 = vector.extract_strided_slice %164 {offsets = [0, 64], sizes = [16, 32], strides = [1, 1]} : vector<16x128xf32> to vector<16x32xf32>
    %232 = arith.truncf %231 : vector<16x32xf32> to vector<16x32xbf16>
    %cst_91 = arith.constant dense<0.000000e+00> : vector<8x16xf32>
    %233 = tpu.matmul %228, %230, %cst_91 {dimension_numbers = #tpu.dot_dimension_numbers<[1], [1], [0], [0], [0, 0, 1, 0], [], []>} : vector<8x32xbf16>, vector<16x32xbf16>, vector<8x16xf32> -> vector<8x16xf32>
    %cst_92 = arith.constant 0.176776692 : f32
    %234 = vector.broadcast %cst_92 : f32 to vector<8x16xf32>
    %235 = arith.mulf %233, %234 : vector<8x16xf32>
    %236 = vector.broadcast %166 : vector<1x16xf32> to vector<8x16xf32>
    %237 = arith.addf %235, %236 : vector<8x16xf32>
    %cst_93 = arith.constant dense<0xFF800000> : vector<8xf32>
    %238 = vector.multi_reduction <maximumf>, %237, %cst_93 [1] : vector<8x16xf32> to vector<8xf32>
    %239 = vector.shape_cast %238 : vector<8xf32> to vector<8x1xf32>
    %240 = vector.broadcast %239 : vector<8x1xf32> to vector<8x16xf32>
    %241 = arith.subf %237, %240 : vector<8x16xf32>
    %242 = math.exp %241 : vector<8x16xf32>
    %cst_94 = arith.constant dense<0.000000e+00> : vector<8xf32>
    %243 = vector.multi_reduction <add>, %242, %cst_94 [1] : vector<8x16xf32> to vector<8xf32>
    %244 = vector.shape_cast %243 : vector<8xf32> to vector<8x1xf32>
    %245 = tpu.reciprocal %244 {approx = true} : vector<8x1xf32> -> vector<8x1xf32>
    %246 = vector.broadcast %245 : vector<8x1xf32> to vector<8x16xf32>
    %247 = arith.mulf %242, %246 : vector<8x16xf32>
    %248 = arith.truncf %247 : vector<8x16xf32> to vector<8x16xbf16>
    %cst_95 = arith.constant dense<0.000000e+00> : vector<8x32xf32>
    %249 = tpu.matmul %248, %232, %cst_95 {dimension_numbers = #tpu.dot_dimension_numbers<[1], [0], [0], [1], [0, 0, 1, 1], [], []>} : vector<8x16xbf16>, vector<16x32xbf16>, vector<8x32xf32> -> vector<8x32xf32>
    %250 = arith.truncf %249 : vector<8x32xf32> to vector<8x32xbf16>
    %c2_96 = arith.constant 2 : index
    %c0_97 = arith.constant 0 : index
    %c0_98 = arith.constant 0 : index
    %251 = vector.load %arg13[%c2_96, %c0_97, %c0_98] : memref<4x32x128xbf16, #tpu.memory_space<vmem>>, vector<1x32x128xbf16>
    %252 = vector.shape_cast %251 : vector<1x32x128xbf16> to vector<32x128xbf16>
    %cst_99 = arith.constant dense<0.000000e+00> : vector<8x128xf32>
    %253 = tpu.matmul %250, %252, %cst_99 {dimension_numbers = #tpu.dot_dimension_numbers<[1], [0], [0], [1], [0, 0, 1, 1], [], []>} : vector<8x32xbf16>, vector<32x128xbf16>, vector<8x128xf32> -> vector<8x128xf32>
    %254 = arith.addf %226, %253 : vector<8x128xf32>
    %255 = vector.extract_strided_slice %157 {offsets = [0, 96], sizes = [8, 32], strides = [1, 1]} : vector<8x128xf32> to vector<8x32xf32>
    %256 = arith.truncf %255 : vector<8x32xf32> to vector<8x32xbf16>
    %257 = vector.extract_strided_slice %163 {offsets = [0, 96], sizes = [16, 32], strides = [1, 1]} : vector<16x128xf32> to vector<16x32xf32>
    %258 = arith.truncf %257 : vector<16x32xf32> to vector<16x32xbf16>
    %259 = vector.extract_strided_slice %164 {offsets = [0, 96], sizes = [16, 32], strides = [1, 1]} : vector<16x128xf32> to vector<16x32xf32>
    %260 = arith.truncf %259 : vector<16x32xf32> to vector<16x32xbf16>
    %cst_100 = arith.constant dense<0.000000e+00> : vector<8x16xf32>
    %261 = tpu.matmul %256, %258, %cst_100 {dimension_numbers = #tpu.dot_dimension_numbers<[1], [1], [0], [0], [0, 0, 1, 0], [], []>} : vector<8x32xbf16>, vector<16x32xbf16>, vector<8x16xf32> -> vector<8x16xf32>
    %cst_101 = arith.constant 0.176776692 : f32
    %262 = vector.broadcast %cst_101 : f32 to vector<8x16xf32>
    %263 = arith.mulf %261, %262 : vector<8x16xf32>
    %264 = vector.broadcast %166 : vector<1x16xf32> to vector<8x16xf32>
    %265 = arith.addf %263, %264 : vector<8x16xf32>
    %cst_102 = arith.constant dense<0xFF800000> : vector<8xf32>
    %266 = vector.multi_reduction <maximumf>, %265, %cst_102 [1] : vector<8x16xf32> to vector<8xf32>
    %267 = vector.shape_cast %266 : vector<8xf32> to vector<8x1xf32>
    %268 = vector.broadcast %267 : vector<8x1xf32> to vector<8x16xf32>
    %269 = arith.subf %265, %268 : vector<8x16xf32>
    %270 = math.exp %269 : vector<8x16xf32>
    %cst_103 = arith.constant dense<0.000000e+00> : vector<8xf32>
    %271 = vector.multi_reduction <add>, %270, %cst_103 [1] : vector<8x16xf32> to vector<8xf32>
    %272 = vector.shape_cast %271 : vector<8xf32> to vector<8x1xf32>
    %273 = tpu.reciprocal %272 {approx = true} : vector<8x1xf32> -> vector<8x1xf32>
    %274 = vector.broadcast %273 : vector<8x1xf32> to vector<8x16xf32>
    %275 = arith.mulf %270, %274 : vector<8x16xf32>
    %276 = arith.truncf %275 : vector<8x16xf32> to vector<8x16xbf16>
    %cst_104 = arith.constant dense<0.000000e+00> : vector<8x32xf32>
    %277 = tpu.matmul %276, %260, %cst_104 {dimension_numbers = #tpu.dot_dimension_numbers<[1], [0], [0], [1], [0, 0, 1, 1], [], []>} : vector<8x16xbf16>, vector<16x32xbf16>, vector<8x32xf32> -> vector<8x32xf32>
    %278 = arith.truncf %277 : vector<8x32xf32> to vector<8x32xbf16>
    %c3_105 = arith.constant 3 : index
    %c0_106 = arith.constant 0 : index
    %c0_107 = arith.constant 0 : index
    %279 = vector.load %arg13[%c3_105, %c0_106, %c0_107] : memref<4x32x128xbf16, #tpu.memory_space<vmem>>, vector<1x32x128xbf16>
    %280 = vector.shape_cast %279 : vector<1x32x128xbf16> to vector<32x128xbf16>
    %cst_108 = arith.constant dense<0.000000e+00> : vector<8x128xf32>
    %281 = tpu.matmul %278, %280, %cst_108 {dimension_numbers = #tpu.dot_dimension_numbers<[1], [0], [0], [1], [0, 0, 1, 1], [], []>} : vector<8x32xbf16>, vector<32x128xbf16>, vector<8x128xf32> -> vector<8x128xf32>
    %282 = arith.addf %254, %281 : vector<8x128xf32>
    %283 = arith.addf %151, %282 : vector<8x128xf32>
    %cst_109 = arith.constant dense<0.000000e+00> : vector<8xf32>
    %284 = vector.multi_reduction <add>, %283, %cst_109 [1] : vector<8x128xf32> to vector<8xf32>
    %285 = vector.shape_cast %284 : vector<8xf32> to vector<8x1xf32>
    %cst_110 = arith.constant 1.280000e+02 : f32
    %286 = vector.broadcast %cst_110 : f32 to vector<8x1xf32>
    %287 = arith.divf %285, %286 : vector<8x1xf32>
    %288 = vector.broadcast %287 : vector<8x1xf32> to vector<8x128xf32>
    %289 = arith.subf %283, %288 : vector<8x128xf32>
    %290 = arith.mulf %289, %289 : vector<8x128xf32>
    %cst_111 = arith.constant dense<0.000000e+00> : vector<8xf32>
    %291 = vector.multi_reduction <add>, %290, %cst_111 [1] : vector<8x128xf32> to vector<8xf32>
    %292 = vector.shape_cast %291 : vector<8xf32> to vector<8x1xf32>
    %cst_112 = arith.constant 1.280000e+02 : f32
    %293 = vector.broadcast %cst_112 : f32 to vector<8x1xf32>
    %294 = arith.divf %292, %293 : vector<8x1xf32>
    %295 = vector.broadcast %287 : vector<8x1xf32> to vector<8x128xf32>
    %296 = arith.subf %283, %295 : vector<8x128xf32>
    %cst_113 = arith.constant 9.99999974E-6 : f32
    %297 = vector.broadcast %cst_113 : f32 to vector<8x1xf32>
    %298 = arith.addf %294, %297 : vector<8x1xf32>
    %299 = math.rsqrt %298 : vector<8x1xf32>
    %300 = vector.broadcast %299 : vector<8x1xf32> to vector<8x128xf32>
    %301 = arith.mulf %296, %300 : vector<8x128xf32>
    %c0_114 = arith.constant 0 : index
    %c0_115 = arith.constant 0 : index
    %302 = vector.load %arg21[%c0_114, %c0_115] : memref<1x128xf32, #tpu.memory_space<vmem>>, vector<1x128xf32>
    %303 = vector.broadcast %302 : vector<1x128xf32> to vector<8x128xf32>
    %304 = arith.mulf %301, %303 : vector<8x128xf32>
    %c0_116 = arith.constant 0 : index
    %c0_117 = arith.constant 0 : index
    %305 = vector.load %arg22[%c0_116, %c0_117] : memref<1x128xf32, #tpu.memory_space<vmem>>, vector<1x128xf32>
    %306 = vector.broadcast %305 : vector<1x128xf32> to vector<8x128xf32>
    %307 = arith.addf %304, %306 : vector<8x128xf32>
    %308 = arith.truncf %307 : vector<8x128xf32> to vector<8x128xbf16>
    %c0_118 = arith.constant 0 : index
    %c0_119 = arith.constant 0 : index
    %309 = vector.load %arg15[%c0_118, %c0_119] : memref<128x256xbf16, #tpu.memory_space<vmem>>, vector<128x256xbf16>
    %cst_120 = arith.constant dense<0.000000e+00> : vector<8x256xf32>
    %310 = tpu.matmul %308, %309, %cst_120 {dimension_numbers = #tpu.dot_dimension_numbers<[1], [0], [0], [1], [0, 0, 1, 1], [], []>} : vector<8x128xbf16>, vector<128x256xbf16>, vector<8x256xf32> -> vector<8x256xf32>
    %c0_121 = arith.constant 0 : index
    %c0_122 = arith.constant 0 : index
    %311 = vector.load %arg16[%c0_121, %c0_122] : memref<1x256xf32, #tpu.memory_space<vmem>>, vector<1x256xf32>
    %312 = vector.broadcast %311 : vector<1x256xf32> to vector<8x256xf32>
    %313 = arith.addf %310, %312 : vector<8x256xf32>
    %cst_123 = arith.constant 0.000000e+00 : f32
    %314 = vector.broadcast %cst_123 : f32 to vector<8x256xf32>
    %315 = arith.maximumf %313, %314 : vector<8x256xf32>
    %316 = arith.truncf %315 : vector<8x256xf32> to vector<8x256xbf16>
    %c0_124 = arith.constant 0 : index
    %c0_125 = arith.constant 0 : index
    %317 = vector.load %arg17[%c0_124, %c0_125] : memref<256x128xbf16, #tpu.memory_space<vmem>>, vector<256x128xbf16>
    %cst_126 = arith.constant dense<0.000000e+00> : vector<8x128xf32>
    %318 = tpu.matmul %316, %317, %cst_126 {dimension_numbers = #tpu.dot_dimension_numbers<[1], [0], [0], [1], [0, 0, 1, 1], [], []>} : vector<8x256xbf16>, vector<256x128xbf16>, vector<8x128xf32> -> vector<8x128xf32>
    %c0_127 = arith.constant 0 : index
    %c0_128 = arith.constant 0 : index
    %319 = vector.load %arg18[%c0_127, %c0_128] : memref<1x128xf32, #tpu.memory_space<vmem>>, vector<1x128xf32>
    %320 = vector.broadcast %319 : vector<1x128xf32> to vector<8x128xf32>
    %321 = arith.addf %318, %320 : vector<8x128xf32>
    %322 = arith.addf %307, %321 : vector<8x128xf32>
    %cst_129 = arith.constant dense<0.000000e+00> : vector<8xf32>
    %323 = vector.multi_reduction <add>, %322, %cst_129 [1] : vector<8x128xf32> to vector<8xf32>
    %324 = vector.shape_cast %323 : vector<8xf32> to vector<8x1xf32>
    %cst_130 = arith.constant 1.280000e+02 : f32
    %325 = vector.broadcast %cst_130 : f32 to vector<8x1xf32>
    %326 = arith.divf %324, %325 : vector<8x1xf32>
    %327 = vector.broadcast %326 : vector<8x1xf32> to vector<8x128xf32>
    %328 = arith.subf %322, %327 : vector<8x128xf32>
    %329 = arith.mulf %328, %328 : vector<8x128xf32>
    %cst_131 = arith.constant dense<0.000000e+00> : vector<8xf32>
    %330 = vector.multi_reduction <add>, %329, %cst_131 [1] : vector<8x128xf32> to vector<8xf32>
    %331 = vector.shape_cast %330 : vector<8xf32> to vector<8x1xf32>
    %cst_132 = arith.constant 1.280000e+02 : f32
    %332 = vector.broadcast %cst_132 : f32 to vector<8x1xf32>
    %333 = arith.divf %331, %332 : vector<8x1xf32>
    %334 = vector.broadcast %326 : vector<8x1xf32> to vector<8x128xf32>
    %335 = arith.subf %322, %334 : vector<8x128xf32>
    %cst_133 = arith.constant 9.99999974E-6 : f32
    %336 = vector.broadcast %cst_133 : f32 to vector<8x1xf32>
    %337 = arith.addf %333, %336 : vector<8x1xf32>
    %338 = math.rsqrt %337 : vector<8x1xf32>
    %339 = vector.broadcast %338 : vector<8x1xf32> to vector<8x128xf32>
    %340 = arith.mulf %335, %339 : vector<8x128xf32>
    %c0_134 = arith.constant 0 : index
    %c0_135 = arith.constant 0 : index
    %341 = vector.load %arg23[%c0_134, %c0_135] : memref<1x128xf32, #tpu.memory_space<vmem>>, vector<1x128xf32>
    %342 = vector.broadcast %341 : vector<1x128xf32> to vector<8x128xf32>
    %343 = arith.mulf %340, %342 : vector<8x128xf32>
    %c0_136 = arith.constant 0 : index
    %c0_137 = arith.constant 0 : index
    %344 = vector.load %arg24[%c0_136, %c0_137] : memref<1x128xf32, #tpu.memory_space<vmem>>, vector<1x128xf32>
    %345 = vector.broadcast %344 : vector<1x128xf32> to vector<8x128xf32>
    %346 = arith.addf %343, %345 : vector<8x128xf32>
    %c0_138 = arith.constant 0 : index
    %c0_139 = arith.constant 0 : index
    %c0_140 = arith.constant 0 : index
    %347 = vector.load %arg25[%c0_138, %c0_139, %c0_140] : memref<1x8x128xf32, #tpu.memory_space<vmem>>, vector<1x8x128xf32>
    %348 = vector.shape_cast %347 : vector<1x8x128xf32> to vector<8x128xf32>
    %349 = vector.shape_cast %346 : vector<8x128xf32> to vector<1x8x128xf32>
    tpu.vector_store %arg25[%c0_138, %c0_139, %c0_140], %349 {strides = array<i32>} : memref<1x8x128xf32, #tpu.memory_space<vmem>>, vector<1x8x128xf32>,
    return
  }
  func.func @transform_0(%arg0: i32) -> (i32, i32, i32) {
    %c0_i32 = arith.constant 0 : i32
    %c0_i32_0 = arith.constant 0 : i32
    %c0_i32_1 = arith.constant 0 : i32
    return %arg0, %c0_i32, %c0_i32_0 : i32, i32, i32
  }
  func.func @transform_1(%arg0: i32) -> (i32, i32, i32) {
    %c0_i32 = arith.constant 0 : i32
    %c0_i32_0 = arith.constant 0 : i32
    %c0_i32_1 = arith.constant 0 : i32
    return %arg0, %c0_i32, %c0_i32_0 : i32, i32, i32
  }
  func.func @transform_2(%arg0: i32) -> (i32, i32, i32) {
    %c0_i32 = arith.constant 0 : i32
    %c0_i32_0 = arith.constant 0 : i32
    %c0_i32_1 = arith.constant 0 : i32
    return %arg0, %c0_i32, %c0_i32_0 : i32, i32, i32
  }
  func.func @transform_3(%arg0: i32) -> (i32, i32, i32) {
    %c0_i32 = arith.constant 0 : i32
    %c0_i32_0 = arith.constant 0 : i32
    %c0_i32_1 = arith.constant 0 : i32
    return %arg0, %c0_i32, %c0_i32_0 : i32, i32, i32
  }
  func.func @transform_4(%arg0: i32) -> (i32, i32) {
    %c0_i32 = arith.constant 0 : i32
    %c0_i32_0 = arith.constant 0 : i32
    %c0_i32_1 = arith.constant 0 : i32
    return %c0_i32, %c0_i32_0 : i32, i32
  }
  func.func @transform_5(%arg0: i32) -> (i32, i32) {
    %c0_i32 = arith.constant 0 : i32
    %c0_i32_0 = arith.constant 0 : i32
    %c0_i32_1 = arith.constant 0 : i32
    return %c0_i32, %c0_i32_0 : i32, i32
  }
  func.func @transform_6(%arg0: i32) -> (i32, i32, i32) {
    %c0_i32 = arith.constant 0 : i32
    %c0_i32_0 = arith.constant 0 : i32
    %c0_i32_1 = arith.constant 0 : i32
    %c0_i32_2 = arith.constant 0 : i32
    return %c0_i32, %c0_i32_0, %c0_i32_1 : i32, i32, i32
  }
  func.func @transform_7(%arg0: i32) -> (i32, i32) {
    %c0_i32 = arith.constant 0 : i32
    %c0_i32_0 = arith.constant 0 : i32
    %c0_i32_1 = arith.constant 0 : i32
    return %c0_i32, %c0_i32_0 : i32, i32
  }
  func.func @transform_8(%arg0: i32) -> (i32, i32) {
    %c0_i32 = arith.constant 0 : i32
    %c0_i32_0 = arith.constant 0 : i32
    %c0_i32_1 = arith.constant 0 : i32
    return %c0_i32, %c0_i32_0 : i32, i32
  }
  func.func @transform_9(%arg0: i32) -> (i32, i32) {
    %c0_i32 = arith.constant 0 : i32
    %c0_i32_0 = arith.constant 0 : i32
    %c0_i32_1 = arith.constant 0 : i32
    return %c0_i32, %c0_i32_0 : i32, i32
  }
  func.func @transform_10(%arg0: i32) -> (i32, i32) {
    %c0_i32 = arith.constant 0 : i32
    %c0_i32_0 = arith.constant 0 : i32
    %c0_i32_1 = arith.constant 0 : i32
    return %c0_i32, %c0_i32_0 : i32, i32
  }
  func.func @transform_11(%arg0: i32) -> (i32, i32) {
    %c0_i32 = arith.constant 0 : i32
    %c0_i32_0 = arith.constant 0 : i32
    %c0_i32_1 = arith.constant 0 : i32
    return %c0_i32, %c0_i32_0 : i32, i32
  }
  func.func @transform_12(%arg0: i32) -> (i32, i32, i32) {
    %c0_i32 = arith.constant 0 : i32
    %c0_i32_0 = arith.constant 0 : i32
    %c0_i32_1 = arith.constant 0 : i32
    %c0_i32_2 = arith.constant 0 : i32
    return %c0_i32, %c0_i32_0, %c0_i32_1 : i32, i32, i32
  }
  func.func @transform_13(%arg0: i32) -> (i32, i32) {
    %c0_i32 = arith.constant 0 : i32
    %c0_i32_0 = arith.constant 0 : i32
    %c0_i32_1 = arith.constant 0 : i32
    return %c0_i32, %c0_i32_0 : i32, i32
  }
  func.func @transform_14(%arg0: i32) -> (i32, i32) {
    %c0_i32 = arith.constant 0 : i32
    %c0_i32_0 = arith.constant 0 : i32
    %c0_i32_1 = arith.constant 0 : i32
    return %c0_i32, %c0_i32_0 : i32, i32
  }
  func.func @transform_15(%arg0: i32) -> (i32, i32) {
    %c0_i32 = arith.constant 0 : i32
    %c0_i32_0 = arith.constant 0 : i32
    %c0_i32_1 = arith.constant 0 : i32
    return %c0_i32, %c0_i32_0 : i32, i32
  }
  func.func @transform_16(%arg0: i32) -> (i32, i32) {
    %c0_i32 = arith.constant 0 : i32
    %c0_i32_0 = arith.constant 0 : i32
    %c0_i32_1 = arith.constant 0 : i32
    return %c0_i32, %c0_i32_0 : i32, i32
  }
  func.func @transform_17(%arg0: i32) -> (i32, i32) {
    %c0_i32 = arith.constant 0 : i32
    %c0_i32_0 = arith.constant 0 : i32
    %c0_i32_1 = arith.constant 0 : i32
    return %c0_i32, %c0_i32_0 : i32, i32
  }
  func.func @transform_18(%arg0: i32) -> (i32, i32) {
    %c0_i32 = arith.constant 0 : i32
    %c0_i32_0 = arith.constant 0 : i32
    %c0_i32_1 = arith.constant 0 : i32
    return %c0_i32, %c0_i32_0 : i32, i32
  }
  func.func @transform_19(%arg0: i32) -> (i32, i32) {
    %c0_i32 = arith.constant 0 : i32
    %c0_i32_0 = arith.constant 0 : i32
    %c0_i32_1 = arith.constant 0 : i32
    return %c0_i32, %c0_i32_0 : i32, i32
  }
  func.func @transform_20(%arg0: i32) -> (i32, i32) {
    %c0_i32 = arith.constant 0 : i32
    %c0_i32_0 = arith.constant 0 : i32
    %c0_i32_1 = arith.constant 0 : i32
    return %c0_i32, %c0_i32_0 : i32, i32
  }
  func.func @transform_21(%arg0: i32) -> (i32, i32) {
    %c0_i32 = arith.constant 0 : i32
    %c0_i32_0 = arith.constant 0 : i32
    %c0_i32_1 = arith.constant 0 : i32
    return %c0_i32, %c0_i32_0 : i32, i32
  }
  func.func @transform_22(%arg0: i32) -> (i32, i32) {
    %c0_i32 = arith.constant 0 : i32
    %c0_i32_0 = arith.constant 0 : i32
    %c0_i32_1 = arith.constant 0 : i32
    return %c0_i32, %c0_i32_0 : i32, i32
  }
  func.func @transform_23(%arg0: i32) -> (i32, i32) {
    %c0_i32 = arith.constant 0 : i32
    %c0_i32_0 = arith.constant 0 : i32
    %c0_i32_1 = arith.constant 0 : i32
    return %c0_i32, %c0_i32_0 : i32, i32
  }
  func.func @transform_24(%arg0: i32) -> (i32, i32, i32) {
    %c0_i32 = arith.constant 0 : i32
    %c0_i32_0 = arith.constant 0 : i32
    %c0_i32_1 = arith.constant 0 : i32
    return %arg0, %c0_i32, %c0_i32_0 : i32, i32, i32
  }
}

</mosaic_0001>

<bundles_post_ra>
// kernel: swipe_decoder_forward.5
= control target key start
LH: loop header
LB: loop body
LE: loop exit
PB: predicated region body
PF: predicated region fallthrough
CT: control target
= control target key end

     0   :  { %8 = vsyncpa [#allocation4], 0  ;;  %s221_s15 = smov [#allocation3]   ;;  %s222_s17 = smov 64   ;;  %s259_s0 = inlined_call_operand.vmem [shape: bf16[16,128], index: 0, kind: input, shape index: {}]   ;;  %s260_s1 = inlined_call_operand.hbm [shape: bf16[128,128], index: 1, kind: input, shape index: {}]   ;;  %s261_s2 = inlined_call_operand.vmem [shape: f32[1,128], index: 2, kind: input, shape index: {}]   ;;  %s262_s3 = inlined_call_operand.vmem [shape: f32[16,128], index: 3, kind: output, shape index: {}]  }
   0x1   :  { %s15_s14 = sshll.u32 %s260_s1, 4  ;;  %s17_s16 = sshll.u32 %s221_s15, 4  ;;  %s16_s14 = int_to_ptr.hbm [resolvable:$true] %s15_s14  ;;  %s18_s16 = int_to_ptr.vmem [resolvable:$true] %s17_s16 }
   0x2   :  { %s223_s18 = smov 4  }
   0x3   :  { %23 = dma.hbm_to_vmem [thread:$0]  %s16_s14, 1024, %s18_s16, [#allocation4], %s222_s17, %s222_s17, %s223_s18  }
   0x4   :  { %219 = dma.done.wait [#allocation4], 1024  }
   0x5   :  { %220 = vsyncadd [#allocation4], 4294966272  ;;  %v190_v0 = vld [vmem:[#allocation3 + $0x38] sm:$0xff]  ;;  %v189_v1 = vld [vmem:[#allocation3 + $0x30] sm:$0xff] }
   0x6   :  { %110 = vmatpush.bf16.msra.mxu0 %v190_v0  ;;  %v188_v2 = vld [vmem:[#allocation3 + $0x28] sm:$0xff]  ;;  %v187_v3 = vld [vmem:[#allocation3 + $0x20] sm:$0xff]  ;;  %v186_v4 = vld [vmem:[#allocation3 + $0x18] sm:$0xff] }
   0x7   :  { %v185_v5 = vld [vmem:[#allocation3 + $0x10] sm:$0xff]  ;;  %v184_v6 = vld [vmem:[#allocation3 + $0x8] sm:$0xff]  ;;  %v183_v7 = vld [vmem:[#allocation3] sm:$0xff] }
   0x8   :  { %v182_v8 = vld [vmem:[%s259_s0] sm:$0xff] }
   0x9   :  { %v194_v9 = vld [vmem:[%s261_s2] ss:$0 sm:$0xff] }
   0xa   :  { %111 = vmatpush.bf16.msra.mxu0 %v189_v1 }
   0xe   :  { %112 = vmatpush.bf16.msra.mxu0 %v188_v2 }
  0x12   :  { %113 = vmatpush.bf16.msra.mxu0 %v187_v3 }
  0x16   :  { %114 = vmatpush.bf16.msra.mxu0 %v186_v4 }
  0x1a   :  { %115 = vmatpush.bf16.msra.mxu0 %v185_v5 }
  0x1e   :  { %116 = vmatpush.bf16.msra.mxu0 %v184_v6 }
  0x22   :  { %117 = vmatpush.bf16.msra.mxu0 %v183_v7 }
  0x25   :  { %118 = vmatmul.bf16.vlgmr.msra.gmra.mxu0 %v182_v8 }
  0xa2   :  { %v119_v10 = vpop.f32.mrf.mxu0 }
  0xa3   :  { %v137_v11 = vadd.f32 %v194_v9, %v119_v10 }
  0xa5   :  { %139 = vst [vmem:[%s262_s3] sm:$0xff] %v137_v11 }
  0xaa   :  { %v121_v12 = vpop.f32.mrf.mxu0 }
  0xab   :  { %v138_v13 = vadd.f32 %v194_v9, %v121_v12 }
  0xad   :  { %140 = vst [vmem:[%s262_s3 + $0x8] sm:$0xff] %v138_v13 }
  0xae   :  { %145 = vsyncpa [#allocation4], 1 }

// kernel: swipe_decoder_forward.4
= control target key start
LH: loop header
LB: loop body
LE: loop exit
PB: predicated region body
PF: predicated region fallthrough
CT: control target
= control target key end

     0   :  { %s4053_s0 = inlined_call_operand.vmem [shape: f32[2,8,128], index: 0, kind: input, shape index: {}]   ;;  %s4054_s1 = inlined_call_operand.vmem [shape: bf16[2,16,128], index: 1, kind: input, shape index: {}]   ;;  %s4055_s2 = inlined_call_operand.vmem [shape: f32[2,8,8], index: 2, kind: input, shape index: {}]   ;;  %s4056_s3 = inlined_call_operand.vmem [shape: f32[2,1,16], index: 3, kind: input, shape index: {}]   ;;  %s4057_s4 = inlined_call_operand.hbm [shape: bf16[128,384], index: 4, kind: input, shape index: {}]   ;;  %s4058_s5 = inlined_call_operand.vmem [shape: f32[1,384], index: 5, kind: input, shape index: {}]   ;;  %s4059_s6 = inlined_call_operand.hbm [shape: bf16[4,32,128], index: 6, kind: input, shape index: {}]   ;;  %s4060_s7 = inlined_call_operand.vmem [shape: f32[1,128], index: 7, kind: input, shape index: {}]   ;;  %s4061_s8 = inlined_call_operand.hbm [shape: bf16[128,128], index: 8, kind: input, shape index: {}]   ;;  %s4062_s9 = inlined_call_operand.vmem [shape: f32[1,128], index: 9, kind: input, shape index: {}]   ;;  %s4063_s10 = inlined_call_operand.hbm [shape: bf16[128,256], index: 10, kind: input, shape index: {}]   ;;  %s4064_s11 = inlined_call_operand.vmem [shape: f32[1,256], index: 11, kind: input, shape index: {}]   ;;  %s4065_s12 = inlined_call_operand.hbm [shape: bf16[4,32,128], index: 12, kind: input, shape index: {}]   ;;  %s4066_s13 = inlined_call_operand.vmem [shape: f32[1,128], index: 13, kind: input, shape index: {}]   ;;  %s4067_s14 = inlined_call_operand.hbm [shape: bf16[128,256], index: 14, kind: input, shape index: {}]   ;;  %s4068_s15 = inlined_call_operand.vmem [shape: f32[1,256], index: 15, kind: input, shape index: {}]   ;;  %s4069_s16 = inlined_call_operand.hbm [shape: bf16[256,128], index: 16, kind: input, shape index: {}]   ;;  %s4070_s17 = inlined_call_operand.hbm [shape: f32[1,128], index: 17, kind: input, shape index: {}]   ;;  %s4071_s18 = inlined_call_operand.vmem [shape: f32[1,128], index: 18, kind: input, shape index: {}]   ;;  %s4072_s19 = inlined_call_operand.vmem [shape: f32[1,128], index: 19, kind: input, shape index: {}]   ;;  %s4073_s20 = inlined_call_operand.vmem [shape: f32[1,128], index: 20, kind: input, shape index: {}]   ;;  %s4074_s21 = inlined_call_operand.vmem [shape: f32[1,128], index: 21, kind: input, shape index: {}]   ;;  %s4075_s22 = inlined_call_operand.vmem [shape: f32[1,128], index: 22, kind: input, shape index: {}]   ;;  %s4076_s23 = inlined_call_operand.vmem [shape: f32[1,128], index: 23, kind: input, shape index: {}]   ;;  %s4077_s24 = inlined_call_operand.vmem [shape: f32[2,8,128], index: 24, kind: output, shape index: {}]  }
   0x1   :  { %4083 = sst [smem:[#allocation21_spill]] %s4053_s0 }
   0x2   :  { %4084 = sst [smem:[#allocation22_spill]] %s4054_s1 }
   0x3   :  { %4085 = sst [smem:[#allocation23_spill]] %s4055_s2 }
   0x4   :  { %4086 = sst [smem:[#allocation24_spill]] %s4056_s3 }
   0x5   :  { %4087 = sst [smem:[#allocation25_spill]] %s4057_s4 }
   0x6   :  { %4088 = sst [smem:[#allocation26_spill]] %s4058_s5 }
   0x7   :  { %4089 = sst [smem:[#allocation27_spill]] %s4059_s6 }
   0x8   :  { %4090 = sst [smem:[#allocation28_spill]] %s4060_s7 }
   0x9   :  { %4091 = sst [smem:[#allocation29_spill]] %s4061_s8 }
   0xa   :  { %4092 = sst [smem:[#allocation30_spill]] %s4063_s10 }
   0xb   :  { %4093 = sst [smem:[#allocation31_spill]] %s4068_s15 }
   0xc   :  { %4094 = sst [smem:[#allocation32_spill]] %s4075_s22 }
   0xd   :  { %4095 = sst [smem:[#allocation33_spill]] %s4076_s23 }
   0xe   :  { %4096 = sst [smem:[#allocation34_spill]] %s4077_s24 }
   0xf   :  { %29 = vsyncpa [#allocation3], 0 }
  0x10   :  { %30 = vsyncpa [#allocation5], 0 }
  0x11   :  { %31 = vsyncpa [#allocation8], 0 }
  0x12   :  { %32 = vsyncpa [#allocation11], 0 }
  0x13   :  { %33 = vsyncpa [#allocation14], 0  ;;  %s3753_s5 = smov 0  }
  0x14 LB: > { %4097 = sst [smem:[#allocation20_spill]] %s3608_s5  ;;  %s3762_s2 = sadd.s32 4294967295, %s3608_s5   ;;  %s3608_s5 = sphi %s3753_s5, %s39_s5  }
  0x15   : > { %s4098_s28 = sld [smem:[#allocation27_spill]]  ;;  %p2656_p0 = scmp.ge.s32.totalorder %s3608_s5, 1 }
  0x16   : > { %p594_p1 = scmp.lt.s32.totalorder %s3608_s5, 3  ;;  %p3249_p2 = scmp.eq.s32.totalorder %s3762_s2, 0 }
  0x17   : > { %s3610_s0 = smov [#allocation4]   ;;  %s4100_s10 = sld [smem:[#allocation30_spill]] }
  0x18   : > { %p3767_p3 = pnand %p2656_p0, %p594_p1  ;;  %s624_s7 = sshll.u32 %s3610_s0, 4  ;;  %s625_s7 = int_to_ptr.vmem [resolvable:$true] %s624_s7 }
  0x19   : > { %s3611_s4 = smov [#allocation7]   ;;  %s4079_s26 = smov 64  }
  0x1a   : > { %p3224_p4 = pneg %p3767_p3  ;;  %s658_s1 = sshll.u32 %s3611_s4, 4  ;;  %s659_s1 = int_to_ptr.vmem [resolvable:$true] %s658_s1 }
  0x1b   : > { %s622_s6 = sshll.u32 %s4098_s28, 4  ;;  %s4081_s27 = smov 4   ;;  %s623_s6 = int_to_ptr.hbm [resolvable:$true] %s622_s6 }
  0x1c   : > { %p3778_p5 = pnand %p3249_p2, %p3224_p4  ;;  %s690_s30 = sshll.u32 %s4067_s14, 4  ;;  %s691_s30 = int_to_ptr.hbm [resolvable:$true] %s690_s30 }
  0x1d   : > { %s656_s25 = sshll.u32 %s4100_s10, 4  ;;  %s3614_s3 = smov 128   ;;  %s657_s25 = int_to_ptr.hbm [resolvable:$true] %s656_s25 }
  0x1e   : > { %3230 = dma.hbm_to_vmem [thread:$0]  (!%p3778_p5), %s623_s6, 1024, %s625_s7, [#allocation5], %s4079_s26, %s4079_s26, %s4081_s27  }
  0x1f   : > { %s3615_s10 = smov 8   ;;  %s3616_s5 = smov [#allocation10]  }
  0x20   : > { %3236 = dma.hbm_to_vmem [thread:$0]  (!%p3778_p5), %s657_s25, 2048, %s659_s1, [#allocation8], %s3614_s3, %s3614_s3, %s3615_s10  }
  0x21   : > { %s692_s4 = sshll.u32 %s3616_s5, 4  ;;  %s4102_s22 = sld [smem:[#allocation25_spill]]  ;;  %s693_s4 = int_to_ptr.vmem [resolvable:$true] %s692_s4 }
  0x22   : > { %3242 = dma.hbm_to_vmem [thread:$0]  (!%p3778_p5), %s691_s30, 2048, %s693_s4, [#allocation11], %s3614_s3, %s3614_s3, %s3615_s10  }
  0x23   : > { %s3617_s6 = smov [#allocation2]   ;;  %s4103_s26 = sld [smem:[#allocation29_spill]] }
  0x24   : > { %s607_s7 = sshll.u32 %s3617_s6, 4  ;;  %s3618_s25 = smov 192   ;;  %s608_s7 = int_to_ptr.vmem [resolvable:$true] %s607_s7 }
  0x25   : > { %s3619_s1 = smov 12   ;;  %s3620_s23 = smov [#allocation6]  }
  0x26   : > { %s673_s10 = sshll.u32 %s4065_s12, 4  ;;  %s4104_s30 = smov 4   ;;  %s674_s10 = int_to_ptr.hbm [resolvable:$true] %s673_s10 }
  0x27   : > { %s605_s15 = sshll.u32 %s4102_s22, 4  ;;  %s641_s22 = sshll.u32 %s3620_s23, 4  ;;  %s606_s15 = int_to_ptr.hbm [resolvable:$true] %s605_s15  ;;  %s642_s22 = int_to_ptr.vmem [resolvable:$true] %s641_s22 }
  0x28   : > { %3227 = dma.hbm_to_vmem [thread:$0]  (!%p3778_p5), %s606_s15, 3072, %s608_s7, [#allocation3], %s3618_s25, %s3618_s25, %s3619_s1  }
  0x29   : > { %s639_s27 = sshll.u32 %s4103_s26, 4  ;;  %s4105_s3 = smov 64   ;;  %s640_s27 = int_to_ptr.hbm [resolvable:$true] %s639_s27 }
  0x2a   : > { %3233 = dma.hbm_to_vmem [thread:$0]  (!%p3778_p5), %s640_s27, 1024, %s642_s22, [#allocation5], %s4105_s3, %s4105_s3, %s4104_s30  }
  0x2b   : > { %s707_s15 = sshll.u32 %s4069_s16, 4  ;;  %s3621_s6 = smov [#allocation9]   ;;  %s708_s15 = int_to_ptr.hbm [resolvable:$true] %s707_s15 }
  0x2c   : > { %s675_s7 = sshll.u32 %s3621_s6, 4  ;;  %s3622_s28 = smov [#allocation12]   ;;  %s676_s7 = int_to_ptr.vmem [resolvable:$true] %s675_s7 }
  0x2d   : > { %3239 = dma.hbm_to_vmem [thread:$0]  (!%p3778_p5), %s674_s10, 1024, %s676_s7, [#allocation8], %s4105_s3, %s4105_s3, %s4104_s30  }
  0x2e   : > { %s709_s0 = sshll.u32 %s3622_s28, 4  ;;  %s722_s27 = sshll.u32 %s4070_s17, 4  ;;  %s710_s0 = int_to_ptr.vmem [resolvable:$true] %s709_s0  ;;  %s723_s27 = int_to_ptr.hbm [resolvable:$true] %s722_s27 }
  0x2f   : > { %3245 = dma.hbm_to_vmem [thread:$0]  (!%p3778_p5), %s708_s15, 2048, %s710_s0, [#allocation11], %s4105_s3, %s4105_s3, %s4104_s30  }
  0x30   : > { %s3623_s23 = smov [#allocation13]   ;;  %783 = sbr.rel (%p3767_p3) target bundleno = 4051 (0xfd3), region = 116 }
  0x31   : > { %s724_s22 = sshll.u32 %s3623_s23, 4  ;;  %s725_s22 = int_to_ptr.vmem [resolvable:$true] %s724_s22 }
  0x32   : > { %3248 = dma.hbm_to_vmem [thread:$0]  (!%p3778_p5), %s723_s27, 16, %s725_s22, [#allocation14]  }
  0x35   : > { %3587 = dma.done.wait (%p3249_p2), [#allocation3], 3072  }
  0x36   : > { %3589 = vsyncadd (%p3249_p2), [#allocation3], 4294964224 }
  0x37   : > { %3591 = dma.done.wait (%p3249_p2), [#allocation5], 2048  }
  0x38   : > { %3593 = vsyncadd (%p3249_p2), [#allocation5], 4294965248 }
  0x39   : > { %3595 = dma.done.wait (%p3249_p2), [#allocation8], 3072  }
  0x3a   : > { %3597 = vsyncadd (%p3249_p2), [#allocation8], 4294964224 }
  0x3b   : > { %3599 = dma.done.wait (%p3249_p2), [#allocation11], 4096  }
  0x3c   : > { %3601 = vsyncadd (%p3249_p2), [#allocation11], 4294963200 }
  0x3d   : > { %3603 = dma.done.wait (%p3249_p2), [#allocation14], 16  }
  0x3e   : > { %3605 = vsyncadd (%p3249_p2), [#allocation14], 4294967280  ;;  %v2766_v0 = vld [vmem:[#allocation2 + $0xa8] sm:$0xf]  ;;  %v3118_v1 = vld [vmem:[#allocation2 + $0xb0] sm:$0xf0] }
  0x3f   : > { %v3117_v2 = vld [vmem:[#allocation2 + $0xac] sm:$0xf]  ;;  %v2767_v3 = vor.u32 %v3118_v1, %v2766_v0  ;;  %v2768_v4 = vld [vmem:[#allocation2 + $0xb4] sm:$0xf0]  ;;  %v2754_v5 = vld [vmem:[#allocation2 + $0x90] sm:$0xf] }
  0x40   : > { %v3115_v6 = vld [vmem:[#allocation2 + $0x98] sm:$0xf0]  ;;  %v2771_v7 = vor.u32 %v3117_v2, %v2768_v4  ;;  %v3114_v8 = vld [vmem:[#allocation2 + $0x94] sm:$0xf]  ;;  %v2756_v9 = vld [vmem:[#allocation2 + $0x9c] sm:$0xf0] }
  0x41   : > { %1088 = vmatpush.bf16.msra.mxu0 %v2767_v3  ;;  %v2755_v10 = vor.u32 %v3115_v6, %v2754_v5  ;;  %v2742_v11 = vld [vmem:[#allocation2 + $0x78] sm:$0xf]  ;;  %v2759_v12 = vor.u32 %v3114_v8, %v2756_v9  ;;  %v3112_v13 = vld [vmem:[#allocation2 + $0x80] sm:$0xf0]  ;;  %v2774_v14 = vld [vmem:[#allocation2 + $0xb0] sm:$0xf] }
  0x42   : > { %1101 = vmatpush.bf16.msra.mxu1 %v2771_v7  ;;  %v3119_v15 = vld [vmem:[#allocation2 + $0xb8] sm:$0xf0]  ;;  %v2744_v17 = vld [vmem:[#allocation2 + $0x84] sm:$0xf0]  ;;  %v2762_v19 = vld [vmem:[#allocation2 + $0x98] sm:$0xf]  ;;  %v2743_v21 = vor.u32 %v3112_v13, %v2742_v11 }
  0x43   : > { %v3111_v16 = vld [vmem:[#allocation2 + $0x7c] sm:$0xf]  ;;  %v2775_v18 = vor.u32 %v3119_v15, %v2774_v14  ;;  %v3116_v20 = vld [vmem:[#allocation2 + $0xa0] sm:$0xf0]  ;;  %v2730_v22 = vld [vmem:[#allocation2 + $0x60] sm:$0xf] }
  0x44   : > { %v2763_v23 = vor.u32 %v3116_v20, %v2762_v19  ;;  %v2747_v24 = vor.u32 %v3111_v16, %v2744_v17  ;;  %v3109_v25 = vld [vmem:[#allocation2 + $0x68] sm:$0xf0]  ;;  %v2750_v26 = vld [vmem:[#allocation2 + $0x80] sm:$0xf]  ;;  %v3108_v28 = vld [vmem:[#allocation2 + $0x64] sm:$0xf] }
  0x45   : > { %1089 = vmatpush.bf16.msra.mxu0 %v2755_v10  ;;  %1114 = vmatpush.bf16.msra.mxu2 %v2775_v18  ;;  %v3113_v27 = vld [vmem:[#allocation2 + $0x88] sm:$0xf0]  ;;  %v2732_v29 = vld [vmem:[#allocation2 + $0x6c] sm:$0xf0]  ;;  %p895_p6 = scmp.lt.s32.totalorder %s3762_s2, 1  ;;  %v2731_v30 = vor.u32 %v3109_v25, %v2730_v22  ;;  %s4106_s5 = sld [smem:[#allocation21_spill]] }
  0x46   : > { %1102 = vmatpush.bf16.msra.mxu1 %v2759_v12  ;;  %v2718_v31 = vld [vmem:[#allocation2 + $0x48] sm:$0xf]  ;;  %v2751_v32 = vor.u32 %v3113_v27, %v2750_v26  ;;  %v2735_v33 = vor.u32 %v3108_v28, %v2732_v29  ;;  %v3106_v34 = vld [vmem:[#allocation2 + $0x50] sm:$0xf0]  ;;  %v3105_v37 = vld [vmem:[#allocation2 + $0x4c] sm:$0xf] }
  0x47   : > { %v2738_v35 = vld [vmem:[#allocation2 + $0x68] sm:$0xf]  ;;  %v3110_v36 = vld [vmem:[#allocation2 + $0x70] sm:$0xf0]  ;;  %v2720_v38 = vld [vmem:[#allocation2 + $0x54] sm:$0xf0]  ;;  %v2719_v39 = vor.u32 %v3106_v34, %v2718_v31 }
  0x48   : > { %s4118_s2 = smov (!%p895_p6, %s3762_s2), 1  ;;  %v2706_v40 = vld [vmem:[#allocation2 + $0x30] sm:$0xf]  ;;  %v3103_v41 = vld [vmem:[#allocation2 + $0x38] sm:$0xf0]  ;;  %v2739_v43 = vor.u32 %v3110_v36, %v2738_v35  ;;  %v2723_v44 = vor.u32 %v3105_v37, %v2720_v38  ;;  %s4107_s26 = sld [smem:[#allocation26_spill]] }
  0x49   : > { %1090 = vmatpush.bf16.msra.mxu0 %v2743_v21  ;;  %1115 = vmatpush.bf16.msra.mxu2 %v2763_v23  ;;  %v3102_v42 = vld [vmem:[#allocation2 + $0x34] sm:$0xf]  ;;  %v2726_v45 = vld [vmem:[#allocation2 + $0x50] sm:$0xf]  ;;  %v3107_v46 = vld [vmem:[#allocation2 + $0x58] sm:$0xf0]  ;;  %v2707_v50 = vor.u32 %v3103_v41, %v2706_v40 }
  0x4a   : > { %1103 = vmatpush.bf16.msra.mxu1 %v2747_v24  ;;  %v2708_v47 = vld [vmem:[#allocation2 + $0x3c] sm:$0xf0]  ;;  %v2694_v48 = vld [vmem:[#allocation2 + $0x18] sm:$0xf]  ;;  %v3100_v49 = vld [vmem:[#allocation2 + $0x20] sm:$0xf0]  ;;  %v2727_v51 = vor.u32 %v3107_v46, %v2726_v45 }
  0x4b   : > { %v2711_v52 = vor.u32 %v3102_v42, %v2708_v47  ;;  %v2714_v53 = vld [vmem:[#allocation2 + $0x38] sm:$0xf]  ;;  %v3104_v54 = vld [vmem:[#allocation2 + $0x40] sm:$0xf0]  ;;  %v3099_v55 = vld [vmem:[#allocation2 + $0x1c] sm:$0xf]  ;;  %v2695_v57 = vor.u32 %v3100_v49, %v2694_v48 }
  0x4c   : > { %v2696_v56 = vld [vmem:[#allocation2 + $0x24] sm:$0xf0]  ;;  %s3855_s29 = sshll.u32 %s4118_s2, 3  ;;  %v2682_v58 = vld [vmem:[#allocation2] sm:$0xf]  ;;  %v2715_v59 = vor.u32 %v3104_v54, %v2714_v53  ;;  %vm1136_vm0 = vcmask 261120  }
  0x4d   : > { %1091 = vmatpush.bf16.msra.mxu0 %v2731_v30  ;;  %1116 = vmatpush.bf16.msra.mxu2 %v2751_v32  ;;  %v2699_v60 = vor.u32 %v3099_v55, %v2696_v56  ;;  %v3097_v61 = vld [vmem:[#allocation2 + $0x8] sm:$0xf0]  ;;  %s898_s10 = scalar_lea.vmem %s4106_s5, %s3855_s29  ;;  %v2702_v62 = vld [vmem:[#allocation2 + $0x20] sm:$0xf]  ;;  %v3096_v0 = vld [vmem:[#allocation2 + $0x4] sm:$0xf] }
  0x4e   : > { %1104 = vmatpush.bf16.msra.mxu1 %v2735_v33  ;;  %v3101_v63 = vld [vmem:[#allocation2 + $0x28] sm:$0xf0]  ;;  %v2684_v1 = vld [vmem:[#allocation2 + $0xc] sm:$0xf0]  ;;  %v2683_v2 = vor.u32 %v3097_v61, %v2682_v58  ;;  %v3861_v3 = vld [vmem:[%s898_s10] sm:$0xff]  ;;  %s3624_s4 = smov 96  }
  0x4f   : > { %v2703_v4 = vor.u32 %v3101_v63, %v2702_v62  ;;  %v2687_v5 = vor.u32 %v3096_v0, %v2684_v1  ;;  %v2690_v6 = vld [vmem:[#allocation2 + $0x8] sm:$0xf]  ;;  %v3098_v7 = vld [vmem:[#allocation2 + $0x10] sm:$0xf0]  ;;  %v919_v8 = vpack.c.bf16 %v3861_v3, %v3861_v3  ;;  %v952_v10 = vld [vmem:[%s4107_s26] sm:$0x7] }
  0x50   : > { %v2691_v9 = vor.u32 %v3098_v7, %v2690_v6  ;;  %v955_v11 = vperm.slane %v952_v10, 1  ;;  %v954_v14 = vperm.slane %v952_v10, 0  ;;  %v956_v22 = vperm.slane %v952_v10, 2  ;;  %s3625_s15 = smov 32   ;;  %s3626_s6 = smov 64   ;;  %v3123_v46 = vld [vmem:[#allocation4 + $0x18] sm:$0xff] }
  0x51   : > { %1092 = vmatpush.bf16.msra.mxu0 %v2719_v39  ;;  %1117 = vmatpush.bf16.msra.mxu2 %v2739_v43  ;;  %s4108_s0 = sld [smem:[#allocation23_spill]]  ;;  %vm1158_vm1 = vcmask 64512   ;;  %vm1174_vm2 = vcmask 1043456   ;;  %v3122_v48 = vld [vmem:[#allocation4 + $0x10] sm:$0xff]  ;;  %v3120_v62 = vld [vmem:[#allocation4] sm:$0xff]  ;;  %vm1796_vm7 = vcmask 130048  }
  0x52   : > { %1105 = vmatpush.bf16.msra.mxu1 %v2723_v44  ;;  %s4109_s23 = sld [smem:[#allocation28_spill]] }
  0x53   : > { %s4110_s24 = sld [smem:[#allocation22_spill]] }
  0x54   : > { %s4112_s30 = sld [smem:[#allocation31_spill]] }
  0x55   : > { %1093 = vmatpush.bf16.msra.mxu0 %v2707_v50  ;;  %1118 = vmatpush.bf16.msra.mxu2 %v2727_v51  ;;  %s4113_s7 = sld [smem:[#allocation32_spill]] }
  0x56   : > { %1106 = vmatpush.bf16.msra.mxu1 %v2711_v52 }
  0x57   : > { %s907_s25 = scalar_lea.vmem %s4108_s0, %s3855_s29 }
  0x58   : > { %v3888_v31 = vld [vmem:[%s907_s25] sm:$0xff]  ;;  %s4114_s25 = sld [smem:[#allocation33_spill]] }
  0x59   : > { %1094 = vmatpush.bf16.msra.mxu0 %v2695_v57  ;;  %1119 = vmatpush.bf16.msra.mxu2 %v2715_v59  ;;  %s903_s5 = scalar_lea.vmem %s4110_s24, %s3855_s29 }
  0x5a   : > { %1107 = vmatpush.bf16.msra.mxu1 %v2699_v60  ;;  %v3121_v60 = vld [vmem:[#allocation4 + $0x8] sm:$0xff] }
  0x5d   : > { %1095 = vmatpush.bf16.msra.mxu0 %v2683_v2  ;;  %1120 = vmatpush.bf16.msra.mxu2 %v2703_v4 }
  0x5e   : > { %1108 = vmatpush.bf16.msra.mxu1 %v2687_v5 }
  0x60   : > { %1096 = vmatmul.bf16.vlgmr.msra.gmra.mxu0 %v919_v8 }
  0x61   : > { %1109 = vmatmul.bf16.vlgmr.msra.gmra.mxu1 %v919_v8  ;;  %1121 = vmatpush.bf16.msra.mxu2 %v2691_v9 }
  0x64   : > { %1122 = vmatmul.bf16.vlgmr.msra.gmra.mxu2 %v919_v8 }
  0x65   : > { %1313 = vmatpush.bf16.msrb.mxu2 %v3123_v46 }
  0x69   : > { %1314 = vmatpush.bf16.msrb.mxu2 %v3122_v48 }
  0xdd   : > { %v1097_v12 = vpop.f32.mrf.mxu0 }
  0xde   : > { %v1110_v13 = vpop.f32.mrf.mxu1  ;;  %v1098_v17 = vadd.f32 %v1097_v12, %v954_v14 }
  0xdf   : > { %v1111_v15 = vadd.f32 %v1110_v13, %v955_v11 }
  0xe0   : > { %v1133_v21 = vpack.c.bf16 %v1098_v17, %v1098_v17 }
  0xe1   : > { %v3868_v16 = vpack.c.bf16 %v1111_v15, %v1111_v15 }
  0xe3   : > { %1229 = vrot.lane.b32.xlu0 %v3868_v16, %s3624_s4  ;;  %v1141_v18 = vsel %vm1136_vm0, %v3868_v16, 0 }
  0xe4   : > { %1150 = vmatpush.bf16.xpose.msra.mxu3 %v1141_v18 }
  0xe5   : > { %v1099_v19 = vpop.f32.mrf.mxu0 }
  0xe6   : > { %v1112_v20 = vpop.f32.mrf.mxu1 }
  0xe7   : > { %v1123_v23 = vpop.f32.mrf.mxu2 }
  0xe8   : > { %v1124_v24 = vadd.f32 %v1123_v23, %v956_v22  ;;  %v3291_v22 = vld [vmem:[%s4109_s23] ss:$0 sm:$0xff]  ;;  %s4111_s23 = sld [smem:[#allocation24_spill]] }
  0xea   : > { %v3876_v25 = vpack.c.bf16 %v1124_v24, %v1124_v24 }
  0xeb   : > { %1226 = vrot.lane.b32.xlu0 %v1133_v21, %s3624_s4  ;;  %2776 = vmatmul.msk.bf16.vlgmr.msra.gmra.mxu3 %vm1136_vm0, %v1133_v21 }
  0xec   : > { %v1176_v47 = vsel %vm1174_vm2, %v3876_v25, 0 }
  0xed   : > { %1185 = vmatpush.bf16.msrb.mxu3 %v1176_v47 }
  0xee   : > { %s910_s22 = scalar_lea.vmem %s4111_s23, %s4118_s2  ;;  %s4115_s23 = sld [smem:[#allocation34_spill]] }
  0xef   : > { %v1125_v26 = vpop.f32.mrf.mxu2 }
  0xf1   : > { %1217 = vmatpush.bf16.msra.mxu3 %v3121_v60 }
  0xf3   : > { %1265 = vrot.lane.b32.xlu0 %v3876_v25, %s3624_s4 }
  0xf5   : > { %1218 = vmatpush.bf16.msra.mxu3 %v3120_v62 }
  0xfb   : > { %1414 = vrot.lane.b32.xlu0 %v1133_v21, %s3625_s15 }
 0x103   : > { %1321 = vrot.lane.b32.xlu0 %v1133_v21, %s3626_s6 }
 0x155   : > { %v1230_v27 = vpop.permute.xlu0 %1229 }
 0x156   : > { %v1235_v28 = vsel %vm1136_vm0, %v1230_v27, 0 }
 0x157   : > { %1244 = vmatpush.bf16.xpose.msrb.mxu0 %v1235_v28 }
 0x15d   : > { %v1227_v29 = vpop.permute.xlu0 %1226 }
 0x15e   : > { %2787 = vmatmul.msk.bf16.vlgmr.msrb.gmra.mxu0 %vm1136_vm0, %v1227_v29 }
 0x165   : > { %v1266_v61 = vpop.permute.xlu0 %1265 }
 0x166   : > { %v1271_v63 = vsel %vm1174_vm2, %v1266_v61, 0 }
 0x167   : > { %1280 = vmatpush.bf16.msrb.mxu1 %v1271_v63 }
 0x16d   : > { %v1415_v9 = vpop.permute.xlu0 %1414 }
 0x16e   : > { %v1152_v30 = vpop.f32.mrf.mxu3 }
 0x16f   : > { %v1156_v32 = vmul.f32 0.17677669, %v1152_v30 }
 0x171   : > { %v1157_v33 = vadd.f32 %v1156_v32, %v3888_v31 }
 0x173   : > { %v1159_v34 = vsel %vm1158_vm1, %v1157_v33, -inf }
 0x174   : > { %1160 = vmax.xlane.f32.xlu1 %v1159_v34 }
 0x175   : > { %v1322_v11 = vpop.permute.xlu0 %1321 }
 0x176   : > { %v1154_v35 = vpop.f32.mrf.mxu3 }
 0x1db   : > { %v1246_v36 = vpop.f32.mrf.mxu0 }
 0x1dc   : > { %v1250_v37 = vmul.f32 0.17677669, %v1246_v36 }
 0x1de   : > { %v1251_v38 = vadd.f32 %v1250_v37, %v3888_v31 }
 0x1e0   : > { %v1252_v39 = vsel %vm1158_vm1, %v1251_v38, -inf }
 0x1e1   : > { %1253 = vmax.xlane.f32.xlu1 %v1252_v39 }
 0x1e3   : > { %v1248_v40 = vpop.f32.mrf.mxu0 }
 0x1e7   : > { %v1161_v41 = vpop.xlane.xlu1 %1160 }
 0x1e8   : > { %v1162_v42 = vsub.f32 %v1157_v33, %v1161_v41 }
 0x1ea   : > { %v1163_v43 = vmul.f32 1.442695, %v1162_v42 }
 0x1ec   : > { %3302 = vpow2.f32 %v1163_v43 }
 0x1f2   : > { %v3303_v44 = vpop.eup %3302 }
 0x1f3   : > { %v1165_v45 = vsel %vm1158_vm1, %v3303_v44, 0.0 }
 0x1f4   : > { %1166 = vadd.xlane.f32.xlu2 %v1165_v45 }
 0x1fa   : > { %1416 = vrot.lane.b32.xlu1 %v3868_v16, %s3625_s15 }
 0x254   : > { %v1254_v49 = vpop.xlane.xlu1 %1253 }
 0x255   : > { %v1255_v50 = vsub.f32 %v1251_v38, %v1254_v49 }
 0x257   : > { %v1256_v51 = vmul.f32 1.442695, %v1255_v50 }
 0x259   : > { %3304 = vpow2.f32 %v1256_v51 }
 0x25f   : > { %v3305_v52 = vpop.eup %3304 }
 0x260   : > { %v1258_v53 = vsel %vm1158_vm1, %v3305_v52, 0.0 }
 0x261   : > { %1259 = vadd.xlane.f32.xlu2 %v1258_v53 }
 0x267   : > { %v1167_v54 = vpop.xlane.xlu2 %1166 }
 0x268   : > { %3306 = vrcp.f32 %v1167_v54 }
 0x26c   : > { %v1417_v55 = vpop.permute.xlu1 %1416 }
 0x26d   : > { %v1422_v56 = vsel %vm1136_vm0, %v1417_v55, 0 }
 0x26e   : > { %v3307_v57 = vpop.eup %3306  ;;  %1431 = vmatpush.bf16.xpose.msra.mxu2 %v1422_v56  ;;  %v3125_v56 = vld [vmem:[#allocation4 + $0x28] sm:$0xff] }
 0x26f   : > { %v1169_v58 = vmul.f32 %v3307_v57, %v3303_v44  ;;  %1406 = vmatpush.bf16.msra.mxu1 %v3125_v56  ;;  %v3124_v57 = vld [vmem:[#allocation4 + $0x20] sm:$0xff] }
 0x271   : > { %v1170_v59 = vpack.c.bf16 %v1169_v58, %v1169_v58 }
 0x273   : > { %2777 = vmatmul.msk.bf16.vlgmr.msrb.gmra.mxu3 %vm1158_vm1, %v1170_v59  ;;  %1407 = vmatpush.bf16.msra.mxu1 %v3124_v57 }
 0x279   : > { %1323 = vrot.lane.b32.xlu2 %v3868_v16, %s3626_s6 }
 0x2d4   : > { %v1260_v0 = vpop.xlane.xlu2 %1259 }
 0x2d5   : > { %3308 = vrcp.f32 %v1260_v0 }
 0x2db   : > { %v3309_v1 = vpop.eup %3308 }
 0x2dc   : > { %v1262_v2 = vmul.f32 %v3309_v1, %v3305_v52  ;;  %v1324_v4 = vpop.permute.xlu2 %1323  ;;  %v3127_v52 = vld [vmem:[#allocation4 + $0x38] sm:$0xff] }
 0x2dd   : > { %v1329_v5 = vsel %vm1136_vm0, %v1324_v4, 0 }
 0x2de   : > { %1338 = vmatpush.bf16.xpose.msrb.mxu3 %v1329_v5  ;;  %v1263_v6 = vpack.c.bf16 %v1262_v2, %v1262_v2 }
 0x2e0   : > { %2788 = vmatmul.msk.bf16.vlgmr.msrb.gmra.mxu1 %vm1158_vm1, %v1263_v6 }
 0x2f6   : > { %v1187_v7 = vpop.f32.mrf.mxu3 }
 0x2f7   : > { %v1191_v8 = vpack.c.bf16 %v1187_v7, %v1187_v7 }
 0x2f9   : > { %2786 = vmatmul.msk.bf16.vlgmr.msra.gmra.mxu3 %vm1136_vm0, %v1191_v8  ;;  %v3627_v8 = vmov 128.0  }
 0x2fe   : > { %v1189_v10 = vpop.f32.mrf.mxu3 }
 0x2ff   : > { %v3151_v10 = vld [vmem:[#allocation7 + $0x74] sm:$0xf0] }
 0x309   : > { %2798 = vmatmul.msk.bf16.vlgmr.msrb.gmra.mxu3 %vm1136_vm0, %v1322_v11  ;;  %v2906_v11 = vld [vmem:[#allocation7 + $0x60] sm:$0xf] }
 0x35d   : > { %v1282_v12 = vpop.f32.mrf.mxu1 }
 0x35e   : > { %v1286_v13 = vpack.c.bf16 %v1282_v12, %v1282_v12 }
 0x360   : > { %2797 = vmatmul.msk.bf16.vlgmr.msrb.gmra.mxu2 %vm1136_vm0, %v1286_v13  ;;  %v3149_v13 = vld [vmem:[#allocation7 + $0x64] sm:$0xf0] }
 0x365   : > { %v1284_v14 = vpop.f32.mrf.mxu1 }
 0x366   : > { %v2907_v14 = vor.u32 %v3149_v13, %v2906_v11  ;;  %v2916_v13 = vld [vmem:[#allocation7 + $0x78] sm:$0xf0] }
 0x370   : > { %2809 = vmatmul.msk.bf16.vlgmr.msra.gmra.mxu2 %vm1136_vm0, %v1415_v9  ;;  %v2914_v9 = vld [vmem:[#allocation7 + $0x70] sm:$0xf] }
 0x371   : > { %v2915_v12 = vor.u32 %v3151_v10, %v2914_v9 }
 0x373   : > { %1735 = vmatpush.bf16.msrb.mxu2 %v2915_v12  ;;  %v3150_v12 = vld [vmem:[#allocation7 + $0x74] sm:$0xf] }
 0x377   : > { %1736 = vmatpush.bf16.msrb.mxu2 %v2907_v14  ;;  %v3148_v14 = vld [vmem:[#allocation7 + $0x64] sm:$0xf] }
 0x37c   : > { %v1220_v15 = vpop.f32.mrf.mxu3 }
 0x37d   : > { %v1224_v23 = vadd.f32 %v3291_v22, %v1220_v15 }
 0x384   : > { %v1222_v16 = vpop.f32.mrf.mxu3 }
 0x385   : > { %v2898_v16 = vld [vmem:[#allocation7 + $0x50] sm:$0xf] }
 0x38c   : > { %v1340_v17 = vpop.f32.mrf.mxu3 }
 0x38d   : > { %v1344_v18 = vmul.f32 0.17677669, %v1340_v17  ;;  %v3147_v17 = vld [vmem:[#allocation7 + $0x54] sm:$0xf0] }
 0x38f   : > { %v1345_v19 = vadd.f32 %v1344_v18, %v3888_v31  ;;  %v3135_v18 = vld [vmem:[#allocation6 + $0x38] sm:$0xff] }
 0x390   : > { %1614 = vmatpush.bf16.msrb.mxu1 %v3135_v18  ;;  %v3146_v18 = vld [vmem:[#allocation7 + $0x54] sm:$0xf] }
 0x391   : > { %v1346_v20 = vsel %vm1158_vm1, %v1345_v19, -inf }
 0x392   : > { %1347 = vmax.xlane.f32.xlu2 %v1346_v20  ;;  %v2899_v20 = vor.u32 %v3147_v17, %v2898_v16  ;;  %v2908_v16 = vld [vmem:[#allocation7 + $0x68] sm:$0xf0] }
 0x393   : > { %v2911_v17 = vor.u32 %v3148_v14, %v2908_v16 }
 0x394   : > { %v1342_v21 = vpop.f32.mrf.mxu3  ;;  %1737 = vmatpush.bf16.msrb.mxu2 %v2899_v20 }
 0x395   : > { %v3145_v21 = vld [vmem:[#allocation7 + $0x44] sm:$0xf0] }
 0x3e3   : > { %v1316_v24 = vpop.f32.mrf.mxu2 }
 0x3e4   : > { %v1320_v26 = vadd.f32 %v1316_v24, %v1224_v23  ;;  %v2882_v24 = vld [vmem:[#allocation7 + $0x30] sm:$0xf] }
 0x3eb   : > { %v1318_v27 = vpop.f32.mrf.mxu2 }
 0x3f3   : > { %v1433_v28 = vpop.f32.mrf.mxu2 }
 0x3f4   : > { %v1437_v29 = vmul.f32 0.17677669, %v1433_v28 }
 0x3f6   : > { %v1438_v30 = vadd.f32 %v1437_v29, %v3888_v31  ;;  %v2874_v29 = vld [vmem:[#allocation7 + $0x20] sm:$0xf] }
 0x3f8   : > { %v1439_v32 = vsel %vm1158_vm1, %v1438_v30, -inf }
 0x3f9   : > { %1440 = vmax.xlane.f32.xlu0 %v1439_v32 }
 0x3fb   : > { %v1435_v33 = vpop.f32.mrf.mxu2 }
 0x405   : > { %v1348_v34 = vpop.xlane.xlu2 %1347 }
 0x406   : > { %v1349_v35 = vsub.f32 %v1345_v19, %v1348_v34  ;;  %v2866_v34 = vld [vmem:[#allocation7 + $0x10] sm:$0xf] }
 0x408   : > { %v1350_v36 = vmul.f32 1.442695, %v1349_v35  ;;  %v3139_v35 = vld [vmem:[#allocation7 + $0x14] sm:$0xf0] }
 0x40a   : > { %3310 = vpow2.f32 %v1350_v36 }
 0x40d   : > { %1451 = vrot.lane.b32.xlu0 %v3876_v25, %s3625_s15 }
 0x410   : > { %v3311_v37 = vpop.eup %3310 }
 0x411   : > { %v1352_v38 = vsel %vm1158_vm1, %v3311_v37, 0.0 }
 0x412   : > { %1353 = vadd.xlane.f32.xlu2 %v1352_v38  ;;  %v2858_v38 = vld [vmem:[#allocation7] sm:$0xf] }
 0x46c   : > { %v1441_v39 = vpop.xlane.xlu0 %1440 }
 0x46d   : > { %v1442_v40 = vsub.f32 %v1438_v30, %v1441_v39  ;;  %v3141_v30 = vld [vmem:[#allocation7 + $0x24] sm:$0xf0] }
 0x46e   : > { %v2875_v33 = vor.u32 %v3141_v30, %v2874_v29  ;;  %v3137_v39 = vld [vmem:[#allocation7 + $0x4] sm:$0xf0]  ;;  %v3294_v29 = vld [vmem:[%s4062_s9] ss:$0 sm:$0xff] }
 0x46f   : > { %v1443_v41 = vmul.f32 1.442695, %v1442_v40 }
 0x471   : > { %3312 = vpow2.f32 %v1443_v41 }
 0x477   : > { %v3313_v31 = vpop.eup %3312 }
 0x478   : > { %v1445_v42 = vsel %vm1158_vm1, %v3313_v31, 0.0 }
 0x479   : > { %1446 = vadd.xlane.f32.xlu1 %v1445_v42 }
 0x47f   : > { %v1452_v43 = vpop.permute.xlu0 %1451 }
 0x480   : > { %v1457_v44 = vsel %vm1174_vm2, %v1452_v43, 0 }
 0x481   : > { %1466 = vmatpush.bf16.msra.mxu3 %v1457_v44  ;;  %v3938_v44 = vld [vmem:[%s903_s5] sm:$0xff] }
 0x485   : > { %v1354_v49 = vpop.xlane.xlu2 %1353 }
 0x492   : > { %1358 = vrot.lane.b32.xlu1 %v3876_v25, %s3626_s6  ;;  %v3126_v25 = vld [vmem:[#allocation4 + $0x30] sm:$0xff] }
 0x4ec   : > { %v1447_v45 = vpop.xlane.xlu1 %1446 }
 0x4ed   : > { %3314 = vrcp.f32 %v1447_v45  ;;  %v3134_v45 = vld [vmem:[#allocation6 + $0x30] sm:$0xff] }
 0x4ee   : > { %3316 = vrcp.f32 %v1354_v49  ;;  %1615 = vmatpush.bf16.msrb.mxu1 %v3134_v45  ;;  %v3130_v49 = vld [vmem:[#allocation6 + $0x10] sm:$0xff] }
 0x4ef   : > { %3318 = vrcp.f32 %v3627_v8 }
 0x4f3   : > { %v3315_v46 = vpop.eup %3314 }
 0x4f4   : > { %v1449_v47 = vmul.f32 %v3315_v46, %v3313_v31  ;;  %v3317_v50 = vpop.eup %3316  ;;  %v2859_v31 = vor.u32 %v3137_v39, %v2858_v38  ;;  %v3133_v46 = vld [vmem:[#allocation6 + $0x28] sm:$0xff]  ;;  %v3138_v39 = vld [vmem:[#allocation7 + $0x14] sm:$0xf] }
 0x4f5   : > { %v1356_v51 = vmul.f32 %v3317_v50, %v3311_v37  ;;  %v3319_v15 = vpop.eup %3318  ;;  %v2867_v37 = vor.u32 %v3139_v35, %v2866_v34  ;;  %1616 = vmatpush.bf16.msrb.mxu1 %v3133_v46  ;;  %v3129_v50 = vld [vmem:[#allocation6 + $0x8] sm:$0xff]  ;;  %v3140_v35 = vld [vmem:[#allocation7 + $0x24] sm:$0xf]  ;;  %v3976_v46 = vld [vmem:[%s910_s22] ss:$0 sm:$0xff]  ;;  %s914_s22 = scalar_lea.vmem %s4115_s23, %s3855_s29 }
 0x4f6   : > { %v1450_v48 = vpack.c.bf16 %v1449_v47, %v1449_v47  ;;  %v1511_v19 = vmul.f32 128.0, %v3319_v15  ;;  %vm1515_vm3 = vweird.f32 %v3319_v15  ;;  %v3132_v47 = vld [vmem:[#allocation6 + $0x20] sm:$0xff] }
 0x4f7   : > { %v1357_v55 = vpack.c.bf16 %v1356_v51, %v1356_v51  ;;  %v3128_v51 = vld [vmem:[#allocation6] sm:$0xff] }
 0x4f8   : > { %2810 = vmatmul.msk.bf16.vlgmr.msra.gmra.mxu3 %vm1158_vm1, %v1450_v48  ;;  %v1512_v22 = vsub.f32 1.0, %v1511_v19  ;;  %v3131_v48 = vld [vmem:[#allocation6 + $0x18] sm:$0xff] }
 0x4f9   : > { %1617 = vmatpush.bf16.msrb.mxu1 %v3132_v47  ;;  %v2900_v19 = vld [vmem:[#allocation7 + $0x58] sm:$0xf0] }
 0x4fa   : > { %v1513_v27 = vmul.f32 %v3319_v15, %v1512_v22  ;;  %v2903_v20 = vor.u32 %v3146_v18, %v2900_v19  ;;  %v3153_v19 = vld [vmem:[#allocation9 + $0x8] sm:$0xff] }
 0x4fc   : > { %v1514_v32 = vadd.f32 %v3319_v15, %v1513_v27 }
 0x4fd   : > { %1618 = vmatpush.bf16.msrb.mxu1 %v3131_v48 }
 0x4fe   : > { %v3931_v36 = vsel %vm1515_vm3, %v3319_v15, %v1514_v32  ;;  %v2919_v15 = vor.u32 %v3150_v12, %v2916_v13 }
 0x500   : > { %1749 = vmatpush.bf16.msrb.mxu3 %v2919_v15 }
 0x501   : > { %1619 = vmatpush.bf16.msrb.mxu1 %v3130_v49 }
 0x504   : > { %v1359_v53 = vpop.permute.xlu1 %1358  ;;  %1750 = vmatpush.bf16.msrb.mxu3 %v2911_v17 }
 0x505   : > { %v1364_v54 = vsel %vm1174_vm2, %v1359_v53, 0  ;;  %1620 = vmatpush.bf16.msrb.mxu1 %v3129_v50 }
 0x506   : > { %1373 = vmatpush.bf16.msra.mxu0 %v1364_v54 }
 0x508   : > { %1751 = vmatpush.bf16.msrb.mxu3 %v2903_v20  ;;  %v3152_v20 = vld [vmem:[#allocation9] sm:$0xff] }
 0x509   : > { %2799 = vmatmul.msk.bf16.vlgmr.msra.gmra.mxu0 %vm1158_vm1, %v1357_v55  ;;  %1621 = vmatpush.bf16.msrb.mxu1 %v3128_v51 }
 0x50a   : > { %1499 = vmatpush.bf16.msrb.mxu0 %v3127_v52 }
 0x50e   : > { %1500 = vmatpush.bf16.msrb.mxu0 %v3126_v25 }
 0x57b   : > { %v1468_v58 = vpop.f32.mrf.mxu3 }
 0x57c   : > { %v1472_v59 = vpack.c.bf16 %v1468_v58, %v1468_v58 }
 0x57e   : > { %2819 = vmatmul.msk.bf16.vlgmr.msrb.gmra.mxu0 %vm1136_vm0, %v1472_v59  ;;  %v3945_v59 = vld [vmem:[%s4064_s11] sm:$0x3] }
 0x583   : > { %v1470_v60 = vpop.f32.mrf.mxu3 }
 0x586   : > { %v1375_v61 = vpop.f32.mrf.mxu0 }
 0x587   : > { %v1379_v62 = vpack.c.bf16 %v1375_v61, %v1375_v61 }
 0x589   : > { %2808 = vmatmul.msk.bf16.vlgmr.msra.gmra.mxu1 %vm1136_vm0, %v1379_v62  ;;  %v3292_v62 = vld [vmem:[%s4071_s18] ss:$0 sm:$0xff] }
 0x58a   : > { %1851 = vmatpush.bf16.msra.mxu1 %v3153_v19 }
 0x58e   : > { %v1377_v63 = vpop.f32.mrf.mxu0  ;;  %1852 = vmatpush.bf16.msra.mxu1 %v3152_v20 }
 0x58f   : > { %v1645_v63 = vperm.slane %v3945_v59, 0 }
 0x5fb   : > { %v1502_v0 = vpop.f32.mrf.mxu0 }
 0x603   : > { %v1504_v1 = vpop.f32.mrf.mxu0 }
 0x606   : > { %v1409_v2 = vpop.f32.mrf.mxu1 }
 0x607   : > { %v1413_v4 = vadd.f32 %v1409_v2, %v1320_v26  ;;  %v3143_v26 = vld [vmem:[#allocation7 + $0x34] sm:$0xf0]  ;;  %v3293_v2 = vld [vmem:[%s4072_s19] ss:$0 sm:$0xff] }
 0x608   : > { %v2883_v28 = vor.u32 %v3143_v26, %v2882_v24  ;;  %v2884_v24 = vld [vmem:[#allocation7 + $0x38] sm:$0xf0] }
 0x609   : > { %v1506_v5 = vadd.f32 %v1502_v0, %v1413_v4 }
 0x60b   : > { %v1507_v6 = vadd.f32 %v1506_v5, %v3861_v3  ;;  %v2890_v3 = vld [vmem:[#allocation7 + $0x40] sm:$0xf] }
 0x60c   : > { %v2891_v23 = vor.u32 %v3145_v21, %v2890_v3  ;;  %v3144_v3 = vld [vmem:[#allocation7 + $0x44] sm:$0xf]  ;;  %v2892_v21 = vld [vmem:[#allocation7 + $0x48] sm:$0xf0] }
 0x60d   : > { %1508 = vadd.xlane.f32.xlu2 %v1507_v6  ;;  %v2895_v22 = vor.u32 %v3144_v3, %v2892_v21 }
 0x60e   : > { %v1411_v7 = vpop.f32.mrf.mxu1  ;;  %1738 = vmatpush.bf16.msrb.mxu2 %v2891_v23  ;;  %v3142_v23 = vld [vmem:[#allocation7 + $0x34] sm:$0xf] }
 0x60f   : > { %1752 = vmatpush.bf16.msrb.mxu3 %v2895_v22 }
 0x612   : > { %1739 = vmatpush.bf16.msrb.mxu2 %v2883_v28  ;;  %v2887_v28 = vor.u32 %v3142_v23, %v2884_v24 }
 0x614   : > { %1753 = vmatpush.bf16.msrb.mxu3 %v2887_v28 }
 0x616   : > { %1740 = vmatpush.bf16.msrb.mxu2 %v2875_v33 }
 0x61a   : > { %1741 = vmatpush.bf16.msrb.mxu2 %v2867_v37  ;;  %v2876_v37 = vld [vmem:[#allocation7 + $0x28] sm:$0xf0] }
 0x61b   : > { %v2879_v38 = vor.u32 %v3140_v35, %v2876_v37 }
 0x61d   : > { %1754 = vmatpush.bf16.msrb.mxu3 %v2879_v38 }
 0x61e   : > { %1742 = vmatpush.bf16.msrb.mxu2 %v2859_v31  ;;  %v3136_v31 = vld [vmem:[#allocation7 + $0x4] sm:$0xf] }
 0x621   : > { %1743 = vmatmul.bf16.vlgmr.msrb.gmra.mxu2 %v3938_v44 }
 0x680   : > { %v1509_v40 = vpop.xlane.xlu2 %1508 }
 0x681   : > { %v1517_v41 = vmul.f32 %v3931_v36, %v1509_v40  ;;  %v2868_v40 = vld [vmem:[#allocation7 + $0x18] sm:$0xf0] }
 0x683   : > { %v1518_v42 = vsub.f32 %v1507_v6, %v1517_v41  ;;  %v2871_v41 = vor.u32 %v3138_v39, %v2868_v40 }
 0x685   : > { %v1519_v43 = vmul.f32 %v1518_v42, %v1518_v42  ;;  %1755 = vmatpush.bf16.msrb.mxu3 %v2871_v41 }
 0x687   : > { %1520 = vadd.xlane.f32.xlu2 %v1519_v43 }
 0x6a4   : > { %v1744_v60 = vpop.f32.mrf.mxu2 }
 0x6a5   : > { %v1745_v5 = vadd.f32 %v1744_v60, %v1645_v63 }
 0x6ac   : > { %v1746_v6 = vpop.f32.mrf.mxu2 }
 0x6ad   : > { %v1747_v8 = vadd.f32 %v1746_v6, %v1645_v63  ;;  %v3155_v6 = vld [vmem:[#allocation9 + $0x18] sm:$0xff] }
 0x6af   : > { %v3958_v10 = vpack.c.bf16 %v1747_v8, %v1745_v5  ;;  %v3154_v8 = vld [vmem:[#allocation9 + $0x10] sm:$0xff] }
 0x6b1   : > { %1863 = vrot.lane.b32.xlu0 %v3958_v10, %s3624_s4  ;;  %v1776_v11 = vsel %vm1136_vm0, %v3958_v10, 0 }
 0x6b2   : > { %1785 = vmatpush.bf16.xpose.msra.mxu0 %v1776_v11 }
 0x6fa   : > { %v1521_v52 = vpop.xlane.xlu2 %1520 }
 0x6fb   : > { %v1522_v53 = vmul.f32 %v1521_v52, %v3931_v36 }
 0x6fd   : > { %v1523_v54 = vadd.f32 1e-05, %v1522_v53  ;;  %v1646_v53 = vperm.slane %v3945_v59, 1 }
 0x6ff   : > { %3320 = vrsqrt.f32 %v1523_v54  ;;  %vm1530_vm5 = vweird.f32 %v1523_v54 }
 0x705   : > { %v3321_v55 = vpop.eup %3320 }
 0x706   : > { %v1525_v25 = vmul.f32 %v3321_v55, %v1523_v54  ;;  %vm1531_vm4 = vweird.f32 %v3321_v55 }
 0x707   : > { %vm1532_vm6 = vmor %vm1530_vm5, %vm1531_vm4 }
 0x708   : > { %v1526_v56 = vmul.f32 %v3321_v55, %v1525_v25 }
 0x70a   : > { %v1527_v57 = vmul.f32 0.5, %v1526_v56 }
 0x70c   : > { %v1528_v58 = vsub.f32 1.5, %v1527_v57 }
 0x70e   : > { %v1529_v61 = vmul.f32 %v3321_v55, %v1528_v58 }
 0x710   : > { %v1533_v0 = vsel %vm1532_vm6, %v3321_v55, %v1529_v61 }
 0x711   : > { %v1534_v1 = vmul.f32 %v1533_v0, %v1518_v42  ;;  %v2860_v42 = vld [vmem:[#allocation7 + $0x8] sm:$0xf0] }
 0x712   : > { %v2863_v43 = vor.u32 %v3136_v31, %v2860_v42  ;;  %v3296_v42 = vld [vmem:[%s4066_s13] ss:$0 sm:$0xff] }
 0x713   : > { %v1539_v4 = vmul.f32 %v3292_v62, %v1534_v1 }
 0x714   : > { %1756 = vmatpush.bf16.msrb.mxu3 %v2863_v43 }
 0x715   : > { %v3954_v7 = vadd.f32 %v3293_v2, %v1539_v4 }
 0x717   : > { %v1545_v9 = vpack.c.bf16 %v3954_v7, %v3954_v7  ;;  %1757 = vmatmul.bf16.vlgmr.msrb.gmra.mxu3 %v3938_v44 }
 0x719   : > { %1622 = vmatmul.bf16.vlgmr.msrb.gmra.mxu1 %v1545_v9 }
 0x723   : > { %v1864_v26 = vpop.permute.xlu0 %1863 }
 0x724   : > { %v1869_v27 = vsel %vm1136_vm0, %v1864_v26, 0 }
 0x725   : > { %1878 = vmatpush.bf16.xpose.msra.mxu2 %v1869_v27 }
 0x796   : > { %v1623_v30 = vpop.f32.mrf.mxu1 }
 0x797   : > { %v1624_v32 = vadd.f32 %v3294_v29, %v1623_v30 }
 0x799   : > { %v1769_v33 = vpack.c.bf16 %v1624_v32, %v1624_v32 }
 0x79a   : > { %v1758_v52 = vpop.f32.mrf.mxu3 }
 0x79b   : > { %1860 = vrot.lane.b32.xlu2 %v1769_v33, %s3624_s4  ;;  %2920 = vmatmul.msk.bf16.vlgmr.msra.gmra.mxu0 %vm1136_vm0, %v1769_v33  ;;  %v1759_v54 = vadd.f32 %v1758_v52, %v1646_v53 }
 0x79e   : > { %v1625_v34 = vpop.f32.mrf.mxu1 }
 0x7a2   : > { %v1760_v55 = vpop.f32.mrf.mxu3 }
 0x7a3   : > { %v1761_v44 = vadd.f32 %v1760_v55, %v1646_v53 }
 0x7a5   : > { %v3981_v25 = vpack.c.bf16 %v1761_v44, %v1759_v54 }
 0x7a7   : > { %1819 = vmatpush.bf16.msrb.mxu0 %v3981_v25 }
 0x7ab   : > { %1945 = vmatpush.bf16.msra.mxu0 %v3155_v6 }
 0x7af   : > { %1946 = vmatpush.bf16.msra.mxu0 %v3154_v8  ;;  %v3159_v8 = vld [vmem:[#allocation9 + $0x38] sm:$0xff] }
 0x7f5   : > { %v1861_v45 = vpop.permute.xlu2 %1860 }
 0x7f6   : > { %2931 = vmatmul.msk.bf16.vlgmr.msra.gmra.mxu2 %vm1136_vm0, %v1861_v45 }
 0x818   : > { %v1787_v47 = vpop.f32.mrf.mxu0 }
 0x819   : > { %v1791_v48 = vmul.f32 0.17677669, %v1787_v47 }
 0x81b   : > { %v1795_v49 = vadd.f32 %v3976_v46, %v1791_v48 }
 0x81d   : > { %v1797_v50 = vsel %vm1796_vm7, %v1795_v49, -inf }
 0x81e   : > { %1798 = vmax.xlane.f32.xlu1 %v1797_v50 }
 0x820   : > { %v1789_v51 = vpop.f32.mrf.mxu0 }
 0x879   : > { %v1880_v56 = vpop.f32.mrf.mxu2 }
 0x87a   : > { %v1884_v57 = vmul.f32 0.17677669, %v1880_v56 }
 0x87c   : > { %v1885_v58 = vadd.f32 %v3976_v46, %v1884_v57 }
 0x87e   : > { %v1886_v60 = vsel %vm1796_vm7, %v1885_v58, -inf }
 0x87f   : > { %1887 = vmax.xlane.f32.xlu0 %v1886_v60 }
 0x881   : > { %v1882_v61 = vpop.f32.mrf.mxu2 }
 0x891   : > { %v1799_v62 = vpop.xlane.xlu1 %1798 }
 0x892   : > { %v1800_v63 = vsub.f32 %v1795_v49, %v1799_v62 }
 0x893   : > { %1899 = vrot.lane.b32.xlu0 %v3981_v25, %s3624_s4 }
 0x894   : > { %v1801_v59 = vmul.f32 1.442695, %v1800_v63 }
 0x896   : > { %3322 = vpow2.f32 %v1801_v59 }
 0x89b   : > { %2046 = vrot.lane.b32.xlu0 %v3958_v10, %s3625_s15 }
 0x89c   : > { %v3323_v0 = vpop.eup %3322 }
 0x89d   : > { %v1803_v1 = vsel %vm1796_vm7, %v3323_v0, 0.0 }
 0x89e   : > { %1804 = vadd.xlane.f32.xlu2 %v1803_v1 }
 0x8a3   : > { %2044 = vrot.lane.b32.xlu0 %v1769_v33, %s3625_s15 }
 0x8b6   : > { %1953 = vrot.lane.b32.xlu2 %v1769_v33, %s3626_s6 }
 0x8f2   : > { %v1888_v2 = vpop.xlane.xlu0 %1887 }
 0x8f3   : > { %v1889_v4 = vsub.f32 %v1885_v58, %v1888_v2 }
 0x8f5   : > { %v1890_v5 = vmul.f32 1.442695, %v1889_v4  ;;  %v3157_v4 = vld [vmem:[#allocation9 + $0x28] sm:$0xff] }
 0x8f7   : > { %3324 = vpow2.f32 %v1890_v5  ;;  %v3156_v5 = vld [vmem:[#allocation9 + $0x20] sm:$0xff] }
 0x8fd   : > { %v3325_v9 = vpop.eup %3324 }
 0x8fe   : > { %v1892_v11 = vsel %vm1796_vm7, %v3325_v9, 0.0 }
 0x8ff   : > { %1893 = vadd.xlane.f32.xlu1 %v1892_v11 }
 0x905   : > { %v1900_v12 = vpop.permute.xlu0 %1899 }
 0x906   : > { %1912 = vmatpush.bf16.msra.mxu3 %v1900_v12 }
 0x90a   : > { %2036 = vmatpush.bf16.msrb.mxu3 %v3157_v4  ;;  %v3163_v4 = vld [vmem:[#allocation10 + $0x14] sm:$0xf0] }
 0x90d   : > { %v2047_v16 = vpop.permute.xlu0 %2046 }
 0x90e   : > { %v2052_v18 = vsel %vm1136_vm0, %v2047_v16, 0  ;;  %2037 = vmatpush.bf16.msrb.mxu3 %v3156_v5  ;;  %v3158_v16 = vld [vmem:[#allocation9 + $0x30] sm:$0xff] }
 0x90f   : > { %v3162_v5 = vld [vmem:[#allocation10 + $0x14] sm:$0xf] }
 0x911   : > { %v1805_v13 = vpop.xlane.xlu2 %1804 }
 0x912   : > { %3326 = vrcp.f32 %v1805_v13 }
 0x915   : > { %v2045_v34 = vpop.permute.xlu0 %2044 }
 0x918   : > { %v3327_v14 = vpop.eup %3326  ;;  %1955 = vrot.lane.b32.xlu1 %v3958_v10, %s3626_s6 }
 0x919   : > { %v1807_v15 = vmul.f32 %v3327_v14, %v3323_v0  ;;  %v1954_v29 = vpop.permute.xlu2 %1953 }
 0x91b   : > { %v1808_v17 = vpack.c.bf16 %v1807_v15, %v1807_v15 }
 0x91d   : > { %2921 = vmatmul.msk.bf16.vlgmr.msrb.gmra.mxu0 %vm1796_vm7, %v1808_v17 }
 0x91e   : > { %2061 = vmatpush.bf16.xpose.msrb.mxu0 %v2052_v18 }
 0x972   : > { %v1894_v3 = vpop.xlane.xlu1 %1893 }
 0x973   : > { %3328 = vrcp.f32 %v1894_v3 }
 0x979   : > { %v3329_v21 = vpop.eup %3328 }
 0x97a   : > { %v1896_v22 = vmul.f32 %v3329_v21, %v3325_v9 }
 0x97c   : > { %v1897_v23 = vpack.c.bf16 %v1896_v22, %v1896_v22 }
 0x97e   : > { %2932 = vmatmul.msk.bf16.vlgmr.msra.gmra.mxu3 %vm1796_vm7, %v1897_v23 }
 0x98a   : > { %v1956_v10 = vpop.permute.xlu1 %1955 }
 0x98b   : > { %v1961_v24 = vsel %vm1136_vm0, %v1956_v10, 0 }
 0x98c   : > { %1970 = vmatpush.bf16.xpose.msrb.mxu1 %v1961_v24 }
 0x99a   : > { %v1821_v26 = vpop.f32.mrf.mxu0 }
 0x99b   : > { %v1825_v27 = vpack.c.bf16 %v1821_v26, %v1821_v26  ;;  %v3022_v26 = vld [vmem:[#allocation10 + $0x70] sm:$0xf] }
 0x99d   : > { %2930 = vmatmul.msk.bf16.vlgmr.msra.gmra.mxu1 %vm1136_vm0, %v1825_v27  ;;  %v3175_v27 = vld [vmem:[#allocation10 + $0x74] sm:$0xf0] }
 0x9a2   : > { %v1823_v28 = vpop.f32.mrf.mxu0 }
 0x9a3   : > { %v3174_v28 = vld [vmem:[#allocation10 + $0x74] sm:$0xf] }
 0x9ad   : > { %2942 = vmatmul.msk.bf16.vlgmr.msrb.gmra.mxu1 %vm1136_vm0, %v1954_v29  ;;  %v3023_v29 = vor.u32 %v3175_v27, %v3022_v26 }
 0x9af   : > { %2269 = vmatpush.bf16.msra.mxu3 %v3023_v29  ;;  %v3179_v29 = vld [vmem:[#allocation12 + $0x18] sm:$0xff] }
 0xa01   : > { %v1914_v30 = vpop.f32.mrf.mxu3 }
 0xa02   : > { %v1918_v32 = vpack.c.bf16 %v1914_v30, %v1914_v30  ;;  %v3024_v30 = vld [vmem:[#allocation10 + $0x78] sm:$0xf0] }
 0xa04   : > { %2941 = vmatmul.msk.bf16.vlgmr.msra.gmra.mxu0 %vm1136_vm0, %v1918_v32  ;;  %v3027_v32 = vor.u32 %v3174_v28, %v3024_v30  ;;  %v3187_v28 = vld [vmem:[#allocation12 + $0x58] sm:$0xff] }
 0xa06   : > { %2282 = vmatpush.bf16.msra.mxu0 %v3027_v32 }
 0xa09   : > { %v1916_v33 = vpop.f32.mrf.mxu3 }
 0xa14   : > { %2953 = vmatmul.msk.bf16.vlgmr.msrb.gmra.mxu0 %vm1136_vm0, %v2045_v34 }
 0xa1a   : > { %v1854_v35 = vpop.f32.mrf.mxu1 }
 0xa1b   : > { %v1858_v43 = vadd.f32 %v3296_v42, %v1854_v35  ;;  %v3006_v42 = vld [vmem:[#allocation10 + $0x50] sm:$0xf] }
 0xa22   : > { %v1856_v37 = vpop.f32.mrf.mxu1 }
 0xa2a   : > { %v1972_v38 = vpop.f32.mrf.mxu1 }
 0xa2b   : > { %v1976_v39 = vmul.f32 0.17677669, %v1972_v38  ;;  %v3173_v38 = vld [vmem:[#allocation10 + $0x64] sm:$0xf0] }
 0xa2d   : > { %v1977_v40 = vadd.f32 %v3976_v46, %v1976_v39  ;;  %v3172_v39 = vld [vmem:[#allocation10 + $0x64] sm:$0xf] }
 0xa2f   : > { %v1978_v41 = vsel %vm1796_vm7, %v1977_v40, -inf }
 0xa30   : > { %1979 = vmax.xlane.f32.xlu1 %v1978_v41  ;;  %v3016_v41 = vld [vmem:[#allocation10 + $0x68] sm:$0xf0] }
 0xa32   : > { %v1974_v31 = vpop.f32.mrf.mxu1 }
 0xa33   : > { %v3019_v31 = vor.u32 %v3172_v39, %v3016_v41 }
 0xa35   : > { %2283 = vmatpush.bf16.msra.mxu0 %v3019_v31 }
 0xa81   : > { %v1948_v45 = vpop.f32.mrf.mxu0 }
 0xa82   : > { %v1952_v47 = vadd.f32 %v1948_v45, %v1858_v43  ;;  %v3171_v43 = vld [vmem:[#allocation10 + $0x54] sm:$0xf0]  ;;  %v3170_v45 = vld [vmem:[#allocation10 + $0x54] sm:$0xf] }
 0xa89   : > { %v1950_v48 = vpop.f32.mrf.mxu0 }
 0xa8a   : > { %v3008_v48 = vld [vmem:[#allocation10 + $0x58] sm:$0xf0] }
 0xa91   : > { %v2063_v49 = vpop.f32.mrf.mxu0 }
 0xa92   : > { %v2067_v50 = vmul.f32 0.17677669, %v2063_v49  ;;  %v3011_v49 = vor.u32 %v3170_v45, %v3008_v48  ;;  %v3178_v45 = vld [vmem:[#allocation12 + $0x10] sm:$0xff]  ;;  %v3177_v48 = vld [vmem:[#allocation12 + $0x8] sm:$0xff] }
 0xa94   : > { %v2068_v51 = vadd.f32 %v3976_v46, %v2067_v50  ;;  %2284 = vmatpush.bf16.msra.mxu0 %v3011_v49  ;;  %v2998_v50 = vld [vmem:[#allocation10 + $0x40] sm:$0xf] }
 0xa95   : > { %v3176_v49 = vld [vmem:[#allocation12] sm:$0xff] }
 0xa96   : > { %v2069_v52 = vsel %vm1796_vm7, %v2068_v51, -inf }
 0xa97   : > { %2070 = vmax.xlane.f32.xlu0 %v2069_v52  ;;  %v3168_v52 = vld [vmem:[#allocation10 + $0x44] sm:$0xf] }
 0xa99   : > { %v2065_v53 = vpop.f32.mrf.mxu0 }
 0xaa3   : > { %v1980_v54 = vpop.xlane.xlu1 %1979 }
 0xaa4   : > { %v1981_v55 = vsub.f32 %v1977_v40, %v1980_v54  ;;  %v3000_v54 = vld [vmem:[#allocation10 + $0x48] sm:$0xf0] }
 0xaa6   : > { %v1982_v44 = vmul.f32 1.442695, %v1981_v55  ;;  %v3003_v55 = vor.u32 %v3168_v52, %v3000_v54 }
 0xaa8   : > { %3330 = vpow2.f32 %v1982_v44  ;;  %2285 = vmatpush.bf16.msra.mxu0 %v3003_v55  ;;  %v2990_v44 = vld [vmem:[#allocation10 + $0x30] sm:$0xf] }
 0xaab   : > { %1990 = vrot.lane.b32.xlu0 %v3981_v25, %s3626_s6 }
 0xaae   : > { %v3331_v56 = vpop.eup %3330 }
 0xaaf   : > { %v1984_v57 = vsel %vm1796_vm7, %v3331_v56, 0.0 }
 0xab0   : > { %1985 = vadd.xlane.f32.xlu2 %v1984_v57  ;;  %v3166_v57 = vld [vmem:[#allocation10 + $0x34] sm:$0xf] }
 0xb0a   : > { %v2071_v58 = vpop.xlane.xlu0 %2070 }
 0xb0b   : > { %v2072_v60 = vsub.f32 %v2068_v51, %v2071_v58  ;;  %v3169_v51 = vld [vmem:[#allocation10 + $0x44] sm:$0xf0] }
 0xb0c   : > { %v2999_v53 = vor.u32 %v3169_v51, %v2998_v50 }
 0xb0d   : > { %v2073_v61 = vmul.f32 1.442695, %v2072_v60  ;;  %v2992_v60 = vld [vmem:[#allocation10 + $0x38] sm:$0xf0] }
 0xb0f   : > { %3332 = vpow2.f32 %v2073_v61  ;;  %v2995_v61 = vor.u32 %v3166_v57, %v2992_v60 }
 0xb11   : > { %2286 = vmatpush.bf16.msra.mxu0 %v2995_v61 }
 0xb15   : > { %v3333_v46 = vpop.eup %3332 }
 0xb16   : > { %v2075_v62 = vsel %vm1796_vm7, %v3333_v46, 0.0 }
 0xb17   : > { %2076 = vadd.xlane.f32.xlu1 %v2075_v62  ;;  %v3165_v62 = vld [vmem:[#allocation10 + $0x24] sm:$0xf0] }
 0xb1d   : > { %v1991_v63 = vpop.permute.xlu0 %1990 }
 0xb1e   : > { %2003 = vmatpush.bf16.msrb.mxu2 %v1991_v63  ;;  %v3164_v63 = vld [vmem:[#allocation10 + $0x24] sm:$0xf] }
 0xb22   : > { %2127 = vmatpush.bf16.msra.mxu2 %v3159_v8  ;;  %v2976_v8 = vld [vmem:[#allocation10 + $0x18] sm:$0xf0] }
 0xb23   : > { %v1986_v59 = vpop.xlane.xlu2 %1985 }
 0xb24   : > { %3334 = vrcp.f32 %v1986_v59 }
 0xb26   : > { %2128 = vmatpush.bf16.msra.mxu2 %v3158_v16  ;;  %v3191_v16 = vld [vmem:[#allocation12 + $0x78] sm:$0xff] }
 0xb2a   : > { %v3335_v0 = vpop.eup %3334 }
 0xb2b   : > { %v1988_v1 = vmul.f32 %v3335_v0, %v3331_v56  ;;  %v3167_v56 = vld [vmem:[#allocation10 + $0x34] sm:$0xf0]  ;;  %v2984_v0 = vld [vmem:[#allocation10 + $0x28] sm:$0xf0] }
 0xb2c   : > { %v2991_v58 = vor.u32 %v3167_v56, %v2990_v44 }
 0xb2d   : > { %v1989_v2 = vpack.c.bf16 %v1988_v1, %v1988_v1  ;;  %v2987_v1 = vor.u32 %v3164_v63, %v2984_v0 }
 0xb2f   : > { %2943 = vmatmul.msk.bf16.vlgmr.msrb.gmra.mxu2 %vm1796_vm7, %v1989_v2  ;;  %2287 = vmatpush.bf16.msra.mxu0 %v2987_v1  ;;  %v2974_v2 = vld [vmem:[#allocation10 + $0x10] sm:$0xf] }
 0xb30   : > { %2081 = vrot.lane.b32.xlu1 %v3981_v25, %s3625_s15  ;;  %2444 = vmatpush.bf16.msrb.mxu2 %v3191_v16 }
 0xb8a   : > { %v2077_v6 = vpop.xlane.xlu1 %2076 }
 0xb8b   : > { %3336 = vrcp.f32 %v2077_v6  ;;  %v2975_v6 = vor.u32 %v3163_v4, %v2974_v2 }
 0xb91   : > { %v3337_v9 = vpop.eup %3336 }
 0xb92   : > { %v2079_v11 = vmul.f32 %v3337_v9, %v3333_v46  ;;  %v2982_v46 = vld [vmem:[#allocation10 + $0x20] sm:$0xf] }
 0xb93   : > { %v2983_v59 = vor.u32 %v3165_v62, %v2982_v46  ;;  %v2966_v9 = vld [vmem:[#allocation10] sm:$0xf] }
 0xb94   : > { %v2080_v13 = vpack.c.bf16 %v2079_v11, %v2079_v11  ;;  %v3161_v11 = vld [vmem:[#allocation10 + $0x4] sm:$0xf0]  ;;  %v3299_v46 = vld [vmem:[#allocation13] ss:$0 sm:$0xff] }
 0xba2   : > { %v2082_v12 = vpop.permute.xlu1 %2081 }
 0xba3   : > { %2094 = vmatpush.bf16.msra.mxu1 %v2082_v12  ;;  %v2979_v12 = vor.u32 %v3162_v5, %v2976_v8 }
 0xba5   : > { %2288 = vmatpush.bf16.msra.mxu0 %v2979_v12 }
 0xba6   : > { %2954 = vmatmul.msk.bf16.vlgmr.msra.gmra.mxu1 %vm1796_vm7, %v2080_v13  ;;  %v3160_v13 = vld [vmem:[#allocation10 + $0x4] sm:$0xf] }
 0xbb2   : > { %v2005_v14 = vpop.f32.mrf.mxu2 }
 0xbb3   : > { %v2009_v15 = vpack.c.bf16 %v2005_v14, %v2005_v14  ;;  %v2968_v14 = vld [vmem:[#allocation10 + $0x8] sm:$0xf0] }
 0xbb5   : > { %2952 = vmatmul.msk.bf16.vlgmr.msrb.gmra.mxu3 %vm1136_vm0, %v2009_v15  ;;  %v2967_v15 = vor.u32 %v3161_v11, %v2966_v9 }
 0xbba   : > { %v2007_v25 = vpop.f32.mrf.mxu2 }
 0xbbb   : > { %v2971_v25 = vor.u32 %v3160_v13, %v2968_v14 }
 0xbbd   : > { %2289 = vmatpush.bf16.msra.mxu0 %v2971_v25 }
 0xc23   : > { %v2096_v17 = vpop.f32.mrf.mxu1 }
 0xc24   : > { %v2100_v18 = vpack.c.bf16 %v2096_v17, %v2096_v17  ;;  %v3183_v17 = vld [vmem:[#allocation12 + $0x38] sm:$0xff] }
 0xc25   : > { %2431 = vmatpush.bf16.msrb.mxu1 %v3183_v17 }
 0xc26   : > { %2963 = vmatmul.msk.bf16.vlgmr.msra.gmra.mxu2 %vm1136_vm0, %v2100_v18 }
 0xc2b   : > { %v2098_v19 = vpop.f32.mrf.mxu1 }
 0xc38   : > { %v2039_v20 = vpop.f32.mrf.mxu3 }
 0xc39   : > { %v2043_v3 = vadd.f32 %v2039_v20, %v1952_v47  ;;  %v3007_v47 = vor.u32 %v3171_v43, %v3006_v42  ;;  %v3190_v20 = vld [vmem:[#allocation12 + $0x70] sm:$0xff]  ;;  %v3185_v43 = vld [vmem:[#allocation12 + $0x48] sm:$0xff] }
 0xc3a   : > { %2445 = vmatpush.bf16.msrb.mxu2 %v3190_v20 }
 0xc40   : > { %v2041_v21 = vpop.f32.mrf.mxu3 }
 0xca9   : > { %v2130_v22 = vpop.f32.mrf.mxu2 }
 0xcaa   : > { %v2134_v23 = vadd.f32 %v2130_v22, %v2043_v3  ;;  %v3182_v3 = vld [vmem:[#allocation12 + $0x30] sm:$0xff]  ;;  %v3189_v22 = vld [vmem:[#allocation12 + $0x68] sm:$0xff] }
 0xcab   : > { %2432 = vmatpush.bf16.msrb.mxu1 %v3182_v3  ;;  %2446 = vmatpush.bf16.msrb.mxu2 %v3189_v22 }
 0xcac   : > { %v2135_v10 = vadd.f32 %v2134_v23, %v3954_v7  ;;  %v3014_v7 = vld [vmem:[#allocation10 + $0x60] sm:$0xf]  ;;  %v3181_v23 = vld [vmem:[#allocation12 + $0x28] sm:$0xff] }
 0xcad   : > { %v3015_v40 = vor.u32 %v3173_v38, %v3014_v7  ;;  %v3297_v7 = vld [vmem:[%s4073_s20] ss:$0 sm:$0xff] }
 0xcae   : > { %2136 = vadd.xlane.f32.xlu2 %v2135_v10 }
 0xcaf   : > { %2270 = vmatpush.bf16.msra.mxu3 %v3015_v40  ;;  %2433 = vmatpush.bf16.msrb.mxu1 %v3181_v23  ;;  %v3298_v40 = vld [vmem:[%s4074_s21] ss:$0 sm:$0xff] }
 0xcb1   : > { %v2132_v24 = vpop.f32.mrf.mxu2 }
 0xcb2   : > { %v3180_v24 = vld [vmem:[#allocation12 + $0x20] sm:$0xff] }
 0xcb3   : > { %2271 = vmatpush.bf16.msra.mxu3 %v3007_v47  ;;  %2434 = vmatpush.bf16.msrb.mxu1 %v3180_v24  ;;  %v3184_v47 = vld [vmem:[#allocation12 + $0x40] sm:$0xff] }
 0xcb7   : > { %2272 = vmatpush.bf16.msra.mxu3 %v2999_v53  ;;  %2435 = vmatpush.bf16.msrb.mxu1 %v3179_v29 }
 0xcbb   : > { %2273 = vmatpush.bf16.msra.mxu3 %v2991_v58  ;;  %2436 = vmatpush.bf16.msrb.mxu1 %v3178_v45 }
 0xcbf   : > { %2274 = vmatpush.bf16.msra.mxu3 %v2983_v59  ;;  %2437 = vmatpush.bf16.msrb.mxu1 %v3177_v48 }
 0xcc3   : > { %2275 = vmatpush.bf16.msra.mxu3 %v2975_v6  ;;  %2438 = vmatpush.bf16.msrb.mxu1 %v3176_v49 }
 0xcc7   : > { %2276 = vmatpush.bf16.msra.mxu3 %v2967_v15 }
 0xd21   : > { %v2137_v33 = vpop.xlane.xlu2 %2136 }
 0xd22   : > { %v2138_v34 = vmul.f32 %v2137_v33, %v3931_v36  ;;  %v3186_v33 = vld [vmem:[#allocation12 + $0x50] sm:$0xff] }
 0xd24   : > { %v4023_v35 = vsub.f32 %v2135_v10, %v2138_v34  ;;  %v3188_v10 = vld [vmem:[#allocation12 + $0x60] sm:$0xff] }
 0xd25   : > { %2447 = vmatpush.bf16.msrb.mxu2 %v3188_v10 }
 0xd26   : > { %v2140_v37 = vmul.f32 %v4023_v35, %v4023_v35 }
 0xd28   : > { %2141 = vadd.xlane.f32.xlu2 %v2140_v37 }
 0xd29   : > { %2448 = vmatpush.bf16.msrb.mxu2 %v3187_v28 }
 0xd2d   : > { %2449 = vmatpush.bf16.msrb.mxu2 %v3186_v33 }
 0xd31   : > { %2450 = vmatpush.bf16.msrb.mxu2 %v3185_v43 }
 0xd35   : > { %2451 = vmatpush.bf16.msrb.mxu2 %v3184_v47 }
 0xd9b   : > { %v2142_v18 = vpop.xlane.xlu2 %2141 }
 0xd9c   : > { %v2143_v19 = vmul.f32 %v2142_v18, %v3931_v36 }
 0xd9e   : > { %v2144_v21 = vadd.f32 1e-05, %v2143_v19  ;;  %v3300_v19 = vld [vmem:[%s4113_s7] ss:$0 sm:$0xff] }
 0xda0   : > { %3338 = vrsqrt.f32 %v2144_v21  ;;  %vm2151_vm9 = vweird.f32 %v2144_v21 }
 0xda6   : > { %v3339_v26 = vpop.eup %3338 }
 0xda7   : > { %v2146_v27 = vmul.f32 %v3339_v26, %v2144_v21  ;;  %vm2152_vm8 = vweird.f32 %v3339_v26 }
 0xda8   : > { %vm2153_vm10 = vmor %vm2151_vm9, %vm2152_vm8 }
 0xda9   : > { %v2147_v30 = vmul.f32 %v3339_v26, %v2146_v27 }
 0xdab   : > { %v2148_v32 = vmul.f32 0.5, %v2147_v30 }
 0xdad   : > { %v2149_v34 = vsub.f32 1.5, %v2148_v32 }
 0xdaf   : > { %v2150_v37 = vmul.f32 %v3339_v26, %v2149_v34 }
 0xdb1   : > { %v2154_v38 = vsel %vm2153_vm10, %v3339_v26, %v2150_v37 }
 0xdb2   : > { %v2155_v39 = vmul.f32 %v2154_v38, %v4023_v35  ;;  %v2183_v35 = vld [vmem:[%s4112_s30] sm:$0x3] }
 0xdb3   : > { %v2186_v50 = vperm.slane %v2183_v35, 1  ;;  %v2185_v54 = vperm.slane %v2183_v35, 0 }
 0xdb4   : > { %v2160_v41 = vmul.f32 %v3297_v7, %v2155_v39 }
 0xdb6   : > { %v2165_v31 = vadd.f32 %v3298_v40, %v2160_v41 }
 0xdb8   : > { %v2166_v42 = vpack.c.bf16 %v2165_v31, %v2165_v31 }
 0xdba   : > { %2277 = vmatmul.bf16.vlgmr.msra.gmra.mxu3 %v2166_v42  ;;  %2290 = vmatmul.bf16.vlgmr.msra.gmra.mxu0 %v2166_v42 }
 0xe37   : > { %v2291_v51 = vpop.f32.mrf.mxu0 }
 0xe38   : > { %v2292_v52 = vadd.f32 %v2291_v51, %v2186_v50 }
 0xe3a   : > { %v2296_v53 = vmax.f32 %v2292_v52, 0.0 }
 0xe3c   : > { %v2298_v55 = vpack.c.bf16 %v2296_v53, %v2296_v53 }
 0xe3d   : > { %v2278_v44 = vpop.f32.mrf.mxu3 }
 0xe3e   : > { %v2279_v56 = vadd.f32 %v2278_v44, %v2185_v54  ;;  %2452 = vmatmul.bf16.vlgmr.msrb.gmra.mxu2 %v2298_v55 }
 0xe3f   : > { %v2293_v57 = vpop.f32.mrf.mxu0 }
 0xe40   : > { %v2295_v58 = vmax.f32 %v2279_v56, 0.0 }
 0xe42   : > { %v2297_v60 = vpack.c.bf16 %v2295_v58, %v2295_v58 }
 0xe44   : > { %2439 = vmatmul.bf16.vlgmr.msrb.gmra.mxu1 %v2297_v60 }
 0xe45   : > { %v2280_v61 = vpop.f32.mrf.mxu3 }
 0xec1   : > { %v2440_v62 = vpop.f32.mrf.mxu1  ;;  %v2453_v63 = vpop.f32.mrf.mxu2 }
 0xec2   : > { %v2441_v59 = vadd.f32 %v3299_v46, %v2440_v62 }
 0xec4   : > { %v2454_v0 = vadd.f32 %v2453_v63, %v2441_v59 }
 0xec6   : > { %v2457_v1 = vadd.f32 %v2454_v0, %v2165_v31 }
 0xec8   : > { %2458 = vadd.xlane.f32.xlu0 %v2457_v1 }
 0xec9   : > { %v2442_v2 = vpop.f32.mrf.mxu1  ;;  %v2455_v4 = vpop.f32.mrf.mxu2 }
 0xf3b   : > { %v2459_v5 = vpop.xlane.xlu0 %2458 }
 0xf3c   : > { %v2460_v6 = vmul.f32 %v2459_v5, %v3931_v36 }
 0xf3e   : > { %v2461_v8 = vsub.f32 %v2457_v1, %v2460_v6 }
 0xf40   : > { %v2462_v9 = vmul.f32 %v2461_v8, %v2461_v8 }
 0xf42   : > { %2463 = vadd.xlane.f32.xlu2 %v2462_v9 }
 0xfb5   : > { %v2464_v11 = vpop.xlane.xlu2 %2463 }
 0xfb6   : > { %v2465_v12 = vmul.f32 %v2464_v11, %v3931_v36  ;;  %v3301_v36 = vld [vmem:[%s4114_s25] ss:$0 sm:$0xff] }
 0xfb8   : > { %v2466_v13 = vadd.f32 1e-05, %v2465_v12 }
 0xfba   : > { %3340 = vrsqrt.f32 %v2466_v13  ;;  %vm2473_vm12 = vweird.f32 %v2466_v13 }
 0xfc0   : > { %v3341_v14 = vpop.eup %3340 }
 0xfc1   : > { %v2468_v15 = vmul.f32 %v3341_v14, %v2466_v13  ;;  %vm2474_vm11 = vweird.f32 %v3341_v14 }
 0xfc2   : > { %vm2475_vm13 = vmor %vm2473_vm12, %vm2474_vm11 }
 0xfc3   : > { %v2469_v25 = vmul.f32 %v3341_v14, %v2468_v15 }
 0xfc5   : > { %v2470_v16 = vmul.f32 0.5, %v2469_v25 }
 0xfc7   : > { %v2471_v17 = vsub.f32 1.5, %v2470_v16 }
 0xfc9   : > { %v2472_v18 = vmul.f32 %v3341_v14, %v2471_v17 }
 0xfcb   : > { %v2476_v20 = vsel %vm2475_vm13, %v3341_v14, %v2472_v18 }
 0xfcc   : > { %v2477_v3 = vmul.f32 %v2476_v20, %v2461_v8 }
 0xfce   : > { %v2482_v21 = vmul.f32 %v3300_v19, %v2477_v3 }
 0xfd0   : > { %v2487_v22 = vadd.f32 %v3301_v36, %v2482_v21 }
 0xfd2   : > { %2488 = vst [vmem:[%s914_s22] sm:$0xff] %v2487_v22 }
 0xfd3 PF: > { %s4116_s2 = sld [smem:[#allocation20_spill]] }
 0xfd9   : > { %s39_s5 = sadd.s32 1, %s4116_s2  }
 0xfda   : > { %p36_p7 = scmp.ge.s32.totalorder %s39_s5, 4  }
 0xfdc   :  { %38 = sbr.rel (!%p36_p7) target bundleno = 20 (0x14), region = 194 }
 0xfe1   :  { %2508 = vsyncpa [#allocation3], 1 }
 0xfe2   :  { %2510 = vsyncpa [#allocation3 + $0x1], 1 }
 0xfe3   :  { %2511 = vsyncpa [#allocation5], 1 }
 0xfe4   :  { %2512 = vsyncpa [#allocation8], 1 }
 0xfe5   :  { %2513 = vsyncpa [#allocation11], 1 }
 0xfe6   :  { %2514 = vsyncpa [#allocation14], 1 }

// kernel: swipe_decoder_forward.3
= control target key start
LH: loop header
LB: loop body
LE: loop exit
PB: predicated region body
PF: predicated region fallthrough
CT: control target
= control target key end

     0   :  { %s3994_s0 = inlined_call_operand.vmem [shape: f32[2,8,128], index: 0, kind: input, shape index: {}]   ;;  %s3995_s1 = inlined_call_operand.vmem [shape: bf16[2,16,128], index: 1, kind: input, shape index: {}]   ;;  %s3996_s2 = inlined_call_operand.vmem [shape: f32[2,8,8], index: 2, kind: input, shape index: {}]   ;;  %s3997_s3 = inlined_call_operand.vmem [shape: f32[2,1,16], index: 3, kind: input, shape index: {}]   ;;  %s3998_s4 = inlined_call_operand.hbm [shape: bf16[128,384], index: 4, kind: input, shape index: {}]   ;;  %s3999_s5 = inlined_call_operand.vmem [shape: f32[1,384], index: 5, kind: input, shape index: {}]   ;;  %s4000_s6 = inlined_call_operand.vmem [shape: bf16[4,32,128], index: 6, kind: input, shape index: {}]   ;;  %s4001_s7 = inlined_call_operand.vmem [shape: f32[1,128], index: 7, kind: input, shape index: {}]   ;;  %s4002_s8 = inlined_call_operand.hbm [shape: bf16[128,128], index: 8, kind: input, shape index: {}]   ;;  %s4003_s9 = inlined_call_operand.vmem [shape: f32[1,128], index: 9, kind: input, shape index: {}]   ;;  %s4004_s10 = inlined_call_operand.hbm [shape: bf16[128,256], index: 10, kind: input, shape index: {}]   ;;  %s4005_s11 = inlined_call_operand.vmem [shape: f32[1,256], index: 11, kind: input, shape index: {}]   ;;  %s4006_s12 = inlined_call_operand.hbm [shape: bf16[4,32,128], index: 12, kind: input, shape index: {}]   ;;  %s4007_s13 = inlined_call_operand.vmem [shape: f32[1,128], index: 13, kind: input, shape index: {}]   ;;  %s4008_s14 = inlined_call_operand.hbm [shape: bf16[128,256], index: 14, kind: input, shape index: {}]   ;;  %s4009_s15 = inlined_call_operand.vmem [shape: f32[1,256], index: 15, kind: input, shape index: {}]   ;;  %s4010_s16 = inlined_call_operand.hbm [shape: bf16[256,128], index: 16, kind: input, shape index: {}]   ;;  %s4011_s17 = inlined_call_operand.vmem [shape: f32[1,128], index: 17, kind: input, shape index: {}]   ;;  %s4012_s18 = inlined_call_operand.vmem [shape: f32[1,128], index: 18, kind: input, shape index: {}]   ;;  %s4013_s19 = inlined_call_operand.vmem [shape: f32[1,128], index: 19, kind: input, shape index: {}]   ;;  %s4014_s20 = inlined_call_operand.vmem [shape: f32[1,128], index: 20, kind: input, shape index: {}]   ;;  %s4015_s21 = inlined_call_operand.vmem [shape: f32[1,128], index: 21, kind: input, shape index: {}]   ;;  %s4016_s22 = inlined_call_operand.vmem [shape: f32[1,128], index: 22, kind: input, shape index: {}]   ;;  %s4017_s23 = inlined_call_operand.hbm [shape: f32[1,128], index: 23, kind: input, shape index: {}]   ;;  %s4018_s24 = inlined_call_operand.vmem [shape: f32[2,8,128], index: 24, kind: output, shape index: {}]  }
   0x1   :  { %4021 = sst [smem:[#allocation18_spill]] %s3994_s0 }
   0x2   :  { %4022 = sst [smem:[#allocation19_spill]] %s3995_s1 }
   0x3   :  { %4023 = sst [smem:[#allocation20_spill]] %s3996_s2 }
   0x4   :  { %4024 = sst [smem:[#allocation21_spill]] %s3997_s3 }
   0x5   :  { %4025 = sst [smem:[#allocation22_spill]] %s3998_s4 }
   0x6   :  { %4026 = sst [smem:[#allocation23_spill]] %s3999_s5 }
   0x7   :  { %4027 = sst [smem:[#allocation24_spill]] %s4000_s6 }
   0x8   :  { %4028 = sst [smem:[#allocation25_spill]] %s4001_s7 }
   0x9   :  { %4029 = sst [smem:[#allocation26_spill]] %s4002_s8 }
   0xa   :  { %4030 = sst [smem:[#allocation27_spill]] %s4006_s12 }
   0xb   :  { %4031 = sst [smem:[#allocation28_spill]] %s4010_s16 }
   0xc   :  { %4032 = sst [smem:[#allocation29_spill]] %s4011_s17 }
   0xd   :  { %4033 = sst [smem:[#allocation30_spill]] %s4016_s22 }
   0xe   :  { %4034 = sst [smem:[#allocation31_spill]] %s4018_s24 }
   0xf   :  { %29 = vsyncpa [#allocation3], 0 }
  0x10   :  { %30 = vsyncpa [#allocation5], 0 }
  0x11   :  { %31 = vsyncpa [#allocation8], 0 }
  0x12   :  { %32 = vsyncpa [#allocation11], 0  ;;  %s3691_s5 = smov 0  }
  0x13 LB: > { %4035 = sst [smem:[#allocation17_spill]] %s3547_s5  ;;  %s3700_s2 = sadd.s32 4294967295, %s3547_s5   ;;  %s3547_s5 = sphi %s3691_s5, %s38_s5  }
  0x14   : > { %s4036_s28 = sld [smem:[#allocation26_spill]]  ;;  %p2629_p0 = scmp.ge.s32.totalorder %s3547_s5, 1 }
  0x15   : > { %p593_p1 = scmp.lt.s32.totalorder %s3547_s5, 3  ;;  %p3225_p2 = scmp.eq.s32.totalorder %s3700_s2, 0 }
  0x16   : > { %s3549_s0 = smov [#allocation4]   ;;  %s4038_s12 = sld [smem:[#allocation27_spill]] }
  0x17   : > { %p3705_p3 = pnand %p2629_p0, %p593_p1  ;;  %s629_s7 = sshll.u32 %s3549_s0, 4  ;;  %s630_s7 = int_to_ptr.vmem [resolvable:$true] %s629_s7 }
  0x18   : > { %s3550_s4 = smov [#allocation7]   ;;  %s4040_s16 = sld [smem:[#allocation28_spill]] }
  0x19   : > { %p3203_p4 = pneg %p3705_p3  ;;  %s663_s1 = sshll.u32 %s3550_s4, 4  ;;  %s664_s1 = int_to_ptr.vmem [resolvable:$true] %s663_s1 }
  0x1a   : > { %s627_s6 = sshll.u32 %s4036_s28, 4  ;;  %s3551_s0 = smov 64   ;;  %s628_s6 = int_to_ptr.hbm [resolvable:$true] %s627_s6 }
  0x1b   : > { %p3716_p5 = pnand %p3225_p2, %p3203_p4  ;;  %s3552_s5 = smov 4  }
  0x1c   : > { %s661_s25 = sshll.u32 %s4038_s12, 4  ;;  %s3553_s30 = smov [#allocation10]   ;;  %s662_s25 = int_to_ptr.hbm [resolvable:$true] %s661_s25 }
  0x1d   : > { %3209 = dma.hbm_to_vmem [thread:$0]  (!%p3716_p5), %s628_s6, 1024, %s630_s7, [#allocation5], %s3551_s0, %s3551_s0, %s3552_s5  }
  0x1e   : > { %s695_s28 = sshll.u32 %s4040_s16, 4  ;;  %s697_s3 = sshll.u32 %s3553_s30, 4  ;;  %s696_s28 = int_to_ptr.hbm [resolvable:$true] %s695_s28  ;;  %s698_s3 = int_to_ptr.vmem [resolvable:$true] %s697_s3 }
  0x1f   : > { %3215 = dma.hbm_to_vmem [thread:$0]  (!%p3716_p5), %s662_s25, 1024, %s664_s1, [#allocation8], %s3551_s0, %s3551_s0, %s3552_s5  }
  0x20   : > { %s4041_s22 = sld [smem:[#allocation22_spill]]  ;;  %s3554_s4 = smov [#allocation2]  }
  0x21   : > { %3221 = dma.hbm_to_vmem [thread:$0]  (!%p3716_p5), %s696_s28, 2048, %s698_s3, [#allocation11], %s3551_s0, %s3551_s0, %s3552_s5  }
  0x22   : > { %s606_s26 = sshll.u32 %s3554_s4, 4  ;;  %s644_s6 = sshll.u32 %s4004_s10, 4  ;;  %s607_s26 = int_to_ptr.vmem [resolvable:$true] %s606_s26  ;;  %s645_s6 = int_to_ptr.hbm [resolvable:$true] %s644_s6 }
  0x23   : > { %s3555_s7 = smov 192   ;;  %s3556_s25 = smov 12  }
  0x24   : > { %s3557_s12 = smov [#allocation6]   ;;  %s3558_s24 = smov 128  }
  0x25   : > { %s3559_s1 = smov 8   ;;  %s678_s0 = sshll.u32 %s4008_s14, 4  ;;  %s679_s0 = int_to_ptr.hbm [resolvable:$true] %s678_s0 }
  0x26   : > { %s604_s17 = sshll.u32 %s4041_s22, 4  ;;  %s646_s22 = sshll.u32 %s3557_s12, 4  ;;  %s605_s17 = int_to_ptr.hbm [resolvable:$true] %s604_s17  ;;  %s647_s22 = int_to_ptr.vmem [resolvable:$true] %s646_s22 }
  0x27   : > { %3206 = dma.hbm_to_vmem [thread:$0]  (!%p3716_p5), %s605_s17, 3072, %s607_s26, [#allocation3], %s3555_s7, %s3555_s7, %s3556_s25  }
  0x28   : > { %3212 = dma.hbm_to_vmem [thread:$0]  (!%p3716_p5), %s645_s6, 2048, %s647_s22, [#allocation5], %s3558_s24, %s3558_s24, %s3559_s1  }
  0x29   : > { %s3560_s16 = smov [#allocation9]   ;;  %s728_s17 = sshll.u32 %s4017_s23, 4  ;;  %s729_s17 = int_to_ptr.hbm [resolvable:$true] %s728_s17 }
  0x2a   : > { %s680_s30 = sshll.u32 %s3560_s16, 4  ;;  %s3561_s26 = smov [#allocation12]   ;;  %s681_s30 = int_to_ptr.vmem [resolvable:$true] %s680_s30 }
  0x2b   : > { %3218 = dma.hbm_to_vmem [thread:$0]  (!%p3716_p5), %s679_s0, 2048, %s681_s30, [#allocation8], %s3558_s24, %s3558_s24, %s3559_s1  }
  0x2c   : > { %s730_s27 = sshll.u32 %s3561_s26, 4  ;;  %771 = sbr.rel (%p3705_p3) target bundleno = 4045 (0xfcd), region = 116  ;;  %s731_s27 = int_to_ptr.vmem [resolvable:$true] %s730_s27 }
  0x2d   : > { %3224 = dma.hbm_to_vmem [thread:$0]  (!%p3716_p5), %s729_s17, 16, %s731_s27, [#allocation11]  }
  0x31   : > { %3530 = dma.done.wait (%p3225_p2), [#allocation3], 3072  }
  0x32   : > { %3532 = vsyncadd (%p3225_p2), [#allocation3], 4294964224 }
  0x33   : > { %3534 = dma.done.wait (%p3225_p2), [#allocation5], 3072  }
  0x34   : > { %3536 = vsyncadd (%p3225_p2), [#allocation5], 4294964224 }
  0x35   : > { %3538 = dma.done.wait (%p3225_p2), [#allocation8], 3072  }
  0x36   : > { %3540 = vsyncadd (%p3225_p2), [#allocation8], 4294964224 }
  0x37   : > { %3542 = dma.done.wait (%p3225_p2), [#allocation11], 2064  }
  0x38   : > { %3544 = vsyncadd (%p3225_p2), [#allocation11], 4294965232  ;;  %v2737_v0 = vld [vmem:[#allocation2 + $0xa8] sm:$0xf]  ;;  %v3101_v1 = vld [vmem:[#allocation2 + $0xb0] sm:$0xf0] }
  0x39   : > { %v3100_v2 = vld [vmem:[#allocation2 + $0xac] sm:$0xf]  ;;  %v2738_v3 = vor.u32 %v3101_v1, %v2737_v0  ;;  %v2739_v4 = vld [vmem:[#allocation2 + $0xb4] sm:$0xf0]  ;;  %v2725_v5 = vld [vmem:[#allocation2 + $0x90] sm:$0xf] }
  0x3a   : > { %v3098_v6 = vld [vmem:[#allocation2 + $0x98] sm:$0xf0]  ;;  %v2742_v7 = vor.u32 %v3100_v2, %v2739_v4  ;;  %v3097_v8 = vld [vmem:[#allocation2 + $0x94] sm:$0xf]  ;;  %v2727_v9 = vld [vmem:[#allocation2 + $0x9c] sm:$0xf0] }
  0x3b   : > { %1071 = vmatpush.bf16.msra.mxu0 %v2738_v3  ;;  %v2726_v10 = vor.u32 %v3098_v6, %v2725_v5  ;;  %v2713_v11 = vld [vmem:[#allocation2 + $0x78] sm:$0xf]  ;;  %v2730_v12 = vor.u32 %v3097_v8, %v2727_v9  ;;  %v3095_v13 = vld [vmem:[#allocation2 + $0x80] sm:$0xf0]  ;;  %v2745_v14 = vld [vmem:[#allocation2 + $0xb0] sm:$0xf] }
  0x3c   : > { %1084 = vmatpush.bf16.msra.mxu1 %v2742_v7  ;;  %v3102_v15 = vld [vmem:[#allocation2 + $0xb8] sm:$0xf0]  ;;  %v2715_v17 = vld [vmem:[#allocation2 + $0x84] sm:$0xf0]  ;;  %v2733_v19 = vld [vmem:[#allocation2 + $0x98] sm:$0xf]  ;;  %v2714_v21 = vor.u32 %v3095_v13, %v2713_v11 }
  0x3d   : > { %v3094_v16 = vld [vmem:[#allocation2 + $0x7c] sm:$0xf]  ;;  %v2746_v18 = vor.u32 %v3102_v15, %v2745_v14  ;;  %v3099_v20 = vld [vmem:[#allocation2 + $0xa0] sm:$0xf0]  ;;  %v2701_v22 = vld [vmem:[#allocation2 + $0x60] sm:$0xf] }
  0x3e   : > { %v2734_v23 = vor.u32 %v3099_v20, %v2733_v19  ;;  %v2718_v24 = vor.u32 %v3094_v16, %v2715_v17  ;;  %v3092_v25 = vld [vmem:[#allocation2 + $0x68] sm:$0xf0]  ;;  %v2721_v26 = vld [vmem:[#allocation2 + $0x80] sm:$0xf]  ;;  %v3091_v28 = vld [vmem:[#allocation2 + $0x64] sm:$0xf] }
  0x3f   : > { %1072 = vmatpush.bf16.msra.mxu0 %v2726_v10  ;;  %1097 = vmatpush.bf16.msra.mxu2 %v2746_v18  ;;  %v3096_v27 = vld [vmem:[#allocation2 + $0x88] sm:$0xf0]  ;;  %v2703_v29 = vld [vmem:[#allocation2 + $0x6c] sm:$0xf0]  ;;  %p878_p6 = scmp.lt.s32.totalorder %s3700_s2, 1  ;;  %v2702_v30 = vor.u32 %v3092_v25, %v2701_v22  ;;  %s4042_s7 = sld [smem:[#allocation18_spill]] }
  0x40   : > { %1085 = vmatpush.bf16.msra.mxu1 %v2730_v12  ;;  %v2689_v31 = vld [vmem:[#allocation2 + $0x48] sm:$0xf]  ;;  %v2722_v32 = vor.u32 %v3096_v27, %v2721_v26  ;;  %v2706_v33 = vor.u32 %v3091_v28, %v2703_v29  ;;  %v3089_v34 = vld [vmem:[#allocation2 + $0x50] sm:$0xf0]  ;;  %v3088_v37 = vld [vmem:[#allocation2 + $0x4c] sm:$0xf] }
  0x41   : > { %v2709_v35 = vld [vmem:[#allocation2 + $0x68] sm:$0xf]  ;;  %v3093_v36 = vld [vmem:[#allocation2 + $0x70] sm:$0xf0]  ;;  %v2691_v38 = vld [vmem:[#allocation2 + $0x54] sm:$0xf0]  ;;  %v2690_v39 = vor.u32 %v3089_v34, %v2689_v31 }
  0x42   : > { %s4054_s2 = smov (!%p878_p6, %s3700_s2), 1  ;;  %v2677_v40 = vld [vmem:[#allocation2 + $0x30] sm:$0xf]  ;;  %v3086_v41 = vld [vmem:[#allocation2 + $0x38] sm:$0xf0]  ;;  %v2710_v43 = vor.u32 %v3093_v36, %v2709_v35  ;;  %v2694_v44 = vor.u32 %v3088_v37, %v2691_v38  ;;  %s4043_s24 = sld [smem:[#allocation23_spill]] }
  0x43   : > { %1073 = vmatpush.bf16.msra.mxu0 %v2714_v21  ;;  %1098 = vmatpush.bf16.msra.mxu2 %v2734_v23  ;;  %v3085_v42 = vld [vmem:[#allocation2 + $0x34] sm:$0xf]  ;;  %v2697_v45 = vld [vmem:[#allocation2 + $0x50] sm:$0xf]  ;;  %v3090_v46 = vld [vmem:[#allocation2 + $0x58] sm:$0xf0]  ;;  %v2678_v50 = vor.u32 %v3086_v41, %v2677_v40 }
  0x44   : > { %1086 = vmatpush.bf16.msra.mxu1 %v2718_v24  ;;  %v2679_v47 = vld [vmem:[#allocation2 + $0x3c] sm:$0xf0]  ;;  %v2665_v48 = vld [vmem:[#allocation2 + $0x18] sm:$0xf]  ;;  %v3083_v49 = vld [vmem:[#allocation2 + $0x20] sm:$0xf0]  ;;  %v2698_v51 = vor.u32 %v3090_v46, %v2697_v45 }
  0x45   : > { %v2682_v52 = vor.u32 %v3085_v42, %v2679_v47  ;;  %v2685_v53 = vld [vmem:[#allocation2 + $0x38] sm:$0xf]  ;;  %v3087_v54 = vld [vmem:[#allocation2 + $0x40] sm:$0xf0]  ;;  %v3082_v55 = vld [vmem:[#allocation2 + $0x1c] sm:$0xf]  ;;  %v2666_v57 = vor.u32 %v3083_v49, %v2665_v48 }
  0x46   : > { %v2667_v56 = vld [vmem:[#allocation2 + $0x24] sm:$0xf0]  ;;  %s3772_s29 = sshll.u32 %s4054_s2, 3  ;;  %v2653_v58 = vld [vmem:[#allocation2] sm:$0xf]  ;;  %v2686_v59 = vor.u32 %v3087_v54, %v2685_v53  ;;  %vm1119_vm0 = vcmask 261120  }
  0x47   : > { %1074 = vmatpush.bf16.msra.mxu0 %v2702_v30  ;;  %1099 = vmatpush.bf16.msra.mxu2 %v2722_v32  ;;  %v2670_v60 = vor.u32 %v3082_v55, %v2667_v56  ;;  %v3080_v61 = vld [vmem:[#allocation2 + $0x8] sm:$0xf0]  ;;  %s881_s25 = scalar_lea.vmem %s4042_s7, %s3772_s29  ;;  %v2673_v62 = vld [vmem:[#allocation2 + $0x20] sm:$0xf]  ;;  %v3079_v0 = vld [vmem:[#allocation2 + $0x4] sm:$0xf] }
  0x48   : > { %1087 = vmatpush.bf16.msra.mxu1 %v2706_v33  ;;  %v3084_v63 = vld [vmem:[#allocation2 + $0x28] sm:$0xf0]  ;;  %v2655_v1 = vld [vmem:[#allocation2 + $0xc] sm:$0xf0]  ;;  %v2654_v2 = vor.u32 %v3080_v61, %v2653_v58  ;;  %v3778_v3 = vld [vmem:[%s881_s25] sm:$0xff]  ;;  %s3562_s1 = smov 96  }
  0x49   : > { %v2674_v4 = vor.u32 %v3084_v63, %v2673_v62  ;;  %v2658_v5 = vor.u32 %v3079_v0, %v2655_v1  ;;  %v2661_v6 = vld [vmem:[#allocation2 + $0x8] sm:$0xf]  ;;  %v3081_v7 = vld [vmem:[#allocation2 + $0x10] sm:$0xf0]  ;;  %v902_v8 = vpack.c.bf16 %v3778_v3, %v3778_v3  ;;  %v935_v10 = vld [vmem:[%s4043_s24] sm:$0x7] }
  0x4a   : > { %v2662_v9 = vor.u32 %v3081_v7, %v2661_v6  ;;  %v938_v11 = vperm.slane %v935_v10, 1  ;;  %v937_v14 = vperm.slane %v935_v10, 0  ;;  %v939_v22 = vperm.slane %v935_v10, 2  ;;  %s3563_s5 = smov 32   ;;  %s3564_s28 = smov 64  }
  0x4b   : > { %1075 = vmatpush.bf16.msra.mxu0 %v2690_v39  ;;  %1100 = vmatpush.bf16.msra.mxu2 %v2710_v43  ;;  %s4044_s30 = sld [smem:[#allocation20_spill]]  ;;  %vm1141_vm1 = vcmask 64512   ;;  %vm1157_vm2 = vcmask 1043456   ;;  %vm1779_vm7 = vcmask 130048  }
  0x4c   : > { %1088 = vmatpush.bf16.msra.mxu1 %v2694_v44  ;;  %s4045_s26 = sld [smem:[#allocation24_spill]] }
  0x4d   : > { %s4046_s0 = sld [smem:[#allocation25_spill]] }
  0x4e   : > { %s4047_s12 = sld [smem:[#allocation19_spill]] }
  0x4f   : > { %1076 = vmatpush.bf16.msra.mxu0 %v2678_v50  ;;  %1101 = vmatpush.bf16.msra.mxu2 %v2698_v51  ;;  %s4048_s7 = sld [smem:[#allocation21_spill]] }
  0x50   : > { %1089 = vmatpush.bf16.msra.mxu1 %v2682_v52  ;;  %s4050_s27 = sld [smem:[#allocation30_spill]] }
  0x51   : > { %s890_s3 = scalar_lea.vmem %s4044_s30, %s3772_s29 }
  0x52   : > { %v3805_v31 = vld [vmem:[%s890_s3] sm:$0xff]  ;;  %v3106_v46 = vld [vmem:[%s4045_s26 + $0x18] sm:$0xff]  ;;  %v3105_v48 = vld [vmem:[%s4045_s26 + $0x10] sm:$0xff]  ;;  %s4049_s3 = sld [smem:[#allocation29_spill]] }
  0x53   : > { %1077 = vmatpush.bf16.msra.mxu0 %v2666_v57  ;;  %1102 = vmatpush.bf16.msra.mxu2 %v2686_v59  ;;  %v3103_v62 = vld [vmem:[%s4045_s26] sm:$0xff] }
  0x54   : > { %1090 = vmatpush.bf16.msra.mxu1 %v2670_v60  ;;  %v3104_v60 = vld [vmem:[%s4045_s26 + $0x8] sm:$0xff]  ;;  %s886_s22 = scalar_lea.vmem %s4047_s12, %s3772_s29 }
  0x55   : > { %s893_s25 = scalar_lea.vmem %s4048_s7, %s4054_s2  ;;  %s4051_s7 = sld [smem:[#allocation31_spill]] }
  0x57   : > { %1078 = vmatpush.bf16.msra.mxu0 %v2654_v2  ;;  %1103 = vmatpush.bf16.msra.mxu2 %v2674_v4 }
  0x58   : > { %1091 = vmatpush.bf16.msra.mxu1 %v2658_v5 }
  0x5a   : > { %1079 = vmatmul.bf16.vlgmr.msra.gmra.mxu0 %v902_v8 }
  0x5b   : > { %1092 = vmatmul.bf16.vlgmr.msra.gmra.mxu1 %v902_v8  ;;  %1104 = vmatpush.bf16.msra.mxu2 %v2662_v9 }
  0x5e   : > { %1105 = vmatmul.bf16.vlgmr.msra.gmra.mxu2 %v902_v8 }
  0x5f   : > { %1296 = vmatpush.bf16.msrb.mxu2 %v3106_v46 }
  0x63   : > { %1297 = vmatpush.bf16.msrb.mxu2 %v3105_v48 }
  0xd7   : > { %v1080_v12 = vpop.f32.mrf.mxu0 }
  0xd8   : > { %v1093_v13 = vpop.f32.mrf.mxu1  ;;  %v1081_v17 = vadd.f32 %v1080_v12, %v937_v14 }
  0xd9   : > { %v1094_v15 = vadd.f32 %v1093_v13, %v938_v11 }
  0xda   : > { %v1116_v21 = vpack.c.bf16 %v1081_v17, %v1081_v17 }
  0xdb   : > { %v3785_v16 = vpack.c.bf16 %v1094_v15, %v1094_v15 }
  0xdd   : > { %1212 = vrot.lane.b32.xlu0 %v3785_v16, %s3562_s1  ;;  %v1124_v18 = vsel %vm1119_vm0, %v3785_v16, 0 }
  0xde   : > { %1133 = vmatpush.bf16.xpose.msra.mxu3 %v1124_v18 }
  0xdf   : > { %v1082_v19 = vpop.f32.mrf.mxu0 }
  0xe0   : > { %v1095_v20 = vpop.f32.mrf.mxu1 }
  0xe1   : > { %v1106_v23 = vpop.f32.mrf.mxu2 }
  0xe2   : > { %v1107_v24 = vadd.f32 %v1106_v23, %v939_v22  ;;  %v3264_v22 = vld [vmem:[%s4046_s0] ss:$0 sm:$0xff] }
  0xe4   : > { %v3793_v25 = vpack.c.bf16 %v1107_v24, %v1107_v24 }
  0xe5   : > { %1209 = vrot.lane.b32.xlu0 %v1116_v21, %s3562_s1  ;;  %2747 = vmatmul.msk.bf16.vlgmr.msra.gmra.mxu3 %vm1119_vm0, %v1116_v21 }
  0xe6   : > { %v1159_v47 = vsel %vm1157_vm2, %v3793_v25, 0 }
  0xe7   : > { %1168 = vmatpush.bf16.msrb.mxu3 %v1159_v47 }
  0xe9   : > { %v1108_v26 = vpop.f32.mrf.mxu2 }
  0xeb   : > { %1200 = vmatpush.bf16.msra.mxu3 %v3104_v60 }
  0xed   : > { %1248 = vrot.lane.b32.xlu0 %v3793_v25, %s3562_s1 }
  0xef   : > { %1201 = vmatpush.bf16.msra.mxu3 %v3103_v62 }
  0xf5   : > { %1397 = vrot.lane.b32.xlu0 %v1116_v21, %s3563_s5 }
  0xfd   : > { %1304 = vrot.lane.b32.xlu0 %v1116_v21, %s3564_s28 }
 0x14f   : > { %v1213_v27 = vpop.permute.xlu0 %1212 }
 0x150   : > { %v1218_v28 = vsel %vm1119_vm0, %v1213_v27, 0 }
 0x151   : > { %1227 = vmatpush.bf16.xpose.msrb.mxu0 %v1218_v28 }
 0x157   : > { %v1210_v29 = vpop.permute.xlu0 %1209 }
 0x158   : > { %2758 = vmatmul.msk.bf16.vlgmr.msrb.gmra.mxu0 %vm1119_vm0, %v1210_v29 }
 0x15f   : > { %v1249_v61 = vpop.permute.xlu0 %1248 }
 0x160   : > { %v1254_v63 = vsel %vm1157_vm2, %v1249_v61, 0 }
 0x161   : > { %1263 = vmatpush.bf16.msrb.mxu1 %v1254_v63 }
 0x167   : > { %v1398_v9 = vpop.permute.xlu0 %1397 }
 0x168   : > { %v1135_v30 = vpop.f32.mrf.mxu3 }
 0x169   : > { %v1139_v32 = vmul.f32 0.17677669, %v1135_v30 }
 0x16b   : > { %v1140_v33 = vadd.f32 %v1139_v32, %v3805_v31 }
 0x16d   : > { %v1142_v34 = vsel %vm1141_vm1, %v1140_v33, -inf }
 0x16e   : > { %1143 = vmax.xlane.f32.xlu1 %v1142_v34 }
 0x16f   : > { %v1305_v11 = vpop.permute.xlu0 %1304 }
 0x170   : > { %v1137_v35 = vpop.f32.mrf.mxu3 }
 0x1d5   : > { %v1229_v36 = vpop.f32.mrf.mxu0 }
 0x1d6   : > { %v1233_v37 = vmul.f32 0.17677669, %v1229_v36 }
 0x1d8   : > { %v1234_v38 = vadd.f32 %v1233_v37, %v3805_v31 }
 0x1da   : > { %v1235_v39 = vsel %vm1141_vm1, %v1234_v38, -inf }
 0x1db   : > { %1236 = vmax.xlane.f32.xlu1 %v1235_v39 }
 0x1dd   : > { %v1231_v40 = vpop.f32.mrf.mxu0 }
 0x1e1   : > { %v1144_v41 = vpop.xlane.xlu1 %1143 }
 0x1e2   : > { %v1145_v42 = vsub.f32 %v1140_v33, %v1144_v41 }
 0x1e4   : > { %v1146_v43 = vmul.f32 1.442695, %v1145_v42 }
 0x1e6   : > { %3275 = vpow2.f32 %v1146_v43 }
 0x1ec   : > { %v3276_v44 = vpop.eup %3275 }
 0x1ed   : > { %v1148_v45 = vsel %vm1141_vm1, %v3276_v44, 0.0 }
 0x1ee   : > { %1149 = vadd.xlane.f32.xlu2 %v1148_v45 }
 0x1f4   : > { %1399 = vrot.lane.b32.xlu1 %v3785_v16, %s3563_s5 }
 0x24e   : > { %v1237_v49 = vpop.xlane.xlu1 %1236 }
 0x24f   : > { %v1238_v50 = vsub.f32 %v1234_v38, %v1237_v49 }
 0x251   : > { %v1239_v51 = vmul.f32 1.442695, %v1238_v50 }
 0x253   : > { %3277 = vpow2.f32 %v1239_v51 }
 0x259   : > { %v3278_v52 = vpop.eup %3277 }
 0x25a   : > { %v1241_v53 = vsel %vm1141_vm1, %v3278_v52, 0.0 }
 0x25b   : > { %1242 = vadd.xlane.f32.xlu2 %v1241_v53 }
 0x261   : > { %v1150_v54 = vpop.xlane.xlu2 %1149 }
 0x262   : > { %3279 = vrcp.f32 %v1150_v54 }
 0x266   : > { %v1400_v55 = vpop.permute.xlu1 %1399 }
 0x267   : > { %v1405_v56 = vsel %vm1119_vm0, %v1400_v55, 0  ;;  %v3109_v55 = vld [vmem:[%s4045_s26 + $0x30] sm:$0xff] }
 0x268   : > { %v3280_v57 = vpop.eup %3279  ;;  %1414 = vmatpush.bf16.xpose.msra.mxu2 %v1405_v56  ;;  %v3108_v56 = vld [vmem:[%s4045_s26 + $0x28] sm:$0xff] }
 0x269   : > { %v1152_v58 = vmul.f32 %v3280_v57, %v3276_v44  ;;  %1389 = vmatpush.bf16.msra.mxu1 %v3108_v56  ;;  %v3107_v57 = vld [vmem:[%s4045_s26 + $0x20] sm:$0xff] }
 0x26b   : > { %v1153_v59 = vpack.c.bf16 %v1152_v58, %v1152_v58 }
 0x26d   : > { %2748 = vmatmul.msk.bf16.vlgmr.msrb.gmra.mxu3 %vm1141_vm1, %v1153_v59  ;;  %1390 = vmatpush.bf16.msra.mxu1 %v3107_v57 }
 0x273   : > { %1306 = vrot.lane.b32.xlu2 %v3785_v16, %s3564_s28 }
 0x2ce   : > { %v1243_v0 = vpop.xlane.xlu2 %1242 }
 0x2cf   : > { %3281 = vrcp.f32 %v1243_v0 }
 0x2d5   : > { %v3282_v1 = vpop.eup %3281 }
 0x2d6   : > { %v1245_v2 = vmul.f32 %v3282_v1, %v3278_v52  ;;  %v1307_v4 = vpop.permute.xlu2 %1306  ;;  %v3110_v52 = vld [vmem:[%s4045_s26 + $0x38] sm:$0xff] }
 0x2d7   : > { %v1312_v5 = vsel %vm1119_vm0, %v1307_v4, 0 }
 0x2d8   : > { %1321 = vmatpush.bf16.xpose.msrb.mxu3 %v1312_v5  ;;  %v1246_v6 = vpack.c.bf16 %v1245_v2, %v1245_v2 }
 0x2da   : > { %2759 = vmatmul.msk.bf16.vlgmr.msrb.gmra.mxu1 %vm1141_vm1, %v1246_v6 }
 0x2f0   : > { %v1170_v7 = vpop.f32.mrf.mxu3 }
 0x2f1   : > { %v1174_v8 = vpack.c.bf16 %v1170_v7, %v1170_v7 }
 0x2f3   : > { %2757 = vmatmul.msk.bf16.vlgmr.msra.gmra.mxu3 %vm1119_vm0, %v1174_v8  ;;  %v3565_v8 = vmov 128.0  }
 0x2f8   : > { %v1172_v10 = vpop.f32.mrf.mxu3 }
 0x2f9   : > { %v3134_v10 = vld [vmem:[#allocation6 + $0x74] sm:$0xf0] }
 0x303   : > { %2773 = vmatmul.msk.bf16.vlgmr.msrb.gmra.mxu3 %vm1119_vm0, %v1305_v11  ;;  %v2889_v11 = vld [vmem:[#allocation6 + $0x60] sm:$0xf] }
 0x357   : > { %v1265_v12 = vpop.f32.mrf.mxu1 }
 0x358   : > { %v1269_v13 = vpack.c.bf16 %v1265_v12, %v1265_v12 }
 0x35a   : > { %2772 = vmatmul.msk.bf16.vlgmr.msrb.gmra.mxu2 %vm1119_vm0, %v1269_v13  ;;  %v3132_v13 = vld [vmem:[#allocation6 + $0x64] sm:$0xf0] }
 0x35f   : > { %v1267_v14 = vpop.f32.mrf.mxu1 }
 0x360   : > { %v2890_v14 = vor.u32 %v3132_v13, %v2889_v11  ;;  %v2899_v13 = vld [vmem:[#allocation6 + $0x78] sm:$0xf0] }
 0x36a   : > { %2788 = vmatmul.msk.bf16.vlgmr.msra.gmra.mxu2 %vm1119_vm0, %v1398_v9  ;;  %v2897_v9 = vld [vmem:[#allocation6 + $0x70] sm:$0xf] }
 0x36b   : > { %v2898_v12 = vor.u32 %v3134_v10, %v2897_v9 }
 0x36d   : > { %1718 = vmatpush.bf16.msrb.mxu2 %v2898_v12  ;;  %v3133_v12 = vld [vmem:[#allocation6 + $0x74] sm:$0xf] }
 0x371   : > { %1719 = vmatpush.bf16.msrb.mxu2 %v2890_v14  ;;  %v3131_v14 = vld [vmem:[#allocation6 + $0x64] sm:$0xf] }
 0x376   : > { %v1203_v15 = vpop.f32.mrf.mxu3 }
 0x377   : > { %v1207_v23 = vadd.f32 %v3264_v22, %v1203_v15 }
 0x37e   : > { %v1205_v16 = vpop.f32.mrf.mxu3 }
 0x37f   : > { %v2881_v16 = vld [vmem:[#allocation6 + $0x50] sm:$0xf] }
 0x386   : > { %v1323_v17 = vpop.f32.mrf.mxu3 }
 0x387   : > { %v1327_v18 = vmul.f32 0.17677669, %v1323_v17  ;;  %v3130_v17 = vld [vmem:[#allocation6 + $0x54] sm:$0xf0] }
 0x389   : > { %v1328_v19 = vadd.f32 %v1327_v18, %v3805_v31  ;;  %v3118_v18 = vld [vmem:[#allocation4 + $0x38] sm:$0xff] }
 0x38a   : > { %1597 = vmatpush.bf16.msrb.mxu1 %v3118_v18  ;;  %v3129_v18 = vld [vmem:[#allocation6 + $0x54] sm:$0xf] }
 0x38b   : > { %v1329_v20 = vsel %vm1141_vm1, %v1328_v19, -inf }
 0x38c   : > { %1330 = vmax.xlane.f32.xlu2 %v1329_v20  ;;  %v2882_v20 = vor.u32 %v3130_v17, %v2881_v16  ;;  %v2891_v16 = vld [vmem:[#allocation6 + $0x68] sm:$0xf0] }
 0x38d   : > { %v2894_v17 = vor.u32 %v3131_v14, %v2891_v16 }
 0x38e   : > { %v1325_v21 = vpop.f32.mrf.mxu3  ;;  %1720 = vmatpush.bf16.msrb.mxu2 %v2882_v20 }
 0x38f   : > { %v3128_v21 = vld [vmem:[#allocation6 + $0x44] sm:$0xf0] }
 0x3dd   : > { %v1299_v24 = vpop.f32.mrf.mxu2 }
 0x3de   : > { %v1303_v26 = vadd.f32 %v1299_v24, %v1207_v23  ;;  %v2865_v24 = vld [vmem:[#allocation6 + $0x30] sm:$0xf] }
 0x3e5   : > { %v1301_v27 = vpop.f32.mrf.mxu2 }
 0x3ed   : > { %v1416_v28 = vpop.f32.mrf.mxu2 }
 0x3ee   : > { %v1420_v29 = vmul.f32 0.17677669, %v1416_v28 }
 0x3f0   : > { %v1421_v30 = vadd.f32 %v1420_v29, %v3805_v31  ;;  %v2857_v29 = vld [vmem:[#allocation6 + $0x20] sm:$0xf] }
 0x3f2   : > { %v1422_v32 = vsel %vm1141_vm1, %v1421_v30, -inf }
 0x3f3   : > { %1423 = vmax.xlane.f32.xlu0 %v1422_v32 }
 0x3f5   : > { %v1418_v33 = vpop.f32.mrf.mxu2 }
 0x3ff   : > { %v1331_v34 = vpop.xlane.xlu2 %1330 }
 0x400   : > { %v1332_v35 = vsub.f32 %v1328_v19, %v1331_v34  ;;  %v2849_v34 = vld [vmem:[#allocation6 + $0x10] sm:$0xf] }
 0x402   : > { %v1333_v36 = vmul.f32 1.442695, %v1332_v35  ;;  %v3122_v35 = vld [vmem:[#allocation6 + $0x14] sm:$0xf0] }
 0x404   : > { %3283 = vpow2.f32 %v1333_v36 }
 0x407   : > { %1434 = vrot.lane.b32.xlu0 %v3793_v25, %s3563_s5 }
 0x40a   : > { %v3284_v37 = vpop.eup %3283 }
 0x40b   : > { %v1335_v38 = vsel %vm1141_vm1, %v3284_v37, 0.0 }
 0x40c   : > { %1336 = vadd.xlane.f32.xlu2 %v1335_v38  ;;  %v2841_v38 = vld [vmem:[#allocation6] sm:$0xf] }
 0x466   : > { %v1424_v39 = vpop.xlane.xlu0 %1423 }
 0x467   : > { %v1425_v40 = vsub.f32 %v1421_v30, %v1424_v39  ;;  %v3124_v30 = vld [vmem:[#allocation6 + $0x24] sm:$0xf0] }
 0x468   : > { %v2858_v33 = vor.u32 %v3124_v30, %v2857_v29  ;;  %v3120_v39 = vld [vmem:[#allocation6 + $0x4] sm:$0xf0]  ;;  %v3267_v29 = vld [vmem:[%s4003_s9] ss:$0 sm:$0xff] }
 0x469   : > { %v1426_v41 = vmul.f32 1.442695, %v1425_v40 }
 0x46b   : > { %3285 = vpow2.f32 %v1426_v41 }
 0x471   : > { %v3286_v31 = vpop.eup %3285 }
 0x472   : > { %v1428_v42 = vsel %vm1141_vm1, %v3286_v31, 0.0 }
 0x473   : > { %1429 = vadd.xlane.f32.xlu1 %v1428_v42 }
 0x479   : > { %v1435_v43 = vpop.permute.xlu0 %1434 }
 0x47a   : > { %v1440_v44 = vsel %vm1157_vm2, %v1435_v43, 0 }
 0x47b   : > { %1449 = vmatpush.bf16.msra.mxu3 %v1440_v44  ;;  %v3879_v44 = vld [vmem:[%s886_s22] sm:$0xff] }
 0x47f   : > { %v1337_v49 = vpop.xlane.xlu2 %1336 }
 0x48c   : > { %1341 = vrot.lane.b32.xlu1 %v3793_v25, %s3564_s28 }
 0x4e6   : > { %v1430_v45 = vpop.xlane.xlu1 %1429 }
 0x4e7   : > { %3287 = vrcp.f32 %v1430_v45  ;;  %v3117_v45 = vld [vmem:[#allocation4 + $0x30] sm:$0xff] }
 0x4e8   : > { %3289 = vrcp.f32 %v1337_v49  ;;  %1598 = vmatpush.bf16.msrb.mxu1 %v3117_v45  ;;  %v3113_v49 = vld [vmem:[#allocation4 + $0x10] sm:$0xff] }
 0x4e9   : > { %3291 = vrcp.f32 %v3565_v8 }
 0x4ed   : > { %v3288_v46 = vpop.eup %3287 }
 0x4ee   : > { %v1432_v47 = vmul.f32 %v3288_v46, %v3286_v31  ;;  %v3290_v50 = vpop.eup %3289  ;;  %v2842_v31 = vor.u32 %v3120_v39, %v2841_v38  ;;  %v3116_v46 = vld [vmem:[#allocation4 + $0x28] sm:$0xff]  ;;  %v3121_v39 = vld [vmem:[#allocation6 + $0x14] sm:$0xf] }
 0x4ef   : > { %v1339_v51 = vmul.f32 %v3290_v50, %v3284_v37  ;;  %v3292_v15 = vpop.eup %3291  ;;  %v2850_v37 = vor.u32 %v3122_v35, %v2849_v34  ;;  %1599 = vmatpush.bf16.msrb.mxu1 %v3116_v46  ;;  %v3112_v50 = vld [vmem:[#allocation4 + $0x8] sm:$0xff]  ;;  %v3123_v35 = vld [vmem:[#allocation6 + $0x24] sm:$0xf]  ;;  %v3917_v46 = vld [vmem:[%s893_s25] ss:$0 sm:$0xff]  ;;  %s897_s25 = scalar_lea.vmem %s4051_s7, %s3772_s29 }
 0x4f0   : > { %v1433_v48 = vpack.c.bf16 %v1432_v47, %v1432_v47  ;;  %v1494_v19 = vmul.f32 128.0, %v3292_v15  ;;  %vm1498_vm3 = vweird.f32 %v3292_v15  ;;  %v3115_v47 = vld [vmem:[#allocation4 + $0x20] sm:$0xff] }
 0x4f1   : > { %v1340_v25 = vpack.c.bf16 %v1339_v51, %v1339_v51  ;;  %v3111_v51 = vld [vmem:[#allocation4] sm:$0xff] }
 0x4f2   : > { %2789 = vmatmul.msk.bf16.vlgmr.msra.gmra.mxu3 %vm1141_vm1, %v1433_v48  ;;  %v1495_v22 = vsub.f32 1.0, %v1494_v19  ;;  %v3114_v48 = vld [vmem:[#allocation4 + $0x18] sm:$0xff] }
 0x4f3   : > { %1600 = vmatpush.bf16.msrb.mxu1 %v3115_v47  ;;  %v2883_v19 = vld [vmem:[#allocation6 + $0x58] sm:$0xf0] }
 0x4f4   : > { %v1496_v27 = vmul.f32 %v3292_v15, %v1495_v22  ;;  %v2886_v20 = vor.u32 %v3129_v18, %v2883_v19  ;;  %v3136_v19 = vld [vmem:[#allocation7 + $0x8] sm:$0xff] }
 0x4f6   : > { %v1497_v32 = vadd.f32 %v3292_v15, %v1496_v27 }
 0x4f7   : > { %1601 = vmatpush.bf16.msrb.mxu1 %v3114_v48 }
 0x4f8   : > { %v3872_v36 = vsel %vm1498_vm3, %v3292_v15, %v1497_v32  ;;  %v2902_v15 = vor.u32 %v3133_v12, %v2899_v13 }
 0x4fa   : > { %1732 = vmatpush.bf16.msrb.mxu3 %v2902_v15 }
 0x4fb   : > { %1602 = vmatpush.bf16.msrb.mxu1 %v3113_v49 }
 0x4fe   : > { %v1342_v53 = vpop.permute.xlu1 %1341  ;;  %1733 = vmatpush.bf16.msrb.mxu3 %v2894_v17 }
 0x4ff   : > { %v1347_v54 = vsel %vm1157_vm2, %v1342_v53, 0  ;;  %1603 = vmatpush.bf16.msrb.mxu1 %v3112_v50 }
 0x500   : > { %1356 = vmatpush.bf16.msra.mxu0 %v1347_v54 }
 0x502   : > { %1734 = vmatpush.bf16.msrb.mxu3 %v2886_v20  ;;  %v3135_v20 = vld [vmem:[#allocation7] sm:$0xff] }
 0x503   : > { %2774 = vmatmul.msk.bf16.vlgmr.msra.gmra.mxu0 %vm1141_vm1, %v1340_v25  ;;  %1604 = vmatpush.bf16.msrb.mxu1 %v3111_v51 }
 0x504   : > { %1482 = vmatpush.bf16.msrb.mxu0 %v3110_v52 }
 0x508   : > { %1483 = vmatpush.bf16.msrb.mxu0 %v3109_v55 }
 0x575   : > { %v1451_v58 = vpop.f32.mrf.mxu3 }
 0x576   : > { %v1455_v59 = vpack.c.bf16 %v1451_v58, %v1451_v58 }
 0x578   : > { %2802 = vmatmul.msk.bf16.vlgmr.msrb.gmra.mxu0 %vm1119_vm0, %v1455_v59  ;;  %v3886_v59 = vld [vmem:[%s4005_s11] sm:$0x3] }
 0x57d   : > { %v1453_v60 = vpop.f32.mrf.mxu3 }
 0x580   : > { %v1358_v61 = vpop.f32.mrf.mxu0 }
 0x581   : > { %v1362_v62 = vpack.c.bf16 %v1358_v61, %v1358_v61 }
 0x583   : > { %2787 = vmatmul.msk.bf16.vlgmr.msra.gmra.mxu1 %vm1119_vm0, %v1362_v62  ;;  %v3265_v62 = vld [vmem:[%s4012_s18] ss:$0 sm:$0xff] }
 0x584   : > { %1834 = vmatpush.bf16.msra.mxu1 %v3136_v19 }
 0x588   : > { %v1360_v63 = vpop.f32.mrf.mxu0  ;;  %1835 = vmatpush.bf16.msra.mxu1 %v3135_v20 }
 0x589   : > { %v1628_v63 = vperm.slane %v3886_v59, 0 }
 0x5f5   : > { %v1485_v0 = vpop.f32.mrf.mxu0 }
 0x5fd   : > { %v1487_v1 = vpop.f32.mrf.mxu0 }
 0x600   : > { %v1392_v2 = vpop.f32.mrf.mxu1 }
 0x601   : > { %v1396_v4 = vadd.f32 %v1392_v2, %v1303_v26  ;;  %v3126_v26 = vld [vmem:[#allocation6 + $0x34] sm:$0xf0]  ;;  %v3266_v2 = vld [vmem:[%s4013_s19] ss:$0 sm:$0xff] }
 0x602   : > { %v2866_v28 = vor.u32 %v3126_v26, %v2865_v24  ;;  %v2867_v24 = vld [vmem:[#allocation6 + $0x38] sm:$0xf0] }
 0x603   : > { %v1489_v5 = vadd.f32 %v1485_v0, %v1396_v4 }
 0x605   : > { %v1490_v6 = vadd.f32 %v1489_v5, %v3778_v3  ;;  %v2873_v3 = vld [vmem:[#allocation6 + $0x40] sm:$0xf] }
 0x606   : > { %v2874_v23 = vor.u32 %v3128_v21, %v2873_v3  ;;  %v3127_v3 = vld [vmem:[#allocation6 + $0x44] sm:$0xf]  ;;  %v2875_v21 = vld [vmem:[#allocation6 + $0x48] sm:$0xf0] }
 0x607   : > { %1491 = vadd.xlane.f32.xlu2 %v1490_v6  ;;  %v2878_v22 = vor.u32 %v3127_v3, %v2875_v21 }
 0x608   : > { %v1394_v7 = vpop.f32.mrf.mxu1  ;;  %1721 = vmatpush.bf16.msrb.mxu2 %v2874_v23  ;;  %v3125_v23 = vld [vmem:[#allocation6 + $0x34] sm:$0xf] }
 0x609   : > { %1735 = vmatpush.bf16.msrb.mxu3 %v2878_v22 }
 0x60c   : > { %1722 = vmatpush.bf16.msrb.mxu2 %v2866_v28  ;;  %v2870_v28 = vor.u32 %v3125_v23, %v2867_v24 }
 0x60e   : > { %1736 = vmatpush.bf16.msrb.mxu3 %v2870_v28 }
 0x610   : > { %1723 = vmatpush.bf16.msrb.mxu2 %v2858_v33 }
 0x614   : > { %1724 = vmatpush.bf16.msrb.mxu2 %v2850_v37  ;;  %v2859_v37 = vld [vmem:[#allocation6 + $0x28] sm:$0xf0] }
 0x615   : > { %v2862_v38 = vor.u32 %v3123_v35, %v2859_v37 }
 0x617   : > { %1737 = vmatpush.bf16.msrb.mxu3 %v2862_v38 }
 0x618   : > { %1725 = vmatpush.bf16.msrb.mxu2 %v2842_v31  ;;  %v3119_v31 = vld [vmem:[#allocation6 + $0x4] sm:$0xf] }
 0x61b   : > { %1726 = vmatmul.bf16.vlgmr.msrb.gmra.mxu2 %v3879_v44 }
 0x67a   : > { %v1492_v40 = vpop.xlane.xlu2 %1491 }
 0x67b   : > { %v1500_v41 = vmul.f32 %v3872_v36, %v1492_v40  ;;  %v2851_v40 = vld [vmem:[#allocation6 + $0x18] sm:$0xf0] }
 0x67d   : > { %v1501_v42 = vsub.f32 %v1490_v6, %v1500_v41  ;;  %v2854_v41 = vor.u32 %v3121_v39, %v2851_v40 }
 0x67f   : > { %v1502_v43 = vmul.f32 %v1501_v42, %v1501_v42  ;;  %1738 = vmatpush.bf16.msrb.mxu3 %v2854_v41 }
 0x681   : > { %1503 = vadd.xlane.f32.xlu2 %v1502_v43 }
 0x69e   : > { %v1727_v60 = vpop.f32.mrf.mxu2 }
 0x69f   : > { %v1728_v5 = vadd.f32 %v1727_v60, %v1628_v63 }
 0x6a6   : > { %v1729_v6 = vpop.f32.mrf.mxu2 }
 0x6a7   : > { %v1730_v8 = vadd.f32 %v1729_v6, %v1628_v63  ;;  %v3138_v6 = vld [vmem:[#allocation7 + $0x18] sm:$0xff] }
 0x6a9   : > { %v3899_v10 = vpack.c.bf16 %v1730_v8, %v1728_v5  ;;  %v3137_v8 = vld [vmem:[#allocation7 + $0x10] sm:$0xff] }
 0x6ab   : > { %1846 = vrot.lane.b32.xlu0 %v3899_v10, %s3562_s1  ;;  %v1759_v11 = vsel %vm1119_vm0, %v3899_v10, 0 }
 0x6ac   : > { %1768 = vmatpush.bf16.xpose.msra.mxu0 %v1759_v11 }
 0x6f4   : > { %v1504_v52 = vpop.xlane.xlu2 %1503 }
 0x6f5   : > { %v1505_v53 = vmul.f32 %v1504_v52, %v3872_v36 }
 0x6f7   : > { %v1506_v54 = vadd.f32 1e-05, %v1505_v53  ;;  %v1629_v53 = vperm.slane %v3886_v59, 1 }
 0x6f9   : > { %3293 = vrsqrt.f32 %v1506_v54  ;;  %vm1513_vm5 = vweird.f32 %v1506_v54 }
 0x6ff   : > { %v3294_v25 = vpop.eup %3293 }
 0x700   : > { %v1508_v55 = vmul.f32 %v3294_v25, %v1506_v54  ;;  %vm1514_vm4 = vweird.f32 %v3294_v25 }
 0x701   : > { %vm1515_vm6 = vmor %vm1513_vm5, %vm1514_vm4 }
 0x702   : > { %v1509_v56 = vmul.f32 %v3294_v25, %v1508_v55 }
 0x704   : > { %v1510_v57 = vmul.f32 0.5, %v1509_v56 }
 0x706   : > { %v1511_v58 = vsub.f32 1.5, %v1510_v57 }
 0x708   : > { %v1512_v61 = vmul.f32 %v3294_v25, %v1511_v58 }
 0x70a   : > { %v1516_v0 = vsel %vm1515_vm6, %v3294_v25, %v1512_v61 }
 0x70b   : > { %v1517_v1 = vmul.f32 %v1516_v0, %v1501_v42  ;;  %v2843_v42 = vld [vmem:[#allocation6 + $0x8] sm:$0xf0] }
 0x70c   : > { %v2846_v43 = vor.u32 %v3119_v31, %v2843_v42  ;;  %v3269_v42 = vld [vmem:[%s4007_s13] ss:$0 sm:$0xff] }
 0x70d   : > { %v1522_v4 = vmul.f32 %v3265_v62, %v1517_v1 }
 0x70e   : > { %1739 = vmatpush.bf16.msrb.mxu3 %v2846_v43 }
 0x70f   : > { %v3895_v7 = vadd.f32 %v3266_v2, %v1522_v4 }
 0x711   : > { %v1528_v9 = vpack.c.bf16 %v3895_v7, %v3895_v7  ;;  %1740 = vmatmul.bf16.vlgmr.msrb.gmra.mxu3 %v3879_v44 }
 0x713   : > { %1605 = vmatmul.bf16.vlgmr.msrb.gmra.mxu1 %v1528_v9 }
 0x71d   : > { %v1847_v26 = vpop.permute.xlu0 %1846 }
 0x71e   : > { %v1852_v27 = vsel %vm1119_vm0, %v1847_v26, 0 }
 0x71f   : > { %1861 = vmatpush.bf16.xpose.msra.mxu2 %v1852_v27 }
 0x790   : > { %v1606_v30 = vpop.f32.mrf.mxu1 }
 0x791   : > { %v1607_v32 = vadd.f32 %v3267_v29, %v1606_v30 }
 0x793   : > { %v1752_v33 = vpack.c.bf16 %v1607_v32, %v1607_v32 }
 0x794   : > { %v1741_v52 = vpop.f32.mrf.mxu3 }
 0x795   : > { %1843 = vrot.lane.b32.xlu2 %v1752_v33, %s3562_s1  ;;  %2903 = vmatmul.msk.bf16.vlgmr.msra.gmra.mxu0 %vm1119_vm0, %v1752_v33  ;;  %v1742_v54 = vadd.f32 %v1741_v52, %v1629_v53 }
 0x798   : > { %v1608_v34 = vpop.f32.mrf.mxu1 }
 0x79c   : > { %v1743_v25 = vpop.f32.mrf.mxu3 }
 0x79d   : > { %v1744_v44 = vadd.f32 %v1743_v25, %v1629_v53 }
 0x79f   : > { %v3922_v55 = vpack.c.bf16 %v1744_v44, %v1742_v54 }
 0x7a1   : > { %1802 = vmatpush.bf16.msrb.mxu0 %v3922_v55 }
 0x7a5   : > { %1928 = vmatpush.bf16.msra.mxu0 %v3138_v6 }
 0x7a9   : > { %1929 = vmatpush.bf16.msra.mxu0 %v3137_v8  ;;  %v3142_v8 = vld [vmem:[#allocation7 + $0x38] sm:$0xff] }
 0x7ef   : > { %v1844_v45 = vpop.permute.xlu2 %1843 }
 0x7f0   : > { %2914 = vmatmul.msk.bf16.vlgmr.msra.gmra.mxu2 %vm1119_vm0, %v1844_v45 }
 0x812   : > { %v1770_v47 = vpop.f32.mrf.mxu0 }
 0x813   : > { %v1774_v48 = vmul.f32 0.17677669, %v1770_v47 }
 0x815   : > { %v1778_v49 = vadd.f32 %v3917_v46, %v1774_v48 }
 0x817   : > { %v1780_v50 = vsel %vm1779_vm7, %v1778_v49, -inf }
 0x818   : > { %1781 = vmax.xlane.f32.xlu1 %v1780_v50 }
 0x81a   : > { %v1772_v51 = vpop.f32.mrf.mxu0 }
 0x873   : > { %v1863_v56 = vpop.f32.mrf.mxu2 }
 0x874   : > { %v1867_v57 = vmul.f32 0.17677669, %v1863_v56 }
 0x876   : > { %v1868_v58 = vadd.f32 %v3917_v46, %v1867_v57 }
 0x878   : > { %v1869_v60 = vsel %vm1779_vm7, %v1868_v58, -inf }
 0x879   : > { %1870 = vmax.xlane.f32.xlu0 %v1869_v60 }
 0x87b   : > { %v1865_v61 = vpop.f32.mrf.mxu2 }
 0x88b   : > { %v1782_v62 = vpop.xlane.xlu1 %1781 }
 0x88c   : > { %v1783_v63 = vsub.f32 %v1778_v49, %v1782_v62 }
 0x88d   : > { %1882 = vrot.lane.b32.xlu0 %v3922_v55, %s3562_s1 }
 0x88e   : > { %v1784_v59 = vmul.f32 1.442695, %v1783_v63 }
 0x890   : > { %3295 = vpow2.f32 %v1784_v59 }
 0x895   : > { %2029 = vrot.lane.b32.xlu0 %v3899_v10, %s3563_s5 }
 0x896   : > { %v3296_v0 = vpop.eup %3295 }
 0x897   : > { %v1786_v1 = vsel %vm1779_vm7, %v3296_v0, 0.0 }
 0x898   : > { %1787 = vadd.xlane.f32.xlu2 %v1786_v1 }
 0x89d   : > { %2027 = vrot.lane.b32.xlu0 %v1752_v33, %s3563_s5 }
 0x8b0   : > { %1936 = vrot.lane.b32.xlu2 %v1752_v33, %s3564_s28 }
 0x8ec   : > { %v1871_v2 = vpop.xlane.xlu0 %1870 }
 0x8ed   : > { %v1872_v4 = vsub.f32 %v1868_v58, %v1871_v2 }
 0x8ef   : > { %v1873_v5 = vmul.f32 1.442695, %v1872_v4  ;;  %v3140_v4 = vld [vmem:[#allocation7 + $0x28] sm:$0xff] }
 0x8f1   : > { %3297 = vpow2.f32 %v1873_v5  ;;  %v3139_v5 = vld [vmem:[#allocation7 + $0x20] sm:$0xff] }
 0x8f7   : > { %v3298_v9 = vpop.eup %3297 }
 0x8f8   : > { %v1875_v11 = vsel %vm1779_vm7, %v3298_v9, 0.0 }
 0x8f9   : > { %1876 = vadd.xlane.f32.xlu1 %v1875_v11 }
 0x8ff   : > { %v1883_v12 = vpop.permute.xlu0 %1882 }
 0x900   : > { %1895 = vmatpush.bf16.msra.mxu3 %v1883_v12 }
 0x904   : > { %2019 = vmatpush.bf16.msrb.mxu3 %v3140_v4  ;;  %v3146_v4 = vld [vmem:[#allocation9 + $0x14] sm:$0xf0] }
 0x907   : > { %v2030_v16 = vpop.permute.xlu0 %2029 }
 0x908   : > { %v2035_v18 = vsel %vm1119_vm0, %v2030_v16, 0  ;;  %2020 = vmatpush.bf16.msrb.mxu3 %v3139_v5  ;;  %v3141_v16 = vld [vmem:[#allocation7 + $0x30] sm:$0xff] }
 0x909   : > { %v3145_v5 = vld [vmem:[#allocation9 + $0x14] sm:$0xf] }
 0x90b   : > { %v1788_v13 = vpop.xlane.xlu2 %1787 }
 0x90c   : > { %3299 = vrcp.f32 %v1788_v13 }
 0x90f   : > { %v2028_v34 = vpop.permute.xlu0 %2027 }
 0x912   : > { %v3300_v14 = vpop.eup %3299  ;;  %1938 = vrot.lane.b32.xlu1 %v3899_v10, %s3564_s28 }
 0x913   : > { %v1790_v15 = vmul.f32 %v3300_v14, %v3296_v0  ;;  %v1937_v29 = vpop.permute.xlu2 %1936 }
 0x915   : > { %v1791_v17 = vpack.c.bf16 %v1790_v15, %v1790_v15 }
 0x917   : > { %2904 = vmatmul.msk.bf16.vlgmr.msrb.gmra.mxu0 %vm1779_vm7, %v1791_v17 }
 0x918   : > { %2044 = vmatpush.bf16.xpose.msrb.mxu0 %v2035_v18 }
 0x96c   : > { %v1877_v3 = vpop.xlane.xlu1 %1876 }
 0x96d   : > { %3301 = vrcp.f32 %v1877_v3 }
 0x973   : > { %v3302_v21 = vpop.eup %3301 }
 0x974   : > { %v1879_v22 = vmul.f32 %v3302_v21, %v3298_v9 }
 0x976   : > { %v1880_v23 = vpack.c.bf16 %v1879_v22, %v1879_v22 }
 0x978   : > { %2915 = vmatmul.msk.bf16.vlgmr.msra.gmra.mxu3 %vm1779_vm7, %v1880_v23 }
 0x984   : > { %v1939_v10 = vpop.permute.xlu1 %1938 }
 0x985   : > { %v1944_v24 = vsel %vm1119_vm0, %v1939_v10, 0 }
 0x986   : > { %1953 = vmatpush.bf16.xpose.msrb.mxu1 %v1944_v24 }
 0x994   : > { %v1804_v26 = vpop.f32.mrf.mxu0 }
 0x995   : > { %v1808_v27 = vpack.c.bf16 %v1804_v26, %v1804_v26  ;;  %v3005_v26 = vld [vmem:[#allocation9 + $0x70] sm:$0xf] }
 0x997   : > { %2913 = vmatmul.msk.bf16.vlgmr.msra.gmra.mxu1 %vm1119_vm0, %v1808_v27  ;;  %v3158_v27 = vld [vmem:[#allocation9 + $0x74] sm:$0xf0] }
 0x99c   : > { %v1806_v28 = vpop.f32.mrf.mxu0 }
 0x99d   : > { %v3157_v28 = vld [vmem:[#allocation9 + $0x74] sm:$0xf] }
 0x9a7   : > { %2925 = vmatmul.msk.bf16.vlgmr.msrb.gmra.mxu1 %vm1119_vm0, %v1937_v29  ;;  %v3006_v29 = vor.u32 %v3158_v27, %v3005_v26 }
 0x9a9   : > { %2252 = vmatpush.bf16.msra.mxu3 %v3006_v29  ;;  %v3162_v29 = vld [vmem:[#allocation10 + $0x18] sm:$0xff] }
 0x9fb   : > { %v1897_v30 = vpop.f32.mrf.mxu3 }
 0x9fc   : > { %v1901_v32 = vpack.c.bf16 %v1897_v30, %v1897_v30  ;;  %v3007_v30 = vld [vmem:[#allocation9 + $0x78] sm:$0xf0] }
 0x9fe   : > { %2924 = vmatmul.msk.bf16.vlgmr.msra.gmra.mxu0 %vm1119_vm0, %v1901_v32  ;;  %v3010_v32 = vor.u32 %v3157_v28, %v3007_v30  ;;  %v3170_v28 = vld [vmem:[#allocation10 + $0x58] sm:$0xff] }
 0xa00   : > { %2265 = vmatpush.bf16.msra.mxu0 %v3010_v32 }
 0xa03   : > { %v1899_v33 = vpop.f32.mrf.mxu3 }
 0xa0e   : > { %2936 = vmatmul.msk.bf16.vlgmr.msrb.gmra.mxu0 %vm1119_vm0, %v2028_v34 }
 0xa14   : > { %v1837_v35 = vpop.f32.mrf.mxu1 }
 0xa15   : > { %v1841_v43 = vadd.f32 %v3269_v42, %v1837_v35  ;;  %v2989_v42 = vld [vmem:[#allocation9 + $0x50] sm:$0xf] }
 0xa1c   : > { %v1839_v37 = vpop.f32.mrf.mxu1 }
 0xa24   : > { %v1955_v38 = vpop.f32.mrf.mxu1 }
 0xa25   : > { %v1959_v39 = vmul.f32 0.17677669, %v1955_v38  ;;  %v3156_v38 = vld [vmem:[#allocation9 + $0x64] sm:$0xf0] }
 0xa27   : > { %v1960_v40 = vadd.f32 %v3917_v46, %v1959_v39  ;;  %v3155_v39 = vld [vmem:[#allocation9 + $0x64] sm:$0xf] }
 0xa29   : > { %v1961_v41 = vsel %vm1779_vm7, %v1960_v40, -inf }
 0xa2a   : > { %1962 = vmax.xlane.f32.xlu1 %v1961_v41  ;;  %v2999_v41 = vld [vmem:[#allocation9 + $0x68] sm:$0xf0] }
 0xa2c   : > { %v1957_v31 = vpop.f32.mrf.mxu1 }
 0xa2d   : > { %v3002_v31 = vor.u32 %v3155_v39, %v2999_v41 }
 0xa2f   : > { %2266 = vmatpush.bf16.msra.mxu0 %v3002_v31 }
 0xa7b   : > { %v1931_v45 = vpop.f32.mrf.mxu0 }
 0xa7c   : > { %v1935_v47 = vadd.f32 %v1931_v45, %v1841_v43  ;;  %v3154_v43 = vld [vmem:[#allocation9 + $0x54] sm:$0xf0]  ;;  %v3153_v45 = vld [vmem:[#allocation9 + $0x54] sm:$0xf] }
 0xa83   : > { %v1933_v48 = vpop.f32.mrf.mxu0 }
 0xa84   : > { %v2991_v48 = vld [vmem:[#allocation9 + $0x58] sm:$0xf0] }
 0xa8b   : > { %v2046_v49 = vpop.f32.mrf.mxu0 }
 0xa8c   : > { %v2050_v50 = vmul.f32 0.17677669, %v2046_v49  ;;  %v2994_v49 = vor.u32 %v3153_v45, %v2991_v48  ;;  %v3161_v45 = vld [vmem:[#allocation10 + $0x10] sm:$0xff]  ;;  %v3160_v48 = vld [vmem:[#allocation10 + $0x8] sm:$0xff] }
 0xa8e   : > { %v2051_v51 = vadd.f32 %v3917_v46, %v2050_v50  ;;  %2267 = vmatpush.bf16.msra.mxu0 %v2994_v49  ;;  %v2981_v50 = vld [vmem:[#allocation9 + $0x40] sm:$0xf] }
 0xa8f   : > { %v3159_v49 = vld [vmem:[#allocation10] sm:$0xff] }
 0xa90   : > { %v2052_v52 = vsel %vm1779_vm7, %v2051_v51, -inf }
 0xa91   : > { %2053 = vmax.xlane.f32.xlu0 %v2052_v52  ;;  %v3151_v52 = vld [vmem:[#allocation9 + $0x44] sm:$0xf] }
 0xa93   : > { %v2048_v53 = vpop.f32.mrf.mxu0 }
 0xa9d   : > { %v1963_v54 = vpop.xlane.xlu1 %1962 }
 0xa9e   : > { %v1964_v25 = vsub.f32 %v1960_v40, %v1963_v54  ;;  %v2983_v54 = vld [vmem:[#allocation9 + $0x48] sm:$0xf0] }
 0xaa0   : > { %v1965_v44 = vmul.f32 1.442695, %v1964_v25  ;;  %v2986_v25 = vor.u32 %v3151_v52, %v2983_v54 }
 0xaa2   : > { %3303 = vpow2.f32 %v1965_v44  ;;  %2268 = vmatpush.bf16.msra.mxu0 %v2986_v25  ;;  %v2973_v44 = vld [vmem:[#allocation9 + $0x30] sm:$0xf] }
 0xaa5   : > { %1973 = vrot.lane.b32.xlu0 %v3922_v55, %s3564_s28 }
 0xaa8   : > { %v3304_v56 = vpop.eup %3303 }
 0xaa9   : > { %v1967_v57 = vsel %vm1779_vm7, %v3304_v56, 0.0 }
 0xaaa   : > { %1968 = vadd.xlane.f32.xlu2 %v1967_v57  ;;  %v3149_v57 = vld [vmem:[#allocation9 + $0x34] sm:$0xf] }
 0xb04   : > { %v2054_v58 = vpop.xlane.xlu0 %2053 }
 0xb05   : > { %v2055_v60 = vsub.f32 %v2051_v51, %v2054_v58  ;;  %v3152_v51 = vld [vmem:[#allocation9 + $0x44] sm:$0xf0] }
 0xb06   : > { %v2982_v53 = vor.u32 %v3152_v51, %v2981_v50 }
 0xb07   : > { %v2056_v61 = vmul.f32 1.442695, %v2055_v60  ;;  %v2975_v60 = vld [vmem:[#allocation9 + $0x38] sm:$0xf0] }
 0xb09   : > { %3305 = vpow2.f32 %v2056_v61  ;;  %v2978_v61 = vor.u32 %v3149_v57, %v2975_v60 }
 0xb0b   : > { %2269 = vmatpush.bf16.msra.mxu0 %v2978_v61 }
 0xb0f   : > { %v3306_v46 = vpop.eup %3305 }
 0xb10   : > { %v2058_v62 = vsel %vm1779_vm7, %v3306_v46, 0.0 }
 0xb11   : > { %2059 = vadd.xlane.f32.xlu1 %v2058_v62  ;;  %v3148_v62 = vld [vmem:[#allocation9 + $0x24] sm:$0xf0] }
 0xb17   : > { %v1974_v63 = vpop.permute.xlu0 %1973 }
 0xb18   : > { %1986 = vmatpush.bf16.msrb.mxu2 %v1974_v63  ;;  %v3147_v63 = vld [vmem:[#allocation9 + $0x24] sm:$0xf] }
 0xb1c   : > { %2110 = vmatpush.bf16.msra.mxu2 %v3142_v8  ;;  %v2959_v8 = vld [vmem:[#allocation9 + $0x18] sm:$0xf0] }
 0xb1d   : > { %v1969_v59 = vpop.xlane.xlu2 %1968 }
 0xb1e   : > { %3307 = vrcp.f32 %v1969_v59 }
 0xb20   : > { %2111 = vmatpush.bf16.msra.mxu2 %v3141_v16  ;;  %v3174_v16 = vld [vmem:[#allocation10 + $0x78] sm:$0xff] }
 0xb24   : > { %v3308_v0 = vpop.eup %3307 }
 0xb25   : > { %v1971_v1 = vmul.f32 %v3308_v0, %v3304_v56  ;;  %v3150_v56 = vld [vmem:[#allocation9 + $0x34] sm:$0xf0]  ;;  %v2967_v0 = vld [vmem:[#allocation9 + $0x28] sm:$0xf0] }
 0xb26   : > { %v2974_v58 = vor.u32 %v3150_v56, %v2973_v44 }
 0xb27   : > { %v1972_v2 = vpack.c.bf16 %v1971_v1, %v1971_v1  ;;  %v2970_v1 = vor.u32 %v3147_v63, %v2967_v0 }
 0xb29   : > { %2926 = vmatmul.msk.bf16.vlgmr.msrb.gmra.mxu2 %vm1779_vm7, %v1972_v2  ;;  %2270 = vmatpush.bf16.msra.mxu0 %v2970_v1  ;;  %v2957_v2 = vld [vmem:[#allocation9 + $0x10] sm:$0xf] }
 0xb2a   : > { %2064 = vrot.lane.b32.xlu1 %v3922_v55, %s3563_s5  ;;  %2427 = vmatpush.bf16.msrb.mxu2 %v3174_v16 }
 0xb84   : > { %v2060_v6 = vpop.xlane.xlu1 %2059 }
 0xb85   : > { %3309 = vrcp.f32 %v2060_v6  ;;  %v2958_v6 = vor.u32 %v3146_v4, %v2957_v2 }
 0xb8b   : > { %v3310_v9 = vpop.eup %3309 }
 0xb8c   : > { %v2062_v11 = vmul.f32 %v3310_v9, %v3306_v46  ;;  %v2965_v46 = vld [vmem:[#allocation9 + $0x20] sm:$0xf] }
 0xb8d   : > { %v2966_v59 = vor.u32 %v3148_v62, %v2965_v46  ;;  %v2949_v9 = vld [vmem:[#allocation9] sm:$0xf] }
 0xb8e   : > { %v2063_v13 = vpack.c.bf16 %v2062_v11, %v2062_v11  ;;  %v3144_v11 = vld [vmem:[#allocation9 + $0x4] sm:$0xf0]  ;;  %v3272_v46 = vld [vmem:[%s4049_s3] ss:$0 sm:$0xff] }
 0xb9c   : > { %v2065_v12 = vpop.permute.xlu1 %2064 }
 0xb9d   : > { %2077 = vmatpush.bf16.msra.mxu1 %v2065_v12  ;;  %v2962_v12 = vor.u32 %v3145_v5, %v2959_v8 }
 0xb9f   : > { %2271 = vmatpush.bf16.msra.mxu0 %v2962_v12 }
 0xba0   : > { %2937 = vmatmul.msk.bf16.vlgmr.msra.gmra.mxu1 %vm1779_vm7, %v2063_v13  ;;  %v3143_v13 = vld [vmem:[#allocation9 + $0x4] sm:$0xf] }
 0xbac   : > { %v1988_v14 = vpop.f32.mrf.mxu2 }
 0xbad   : > { %v1992_v15 = vpack.c.bf16 %v1988_v14, %v1988_v14  ;;  %v2951_v14 = vld [vmem:[#allocation9 + $0x8] sm:$0xf0] }
 0xbaf   : > { %2935 = vmatmul.msk.bf16.vlgmr.msrb.gmra.mxu3 %vm1119_vm0, %v1992_v15  ;;  %v2950_v15 = vor.u32 %v3144_v11, %v2949_v9 }
 0xbb4   : > { %v1990_v55 = vpop.f32.mrf.mxu2 }
 0xbb5   : > { %v2954_v55 = vor.u32 %v3143_v13, %v2951_v14 }
 0xbb7   : > { %2272 = vmatpush.bf16.msra.mxu0 %v2954_v55 }
 0xc1d   : > { %v2079_v17 = vpop.f32.mrf.mxu1 }
 0xc1e   : > { %v2083_v18 = vpack.c.bf16 %v2079_v17, %v2079_v17  ;;  %v3166_v17 = vld [vmem:[#allocation10 + $0x38] sm:$0xff] }
 0xc1f   : > { %2414 = vmatpush.bf16.msrb.mxu1 %v3166_v17 }
 0xc20   : > { %2946 = vmatmul.msk.bf16.vlgmr.msra.gmra.mxu2 %vm1119_vm0, %v2083_v18 }
 0xc25   : > { %v2081_v19 = vpop.f32.mrf.mxu1 }
 0xc32   : > { %v2022_v20 = vpop.f32.mrf.mxu3 }
 0xc33   : > { %v2026_v3 = vadd.f32 %v2022_v20, %v1935_v47  ;;  %v2990_v47 = vor.u32 %v3154_v43, %v2989_v42  ;;  %v3173_v20 = vld [vmem:[#allocation10 + $0x70] sm:$0xff]  ;;  %v3168_v43 = vld [vmem:[#allocation10 + $0x48] sm:$0xff] }
 0xc34   : > { %2428 = vmatpush.bf16.msrb.mxu2 %v3173_v20 }
 0xc3a   : > { %v2024_v21 = vpop.f32.mrf.mxu3 }
 0xca3   : > { %v2113_v22 = vpop.f32.mrf.mxu2 }
 0xca4   : > { %v2117_v23 = vadd.f32 %v2113_v22, %v2026_v3  ;;  %v3165_v3 = vld [vmem:[#allocation10 + $0x30] sm:$0xff]  ;;  %v3172_v22 = vld [vmem:[#allocation10 + $0x68] sm:$0xff] }
 0xca5   : > { %2415 = vmatpush.bf16.msrb.mxu1 %v3165_v3  ;;  %2429 = vmatpush.bf16.msrb.mxu2 %v3172_v22  ;;  %v3274_v3 = vld [vmem:[#allocation12] ss:$0 sm:$0xff] }
 0xca6   : > { %v2118_v10 = vadd.f32 %v2117_v23, %v3895_v7  ;;  %v2997_v7 = vld [vmem:[#allocation9 + $0x60] sm:$0xf]  ;;  %v3164_v23 = vld [vmem:[#allocation10 + $0x28] sm:$0xff] }
 0xca7   : > { %v2998_v40 = vor.u32 %v3156_v38, %v2997_v7  ;;  %v3270_v7 = vld [vmem:[%s4014_s20] ss:$0 sm:$0xff] }
 0xca8   : > { %2119 = vadd.xlane.f32.xlu2 %v2118_v10 }
 0xca9   : > { %2253 = vmatpush.bf16.msra.mxu3 %v2998_v40  ;;  %2416 = vmatpush.bf16.msrb.mxu1 %v3164_v23  ;;  %v3271_v40 = vld [vmem:[%s4015_s21] ss:$0 sm:$0xff] }
 0xcab   : > { %v2115_v24 = vpop.f32.mrf.mxu2 }
 0xcac   : > { %v3163_v24 = vld [vmem:[#allocation10 + $0x20] sm:$0xff] }
 0xcad   : > { %2254 = vmatpush.bf16.msra.mxu3 %v2990_v47  ;;  %2417 = vmatpush.bf16.msrb.mxu1 %v3163_v24  ;;  %v3167_v47 = vld [vmem:[#allocation10 + $0x40] sm:$0xff] }
 0xcb1   : > { %2255 = vmatpush.bf16.msra.mxu3 %v2982_v53  ;;  %2418 = vmatpush.bf16.msrb.mxu1 %v3162_v29 }
 0xcb5   : > { %2256 = vmatpush.bf16.msra.mxu3 %v2974_v58  ;;  %2419 = vmatpush.bf16.msrb.mxu1 %v3161_v45 }
 0xcb9   : > { %2257 = vmatpush.bf16.msra.mxu3 %v2966_v59  ;;  %2420 = vmatpush.bf16.msrb.mxu1 %v3160_v48 }
 0xcbd   : > { %2258 = vmatpush.bf16.msra.mxu3 %v2958_v6  ;;  %2421 = vmatpush.bf16.msrb.mxu1 %v3159_v49 }
 0xcc1   : > { %2259 = vmatpush.bf16.msra.mxu3 %v2950_v15 }
 0xd1b   : > { %v2120_v33 = vpop.xlane.xlu2 %2119 }
 0xd1c   : > { %v2121_v34 = vmul.f32 %v2120_v33, %v3872_v36  ;;  %v3169_v33 = vld [vmem:[#allocation10 + $0x50] sm:$0xff] }
 0xd1e   : > { %v3964_v35 = vsub.f32 %v2118_v10, %v2121_v34  ;;  %v3171_v10 = vld [vmem:[#allocation10 + $0x60] sm:$0xff] }
 0xd1f   : > { %2430 = vmatpush.bf16.msrb.mxu2 %v3171_v10 }
 0xd20   : > { %v2123_v37 = vmul.f32 %v3964_v35, %v3964_v35 }
 0xd22   : > { %2124 = vadd.xlane.f32.xlu2 %v2123_v37 }
 0xd23   : > { %2431 = vmatpush.bf16.msrb.mxu2 %v3170_v28 }
 0xd27   : > { %2432 = vmatpush.bf16.msrb.mxu2 %v3169_v33 }
 0xd2b   : > { %2433 = vmatpush.bf16.msrb.mxu2 %v3168_v43 }
 0xd2f   : > { %2434 = vmatpush.bf16.msrb.mxu2 %v3167_v47 }
 0xd95   : > { %v2125_v18 = vpop.xlane.xlu2 %2124 }
 0xd96   : > { %v2126_v19 = vmul.f32 %v2125_v18, %v3872_v36 }
 0xd98   : > { %v2127_v21 = vadd.f32 1e-05, %v2126_v19  ;;  %v3273_v19 = vld [vmem:[%s4050_s27] ss:$0 sm:$0xff] }
 0xd9a   : > { %3311 = vrsqrt.f32 %v2127_v21  ;;  %vm2134_vm9 = vweird.f32 %v2127_v21 }
 0xda0   : > { %v3312_v26 = vpop.eup %3311 }
 0xda1   : > { %v2129_v27 = vmul.f32 %v3312_v26, %v2127_v21  ;;  %vm2135_vm8 = vweird.f32 %v3312_v26 }
 0xda2   : > { %vm2136_vm10 = vmor %vm2134_vm9, %vm2135_vm8 }
 0xda3   : > { %v2130_v30 = vmul.f32 %v3312_v26, %v2129_v27 }
 0xda5   : > { %v2131_v32 = vmul.f32 0.5, %v2130_v30 }
 0xda7   : > { %v2132_v34 = vsub.f32 1.5, %v2131_v32 }
 0xda9   : > { %v2133_v37 = vmul.f32 %v3312_v26, %v2132_v34 }
 0xdab   : > { %v2137_v38 = vsel %vm2136_vm10, %v3312_v26, %v2133_v37 }
 0xdac   : > { %v2138_v39 = vmul.f32 %v2137_v38, %v3964_v35  ;;  %v2166_v35 = vld [vmem:[%s4009_s15] sm:$0x3] }
 0xdad   : > { %v2169_v50 = vperm.slane %v2166_v35, 1  ;;  %v2168_v54 = vperm.slane %v2166_v35, 0 }
 0xdae   : > { %v2143_v41 = vmul.f32 %v3270_v7, %v2138_v39 }
 0xdb0   : > { %v2148_v31 = vadd.f32 %v3271_v40, %v2143_v41 }
 0xdb2   : > { %v2149_v42 = vpack.c.bf16 %v2148_v31, %v2148_v31 }
 0xdb4   : > { %2260 = vmatmul.bf16.vlgmr.msra.gmra.mxu3 %v2149_v42  ;;  %2273 = vmatmul.bf16.vlgmr.msra.gmra.mxu0 %v2149_v42 }
 0xe31   : > { %v2274_v51 = vpop.f32.mrf.mxu0 }
 0xe32   : > { %v2275_v52 = vadd.f32 %v2274_v51, %v2169_v50 }
 0xe34   : > { %v2279_v53 = vmax.f32 %v2275_v52, 0.0 }
 0xe36   : > { %v2281_v25 = vpack.c.bf16 %v2279_v53, %v2279_v53 }
 0xe37   : > { %v2261_v44 = vpop.f32.mrf.mxu3 }
 0xe38   : > { %v2262_v56 = vadd.f32 %v2261_v44, %v2168_v54  ;;  %2435 = vmatmul.bf16.vlgmr.msrb.gmra.mxu2 %v2281_v25 }
 0xe39   : > { %v2276_v57 = vpop.f32.mrf.mxu0 }
 0xe3a   : > { %v2278_v58 = vmax.f32 %v2262_v56, 0.0 }
 0xe3c   : > { %v2280_v60 = vpack.c.bf16 %v2278_v58, %v2278_v58 }
 0xe3e   : > { %2422 = vmatmul.bf16.vlgmr.msrb.gmra.mxu1 %v2280_v60 }
 0xe3f   : > { %v2263_v61 = vpop.f32.mrf.mxu3 }
 0xebb   : > { %v2423_v62 = vpop.f32.mrf.mxu1  ;;  %v2436_v63 = vpop.f32.mrf.mxu2 }
 0xebc   : > { %v2424_v59 = vadd.f32 %v3272_v46, %v2423_v62 }
 0xebe   : > { %v2437_v0 = vadd.f32 %v2436_v63, %v2424_v59 }
 0xec0   : > { %v2440_v1 = vadd.f32 %v2437_v0, %v2148_v31 }
 0xec2   : > { %2441 = vadd.xlane.f32.xlu0 %v2440_v1 }
 0xec3   : > { %v2425_v2 = vpop.f32.mrf.mxu1  ;;  %v2438_v4 = vpop.f32.mrf.mxu2 }
 0xf35   : > { %v2442_v5 = vpop.xlane.xlu0 %2441 }
 0xf36   : > { %v2443_v6 = vmul.f32 %v2442_v5, %v3872_v36 }
 0xf38   : > { %v2444_v8 = vsub.f32 %v2440_v1, %v2443_v6 }
 0xf3a   : > { %v2445_v9 = vmul.f32 %v2444_v8, %v2444_v8 }
 0xf3c   : > { %2446 = vadd.xlane.f32.xlu2 %v2445_v9 }
 0xfaf   : > { %v2447_v11 = vpop.xlane.xlu2 %2446 }
 0xfb0   : > { %v2448_v12 = vmul.f32 %v2447_v11, %v3872_v36 }
 0xfb2   : > { %v2449_v13 = vadd.f32 1e-05, %v2448_v12 }
 0xfb4   : > { %3313 = vrsqrt.f32 %v2449_v13  ;;  %vm2456_vm12 = vweird.f32 %v2449_v13 }
 0xfba   : > { %v3314_v14 = vpop.eup %3313 }
 0xfbb   : > { %v2451_v15 = vmul.f32 %v3314_v14, %v2449_v13  ;;  %vm2457_vm11 = vweird.f32 %v3314_v14 }
 0xfbc   : > { %vm2458_vm13 = vmor %vm2456_vm12, %vm2457_vm11 }
 0xfbd   : > { %v2452_v55 = vmul.f32 %v3314_v14, %v2451_v15 }
 0xfbf   : > { %v2453_v16 = vmul.f32 0.5, %v2452_v55 }
 0xfc1   : > { %v2454_v17 = vsub.f32 1.5, %v2453_v16 }
 0xfc3   : > { %v2455_v18 = vmul.f32 %v3314_v14, %v2454_v17 }
 0xfc5   : > { %v2459_v20 = vsel %vm2458_vm13, %v3314_v14, %v2455_v18 }
 0xfc6   : > { %v2460_v21 = vmul.f32 %v2459_v20, %v2444_v8 }
 0xfc8   : > { %v2465_v36 = vmul.f32 %v3273_v19, %v2460_v21 }
 0xfca   : > { %v2470_v22 = vadd.f32 %v3274_v3, %v2465_v36 }
 0xfcc   : > { %2471 = vst [vmem:[%s897_s25] sm:$0xff] %v2470_v22 }
 0xfcd PF: > { %s4052_s2 = sld [smem:[#allocation17_spill]] }
 0xfd3   : > { %s38_s5 = sadd.s32 1, %s4052_s2  }
 0xfd4   : > { %p35_p7 = scmp.ge.s32.totalorder %s38_s5, 4  }
 0xfd6   :  { %37 = sbr.rel (!%p35_p7) target bundleno = 19 (0x13), region = 190 }
 0xfdb   :  { %2491 = vsyncpa [#allocation3], 1 }
 0xfdc   :  { %2493 = vsyncpa [#allocation3 + $0x1], 1 }
 0xfdd   :  { %2494 = vsyncpa [#allocation5], 1 }
 0xfde   :  { %2495 = vsyncpa [#allocation8], 1 }
 0xfdf   :  { %2496 = vsyncpa [#allocation11], 1 }

</bundles_post_ra>
